<compile_context>
chip_gen: v5e
topology: v5e:2x2
jax: 0.10.0
libtpu: 0.0.40
codegen_flags: <defaults>
</compile_context>

<pallas_src>
import numpy as np
import jax
import jax.numpy as jnp
from jax.experimental import pallas as pl
from jax.experimental.pallas import tpu as pltpu


TB = 8  # images per grid step (batch is zero-padded up to a multiple of TB)


# ---------------------------------------------------------------------------
# Fused kernel: one grid step per TB images.
#   x_ref    : (32, TB, 96)   f32  rows = permuted row positions, lanes = 3 dy taps
#   w1_ref   : (96, 512)      bf16 banded conv1 weights, output columns permuted
#   s1_ref   : (1, 512)       f32  conv1 BN shift (zero on padded pooled columns)
#   w2_ref   : (768, 256)     bf16 banded conv2 weights, 3 dy taps stacked (K=768)
#   s2_ref   : (1, 256)       f32  conv2 BN shift
#   wl_ref   : (3584, 128)    bf16 classifier weight, rows = h*256 + w*16 + c
#   bl_ref   : (1, 128)       f32  classifier bias (N padded 14 -> 128)
#   feat_ref : (16, TB, 256)  f32  conv2 activation, [h, b, w*16+c]
#   out_ref  : (TB, 128)      f32  one row of logits per image (lane-dense)
# ---------------------------------------------------------------------------
def _fused_kernel(x_ref, w1_ref, s1_ref, w2_ref, s2_ref, wl_ref, bl_ref,
                  feat_ref, out_ref):
    f32, bf16 = jnp.float32, jnp.bfloat16
    tb = x_ref.shape[1]

    # ---- Conv1 (+ folded BN) + ReLU: one banded matmul, M = 32*TB ------------
    x = x_ref[...].reshape(32 * tb, 96).astype(bf16)
    o1 = jnp.dot(x, w1_ref[...], preferred_element_type=f32)        # (32*tb, 512)
    o1 = jnp.maximum(o1 + s1_ref[...], 0.0).reshape(32, tb, 512)

    # ---- MaxPool 2x2: both halves are pure VPU maxes (no selection matmuls) --
    cm = jnp.maximum(o1[..., :256], o1[..., 256:])                  # cols (32,tb,256)
    pr = jnp.maximum(cm[:16], cm[16:])                              # rows (16,tb,256)

    # Row positions 14,15 came from zero input rows -> ReLU(shift) garbage;
    # zero them so conv2's row banding sees proper zero padding, then build the
    # +/-1 row taps as leading-dim shifts.
    z1 = jnp.zeros((1, tb, 256), f32)
    z2 = jnp.zeros((2, tb, 256), f32)
    p = jnp.concatenate([pr[:14], z2], axis=0)                      # pooled (16,tb,256)
    t0 = jnp.concatenate([z1, p[:15]], axis=0)                      # pooled[i-1]
    t2 = jnp.concatenate([p[1:], z1], axis=0)                       # pooled[i+1]
    taps = jnp.concatenate([t0, p, t2], axis=-1)                    # (16,tb,768)

    # ---- Conv2 (+ folded BN) + ReLU: single K=768 banded matmul, M = 16*TB ---
    taps2 = taps.reshape(16 * tb, 768).astype(bf16)
    o2 = jnp.dot(taps2, w2_ref[...], preferred_element_type=f32)    # (16*tb, 256)
    o2 = jnp.maximum(o2 + s2_ref[...], 0.0).reshape(16, tb, 256)
    feat_ref[...] = o2

    # ---- Classifier Linear(3136 -> 14): ONE matmul with M = TB ---------------
    # Leading-dim slices are free; lane-concat gives K = 14*256 = 3584.
    cls_in = jnp.concatenate([o2[h] for h in range(14)], axis=-1)   # (tb, 3584)
    logits = jnp.dot(cls_in.astype(bf16), wl_ref[...],
                     preferred_element_type=f32) + bl_ref[...]      # (tb, 128)
    out_ref[...] = logits


# ---------------------------------------------------------------------------
# One-time parameter folding / repacking (BN fold, banded conv weights with the
# pool column permutation, stacked conv2 taps, permuted classifier weight).
# ---------------------------------------------------------------------------
def prepare_params(params, eps=1e-5):
    f32, bf16 = jnp.float32, jnp.bfloat16

    g1, be1, m1, v1 = params["bn1"]
    sc1 = g1 / jnp.sqrt(v1 + eps)
    sh1 = (params["b1"] - m1) * sc1 + be1
    g2, be2, m2, v2 = params["bn2"]
    sc2 = g2 / jnp.sqrt(v2 + eps)
    sh2 = (params["b2"] - m2) * sc2 + be2

    # Conv1 banded weights (BN scale folded): col w*16+c, row dy*32+j, j=w+dx-1.
    w1eff = jnp.transpose(params["w1_oihw"][:, 0, :, :], (1, 2, 0)) * sc1[None, None, :]
    blocks = []
    for dy in range(3):
        blk = sum(jnp.kron(jnp.eye(32, k=1 - dx, dtype=f32),
                           w1eff[dy, dx].reshape(1, 16)) for dx in range(3))
        blocks.append(blk)
    w1_full = jnp.concatenate(blocks, axis=0).reshape(96, 32, 16)    # cols = [w, c]

    # Column permutation that deletes the pool-selection matmul: even output
    # columns (pooled order) -> lanes [0,256), odd -> [256,512); pooled columns
    # 14,15 are zero so conv2's column banding sees zero padding.
    zc = jnp.zeros((96, 2, 16), f32)
    w1 = jnp.concatenate([w1_full[:, 0:28:2, :], zc,
                          w1_full[:, 1:28:2, :], zc],
                         axis=1).reshape(96, 512).astype(bf16)
    s1_half = jnp.concatenate([jnp.tile(sh1, 14), jnp.zeros((32,), f32)])
    s1 = jnp.concatenate([s1_half, s1_half]).reshape(1, 512).astype(f32)

    # Conv2 banded weights with the 3 dy taps stacked into one K=768 matmul.
    w2eff = jnp.transpose(params["w2_oihw"], (2, 3, 1, 0)) * sc2[None, None, None, :]
    w2 = jnp.concatenate(
        [sum(jnp.kron(jnp.eye(16, k=1 - dx, dtype=f32), w2eff[dy, dx]) for dx in range(3))
         for dy in range(3)], axis=0).astype(bf16)                    # (768, 256)
    s2 = jnp.tile(sh2, 16).reshape(1, 256).astype(f32)

    # Classifier weight permuted to rows h*256 + w*16 + c (w=14,15 zero), N 14->128.
    wl_r = jnp.transpose(params["wl"].reshape(14, 16, 14, 14), (2, 3, 1, 0))  # [h,w,c,n]
    wl = jnp.pad(wl_r, ((0, 0), (0, 2), (0, 0), (0, 114))).reshape(14 * 256, 128).astype(bf16)
    bl = jnp.pad(params["bl"], (0, 114)).reshape(1, 128).astype(f32)

    return dict(w1=w1, s1=s1, w2=w2, s2=s2, wl=wl, bl=bl)


# Row-position permutation fed to the kernel: positions 0..13 hold even conv
# output rows (0,2,..,26), 16..29 hold odd rows (1,3,..,27); 14,15,30,31 zero.
_ROW_SRC = np.full(32, 30, dtype=np.int32)
_ROW_SRC[:14] = 2 * np.arange(14)
_ROW_SRC[16:30] = 2 * np.arange(14) + 1


# ---------------------------------------------------------------------------
# Forward wrapper: tiny input prep, ONE pallas_call, tiny output reordering.
# ---------------------------------------------------------------------------
@jax.jit
def forward(x_nchw, prep):
    B = x_nchw.shape[0]
    Bp = ((B + TB - 1) // TB) * TB
    nblk = Bp // TB

    # Input prep (tiny, XLA): zero-pad, gather the 3 dy-shifted row sets in the
    # kernel's permuted row order, lane-concatenate -> (32, Bp, 96).
    # TODO(synk): could be folded into the kernel for latency-sensitive tiny batches.
    img = x_nchw[:, 0, :, :].astype(jnp.float32)
    img = jnp.pad(img, ((0, Bp - B), (0, 0), (0, 0)))
    imgp = jnp.pad(img, ((0, 0), (1, 4), (0, 4)))                    # (Bp, 33, 32)
    x_cat = jnp.concatenate([imgp[:, _ROW_SRC + dy, :] for dy in range(3)], axis=2)
    x_cat = jnp.transpose(x_cat, (1, 0, 2))                          # (32, Bp, 96)

    feat, logits = pl.pallas_call(
        _fused_kernel,
        grid=(nblk,),
        in_specs=[
            pl.BlockSpec((32, TB, 96), lambda i: (0, i, 0)),
            pl.BlockSpec((96, 512), lambda i: (0, 0)),
            pl.BlockSpec((1, 512), lambda i: (0, 0)),
            pl.BlockSpec((768, 256), lambda i: (0, 0)),
            pl.BlockSpec((1, 256), lambda i: (0, 0)),
            pl.BlockSpec((3584, 128), lambda i: (0, 0)),
            pl.BlockSpec((1, 128), lambda i: (0, 0)),
        ],
        out_specs=[
            pl.BlockSpec((16, TB, 256), lambda i: (0, i, 0)),
            pl.BlockSpec((TB, 128), lambda i: (i, 0)),
        ],
        out_shape=[
            jax.ShapeDtypeStruct((16, Bp, 256), jnp.float32),
            jax.ShapeDtypeStruct((Bp, 128), jnp.float32),
        ],
        compiler_params=pltpu.CompilerParams(
            dimension_semantics=("parallel",)),      # both TensorCores on v7x
    )(x_cat, prep["w1"], prep["s1"], prep["w2"], prep["s2"], prep["wl"], prep["bl"])

    # Output plumbing: crop batch padding / padded rows+cols, reorder to the
    # PyTorch NCHW flatten (required return value), crop the padded logits.
    h2 = jnp.transpose(feat[:, :B], (1, 0, 2)).reshape(B, 16, 16, 16)[:, :14, :14, :]
    y = jnp.transpose(h2, (0, 3, 1, 2)).reshape(B, 16 * 14 * 14)
    out = logits[:B, :14]
    return y, out


# ---------------------------------------------------------------------------
# Deterministic parameters and a plain-JAX reference for the numerical check.
# ---------------------------------------------------------------------------
def init_params(key):
    ks = jax.random.split(key, 12)
    f32 = jnp.float32
    p = {}
    p["w1_oihw"] = 0.1 * jax.random.normal(ks[0], (16, 1, 3, 3), f32)
    p["b1"] = 0.01 * jax.random.normal(ks[1], (16,), f32)
    p["bn1"] = (1.0 + 0.05 * jax.random.normal(ks[2], (16,), f32),   # gamma
                0.01 * jax.random.normal(ks[3], (16,), f32),         # beta
                0.05 * jax.random.normal(ks[4], (16,), f32),         # running_mean
                1.0 + 0.1 * jax.random.uniform(ks[5], (16,), f32))   # running_var
    p["w2_oihw"] = 0.1 * jax.random.normal(ks[6], (16, 16, 3, 3), f32)
    p["b2"] = 0.01 * jax.random.normal(ks[7], (16,), f32)
    p["bn2"] = (1.0 + 0.05 * jax.random.normal(ks[8], (16,), f32),
                0.01 * jax.random.normal(ks[9], (16,), f32),
                jnp.zeros((16,), f32),
                jnp.ones((16,), f32))
    p["wl"] = 0.02 * jax.random.normal(ks[10], (14, 16 * 14 * 14), f32)
    p["bl"] = 0.01 * jax.random.normal(ks[11], (14,), f32)
    return p


def reference_forward(x_nchw, params, eps=1e-5):
    x = jnp.transpose(x_nchw, (0, 2, 3, 1)).astype(jnp.float32)      # NHWC

    def conv_bn_relu(h, w_oihw, bias, bn):
        gamma, beta, mean, var = bn
        B, H, W, _ = h.shape
        hp = jnp.pad(h, ((0, 0), (1, 1), (1, 1), (0, 0)))
        z = jnp.zeros((B, H, W, w_oihw.shape[0]), jnp.float32)
        for dy in range(3):
            for dx in range(3):
                z = z + jnp.einsum("bhwc,oc->bhwo",
                                   hp[:, dy:dy + H, dx:dx + W, :],
                                   w_oihw[:, :, dy, dx])
        z = (z + bias - mean) / jnp.sqrt(var + eps) * gamma + beta
        return jnp.maximum(z, 0.0)

    h = conv_bn_relu(x, params["w1_oihw"], params["b1"], params["bn1"])   # (B,28,28,16)
    B = h.shape[0]
    h = h.reshape(B, 14, 2, 14, 2, 16).max(axis=(2, 4))                   # maxpool 2x2
    h = conv_bn_relu(h, params["w2_oihw"], params["b2"], params["bn2"])   # (B,14,14,16)
    y = jnp.transpose(h, (0, 3, 1, 2)).reshape(B, -1)                     # NCHW flatten
    out = y @ params["wl"].T + params["bl"]
    return y, out


if __name__ == "__main__":
    key = jax.random.PRNGKey(0)
    kx, kp = jax.random.split(key)
    params = init_params(kp)
    prep = prepare_params(params)        # one-time weight folding / repacking

    # B=16 exercises batch blocking with a 2-step grid (both v7x TCs);
    # B=5 exercises the batch-padding / cropping path.
    for B in (16, 5):
        x = jax.random.normal(jax.random.fold_in(kx, B), (B, 1, 28, 28), jnp.float32)
        y, out = forward(x, prep)
        jax.block_until_ready((y, out))

        assert y.shape == (B, 16 * 14 * 14) and out.shape == (B, 14)
        assert bool(jnp.all(jnp.isfinite(y))) and bool(jnp.all(jnp.isfinite(out)))

        # Numerical self-check against a plain-JAX f32 reference (kernel uses
        # bf16 matmul operands with f32 accumulation -> ~1% expected error).
        y_r, out_r = reference_forward(x, params)
        y_err = float(jnp.max(jnp.abs(y - y_r)))
        o_err = float(jnp.max(jnp.abs(out - out_r)))
        y_tol = 0.05 * float(jnp.max(jnp.abs(y_r))) + 1e-2
        o_tol = 0.05 * float(jnp.max(jnp.abs(out_r))) + 1e-2
        assert y_err <= y_tol, ("feature mismatch", B, y_err, y_tol)
        assert o_err <= o_tol, ("logit mismatch", B, o_err, o_tol)

    print("KERNEL_OK")
</pallas_src>

<mosaic_0001>
module attributes {stable_mosaic.version = 11 : i64} {
  func.func @_fused_kernel(%arg0: i32, %arg1: memref<32x8x96xf32, #tpu.memory_space<vmem>>, %arg2: memref<96x512xbf16, #tpu.memory_space<vmem>>, %arg3: memref<1x512xf32, #tpu.memory_space<vmem>>, %arg4: memref<768x256xbf16, #tpu.memory_space<vmem>>, %arg5: memref<1x256xf32, #tpu.memory_space<vmem>>, %arg6: memref<3584x128xbf16, #tpu.memory_space<vmem>>, %arg7: memref<1x128xf32, #tpu.memory_space<vmem>>, %arg8: memref<16x8x256xf32, #tpu.memory_space<vmem>>, %arg9: memref<8x128xf32, #tpu.memory_space<vmem>>) attributes {dimension_semantics = [#tpu.dimension_semantics<parallel>], iteration_bounds = array<i64: 2>, scalar_prefetch = 0 : i64, scratch_operands = 0 : i64, tpu.core_type = #tpu.core_type<tc>, window_params = [{transform_indices = @transform_0, window_bounds = array<i64: 32, 8, 96>}, {pipeline_mode = #tpu.pipeline_mode<synchronous>, transform_indices = @transform_1, window_bounds = array<i64: 96, 512>}, {pipeline_mode = #tpu.pipeline_mode<synchronous>, transform_indices = @transform_2, window_bounds = array<i64: 1, 512>}, {pipeline_mode = #tpu.pipeline_mode<synchronous>, transform_indices = @transform_3, window_bounds = array<i64: 768, 256>}, {pipeline_mode = #tpu.pipeline_mode<synchronous>, transform_indices = @transform_4, window_bounds = array<i64: 1, 256>}, {pipeline_mode = #tpu.pipeline_mode<synchronous>, transform_indices = @transform_5, window_bounds = array<i64: 3584, 128>}, {pipeline_mode = #tpu.pipeline_mode<synchronous>, transform_indices = @transform_6, window_bounds = array<i64: 1, 128>}, {transform_indices = @transform_7, window_bounds = array<i64: 16, 8, 256>}, {transform_indices = @transform_8, window_bounds = array<i64: 8, 128>}]} {
    %c0 = arith.constant 0 : index
    %c0_0 = arith.constant 0 : index
    %c0_1 = arith.constant 0 : index
    %0 = vector.load %arg1[%c0, %c0_0, %c0_1] : memref<32x8x96xf32, #tpu.memory_space<vmem>>, vector<32x8x96xf32>
    %1 = vector.shape_cast %0 : vector<32x8x96xf32> to vector<256x96xf32>
    %2 = arith.truncf %1 : vector<256x96xf32> to vector<256x96xbf16>
    %c0_2 = arith.constant 0 : index
    %c0_3 = arith.constant 0 : index
    %3 = vector.load %arg2[%c0_2, %c0_3] : memref<96x512xbf16, #tpu.memory_space<vmem>>, vector<96x512xbf16>
    %cst = arith.constant dense<0.000000e+00> : vector<256x512xf32>
    %4 = tpu.matmul %2, %3, %cst {dimension_numbers = #tpu.dot_dimension_numbers<[1], [0], [0], [1], [0, 0, 1, 1], [], []>} : vector<256x96xbf16>, vector<96x512xbf16>, vector<256x512xf32> -> vector<256x512xf32>
    %c0_4 = arith.constant 0 : index
    %c0_5 = arith.constant 0 : index
    %5 = vector.load %arg3[%c0_4, %c0_5] : memref<1x512xf32, #tpu.memory_space<vmem>>, vector<1x512xf32>
    %6 = vector.broadcast %5 : vector<1x512xf32> to vector<256x512xf32>
    %7 = arith.addf %4, %6 : vector<256x512xf32>
    %cst_6 = arith.constant 0.000000e+00 : f32
    %8 = vector.broadcast %cst_6 : f32 to vector<256x512xf32>
    %9 = arith.maximumf %7, %8 : vector<256x512xf32>
    %10 = vector.shape_cast %9 : vector<256x512xf32> to vector<32x8x512xf32>
    %11 = vector.extract_strided_slice %10 {offsets = [0, 0, 0], sizes = [32, 8, 256], strides = [1, 1, 1]} : vector<32x8x512xf32> to vector<32x8x256xf32>
    %12 = vector.extract_strided_slice %10 {offsets = [0, 0, 256], sizes = [32, 8, 256], strides = [1, 1, 1]} : vector<32x8x512xf32> to vector<32x8x256xf32>
    %13 = arith.maximumf %11, %12 : vector<32x8x256xf32>
    %14 = vector.extract_strided_slice %13 {offsets = [0, 0, 0], sizes = [16, 8, 256], strides = [1, 1, 1]} : vector<32x8x256xf32> to vector<16x8x256xf32>
    %15 = vector.extract_strided_slice %13 {offsets = [16, 0, 0], sizes = [16, 8, 256], strides = [1, 1, 1]} : vector<32x8x256xf32> to vector<16x8x256xf32>
    %16 = arith.maximumf %14, %15 : vector<16x8x256xf32>
    %cst_7 = arith.constant 0.000000e+00 : f32
    %17 = vector.broadcast %cst_7 : f32 to vector<1x8x256xf32>
    %cst_8 = arith.constant 0.000000e+00 : f32
    %18 = vector.broadcast %cst_8 : f32 to vector<2x8x256xf32>
    %19 = vector.extract_strided_slice %16 {offsets = [0, 0, 0], sizes = [14, 8, 256], strides = [1, 1, 1]} : vector<16x8x256xf32> to vector<14x8x256xf32>
    %20 = tpu.concatenate %19, %18 in 0 : vector<14x8x256xf32>, vector<2x8x256xf32> -> vector<16x8x256xf32>
    %21 = vector.extract_strided_slice %20 {offsets = [0, 0, 0], sizes = [15, 8, 256], strides = [1, 1, 1]} : vector<16x8x256xf32> to vector<15x8x256xf32>
    %22 = tpu.concatenate %17, %21 in 0 : vector<1x8x256xf32>, vector<15x8x256xf32> -> vector<16x8x256xf32>
    %23 = vector.extract_strided_slice %20 {offsets = [1, 0, 0], sizes = [15, 8, 256], strides = [1, 1, 1]} : vector<16x8x256xf32> to vector<15x8x256xf32>
    %24 = tpu.concatenate %23, %17 in 0 : vector<15x8x256xf32>, vector<1x8x256xf32> -> vector<16x8x256xf32>
    %25 = tpu.concatenate %22, %20, %24 in 2 : vector<16x8x256xf32>, vector<16x8x256xf32>, vector<16x8x256xf32> -> vector<16x8x768xf32>
    %26 = vector.shape_cast %25 : vector<16x8x768xf32> to vector<128x768xf32>
    %27 = arith.truncf %26 : vector<128x768xf32> to vector<128x768xbf16>
    %c0_9 = arith.constant 0 : index
    %c0_10 = arith.constant 0 : index
    %28 = vector.load %arg4[%c0_9, %c0_10] : memref<768x256xbf16, #tpu.memory_space<vmem>>, vector<768x256xbf16>
    %cst_11 = arith.constant dense<0.000000e+00> : vector<128x256xf32>
    %29 = tpu.matmul %27, %28, %cst_11 {dimension_numbers = #tpu.dot_dimension_numbers<[1], [0], [0], [1], [0, 0, 1, 1], [], []>} : vector<128x768xbf16>, vector<768x256xbf16>, vector<128x256xf32> -> vector<128x256xf32>
    %c0_12 = arith.constant 0 : index
    %c0_13 = arith.constant 0 : index
    %30 = vector.load %arg5[%c0_12, %c0_13] : memref<1x256xf32, #tpu.memory_space<vmem>>, vector<1x256xf32>
    %31 = vector.broadcast %30 : vector<1x256xf32> to vector<128x256xf32>
    %32 = arith.addf %29, %31 : vector<128x256xf32>
    %cst_14 = arith.constant 0.000000e+00 : f32
    %33 = vector.broadcast %cst_14 : f32 to vector<128x256xf32>
    %34 = arith.maximumf %32, %33 : vector<128x256xf32>
    %35 = vector.shape_cast %34 : vector<128x256xf32> to vector<16x8x256xf32>
    %c0_15 = arith.constant 0 : index
    %c0_16 = arith.constant 0 : index
    %c0_17 = arith.constant 0 : index
    %36 = vector.load %arg8[%c0_15, %c0_16, %c0_17] : memref<16x8x256xf32, #tpu.memory_space<vmem>>, vector<16x8x256xf32>
    tpu.vector_store %arg8[%c0_15, %c0_16, %c0_17], %35 {strides = array<i32>} : memref<16x8x256xf32, #tpu.memory_space<vmem>>, vector<16x8x256xf32>,
    %37 = vector.extract_strided_slice %35 {offsets = [0, 0, 0], sizes = [1, 8, 256], strides = [1, 1, 1]} : vector<16x8x256xf32> to vector<1x8x256xf32>
    %38 = vector.shape_cast %37 : vector<1x8x256xf32> to vector<8x256xf32>
    %39 = vector.extract_strided_slice %35 {offsets = [1, 0, 0], sizes = [1, 8, 256], strides = [1, 1, 1]} : vector<16x8x256xf32> to vector<1x8x256xf32>
    %40 = vector.shape_cast %39 : vector<1x8x256xf32> to vector<8x256xf32>
    %41 = vector.extract_strided_slice %35 {offsets = [2, 0, 0], sizes = [1, 8, 256], strides = [1, 1, 1]} : vector<16x8x256xf32> to vector<1x8x256xf32>
    %42 = vector.shape_cast %41 : vector<1x8x256xf32> to vector<8x256xf32>
    %43 = vector.extract_strided_slice %35 {offsets = [3, 0, 0], sizes = [1, 8, 256], strides = [1, 1, 1]} : vector<16x8x256xf32> to vector<1x8x256xf32>
    %44 = vector.shape_cast %43 : vector<1x8x256xf32> to vector<8x256xf32>
    %45 = vector.extract_strided_slice %35 {offsets = [4, 0, 0], sizes = [1, 8, 256], strides = [1, 1, 1]} : vector<16x8x256xf32> to vector<1x8x256xf32>
    %46 = vector.shape_cast %45 : vector<1x8x256xf32> to vector<8x256xf32>
    %47 = vector.extract_strided_slice %35 {offsets = [5, 0, 0], sizes = [1, 8, 256], strides = [1, 1, 1]} : vector<16x8x256xf32> to vector<1x8x256xf32>
    %48 = vector.shape_cast %47 : vector<1x8x256xf32> to vector<8x256xf32>
    %49 = vector.extract_strided_slice %35 {offsets = [6, 0, 0], sizes = [1, 8, 256], strides = [1, 1, 1]} : vector<16x8x256xf32> to vector<1x8x256xf32>
    %50 = vector.shape_cast %49 : vector<1x8x256xf32> to vector<8x256xf32>
    %51 = vector.extract_strided_slice %35 {offsets = [7, 0, 0], sizes = [1, 8, 256], strides = [1, 1, 1]} : vector<16x8x256xf32> to vector<1x8x256xf32>
    %52 = vector.shape_cast %51 : vector<1x8x256xf32> to vector<8x256xf32>
    %53 = vector.extract_strided_slice %35 {offsets = [8, 0, 0], sizes = [1, 8, 256], strides = [1, 1, 1]} : vector<16x8x256xf32> to vector<1x8x256xf32>
    %54 = vector.shape_cast %53 : vector<1x8x256xf32> to vector<8x256xf32>
    %55 = vector.extract_strided_slice %35 {offsets = [9, 0, 0], sizes = [1, 8, 256], strides = [1, 1, 1]} : vector<16x8x256xf32> to vector<1x8x256xf32>
    %56 = vector.shape_cast %55 : vector<1x8x256xf32> to vector<8x256xf32>
    %57 = vector.extract_strided_slice %35 {offsets = [10, 0, 0], sizes = [1, 8, 256], strides = [1, 1, 1]} : vector<16x8x256xf32> to vector<1x8x256xf32>
    %58 = vector.shape_cast %57 : vector<1x8x256xf32> to vector<8x256xf32>
    %59 = vector.extract_strided_slice %35 {offsets = [11, 0, 0], sizes = [1, 8, 256], strides = [1, 1, 1]} : vector<16x8x256xf32> to vector<1x8x256xf32>
    %60 = vector.shape_cast %59 : vector<1x8x256xf32> to vector<8x256xf32>
    %61 = vector.extract_strided_slice %35 {offsets = [12, 0, 0], sizes = [1, 8, 256], strides = [1, 1, 1]} : vector<16x8x256xf32> to vector<1x8x256xf32>
    %62 = vector.shape_cast %61 : vector<1x8x256xf32> to vector<8x256xf32>
    %63 = vector.extract_strided_slice %35 {offsets = [13, 0, 0], sizes = [1, 8, 256], strides = [1, 1, 1]} : vector<16x8x256xf32> to vector<1x8x256xf32>
    %64 = vector.shape_cast %63 : vector<1x8x256xf32> to vector<8x256xf32>
    %65 = tpu.concatenate %38, %40, %42, %44, %46, %48, %50, %52, %54, %56, %58, %60, %62, %64 in 1 : vector<8x256xf32>, vector<8x256xf32>, vector<8x256xf32>, vector<8x256xf32>, vector<8x256xf32>, vector<8x256xf32>, vector<8x256xf32>, vector<8x256xf32>, vector<8x256xf32>, vector<8x256xf32>, vector<8x256xf32>, vector<8x256xf32>, vector<8x256xf32>, vector<8x256xf32> -> vector<8x3584xf32>
    %66 = arith.truncf %65 : vector<8x3584xf32> to vector<8x3584xbf16>
    %c0_18 = arith.constant 0 : index
    %c0_19 = arith.constant 0 : index
    %67 = vector.load %arg6[%c0_18, %c0_19] : memref<3584x128xbf16, #tpu.memory_space<vmem>>, vector<3584x128xbf16>
    %cst_20 = arith.constant dense<0.000000e+00> : vector<8x128xf32>
    %68 = tpu.matmul %66, %67, %cst_20 {dimension_numbers = #tpu.dot_dimension_numbers<[1], [0], [0], [1], [0, 0, 1, 1], [], []>} : vector<8x3584xbf16>, vector<3584x128xbf16>, vector<8x128xf32> -> vector<8x128xf32>
    %c0_21 = arith.constant 0 : index
    %c0_22 = arith.constant 0 : index
    %69 = vector.load %arg7[%c0_21, %c0_22] : memref<1x128xf32, #tpu.memory_space<vmem>>, vector<1x128xf32>
    %70 = vector.broadcast %69 : vector<1x128xf32> to vector<8x128xf32>
    %71 = arith.addf %68, %70 : vector<8x128xf32>
    %c0_23 = arith.constant 0 : index
    %c0_24 = arith.constant 0 : index
    %72 = vector.load %arg9[%c0_23, %c0_24] : memref<8x128xf32, #tpu.memory_space<vmem>>, vector<8x128xf32>
    tpu.vector_store %arg9[%c0_23, %c0_24], %71 {strides = array<i32>} : memref<8x128xf32, #tpu.memory_space<vmem>>, vector<8x128xf32>,
    return
  }
  func.func @transform_0(%arg0: i32) -> (i32, i32, i32) {
    %c0_i32 = arith.constant 0 : i32
    %c0_i32_0 = arith.constant 0 : i32
    %c0_i32_1 = arith.constant 0 : i32
    return %c0_i32, %arg0, %c0_i32_0 : i32, i32, i32
  }
  func.func @transform_1(%arg0: i32) -> (i32, i32) {
    %c0_i32 = arith.constant 0 : i32
    %c0_i32_0 = arith.constant 0 : i32
    %c0_i32_1 = arith.constant 0 : i32
    return %c0_i32, %c0_i32_0 : i32, i32
  }
  func.func @transform_2(%arg0: i32) -> (i32, i32) {
    %c0_i32 = arith.constant 0 : i32
    %c0_i32_0 = arith.constant 0 : i32
    %c0_i32_1 = arith.constant 0 : i32
    return %c0_i32, %c0_i32_0 : i32, i32
  }
  func.func @transform_3(%arg0: i32) -> (i32, i32) {
    %c0_i32 = arith.constant 0 : i32
    %c0_i32_0 = arith.constant 0 : i32
    %c0_i32_1 = arith.constant 0 : i32
    return %c0_i32, %c0_i32_0 : i32, i32
  }
  func.func @transform_4(%arg0: i32) -> (i32, i32) {
    %c0_i32 = arith.constant 0 : i32
    %c0_i32_0 = arith.constant 0 : i32
    %c0_i32_1 = arith.constant 0 : i32
    return %c0_i32, %c0_i32_0 : i32, i32
  }
  func.func @transform_5(%arg0: i32) -> (i32, i32) {
    %c0_i32 = arith.constant 0 : i32
    %c0_i32_0 = arith.constant 0 : i32
    %c0_i32_1 = arith.constant 0 : i32
    return %c0_i32, %c0_i32_0 : i32, i32
  }
  func.func @transform_6(%arg0: i32) -> (i32, i32) {
    %c0_i32 = arith.constant 0 : i32
    %c0_i32_0 = arith.constant 0 : i32
    %c0_i32_1 = arith.constant 0 : i32
    return %c0_i32, %c0_i32_0 : i32, i32
  }
  func.func @transform_7(%arg0: i32) -> (i32, i32, i32) {
    %c0_i32 = arith.constant 0 : i32
    %c0_i32_0 = arith.constant 0 : i32
    %c0_i32_1 = arith.constant 0 : i32
    return %c0_i32, %arg0, %c0_i32_0 : i32, i32, i32
  }
  func.func @transform_8(%arg0: i32) -> (i32, i32) {
    %c0_i32 = arith.constant 0 : i32
    %c0_i32_0 = arith.constant 0 : i32
    return %arg0, %c0_i32 : i32, i32
  }
}

</mosaic_0001>

<bundles_post_ra>
// kernel: forward.1
= control target key start
LH: loop header
LB: loop body
LE: loop exit
PB: predicated region body
PF: predicated region fallthrough
CT: control target
= control target key end

     0   :  { %14 = vsyncpa [#allocation5], 0  ;;  %s9276_s0 = inlined_call_operand.vmem [shape: f32[32,16,96], index: 0, kind: input, shape index: {}]   ;;  %s9277_s1 = inlined_call_operand.vmem [shape: bf16[96,512], index: 1, kind: input, shape index: {}]   ;;  %s9278_s2 = inlined_call_operand.vmem [shape: f32[1,512], index: 2, kind: input, shape index: {}]   ;;  %s9279_s3 = inlined_call_operand.vmem [shape: bf16[768,256], index: 3, kind: input, shape index: {}]   ;;  %s9280_s4 = inlined_call_operand.vmem [shape: f32[1,256], index: 4, kind: input, shape index: {}]   ;;  %s9281_s5 = inlined_call_operand.vmem [shape: bf16[3584,128], index: 5, kind: input, shape index: {}]   ;;  %s9282_s6 = inlined_call_operand.vmem [shape: f32[1,128], index: 6, kind: input, shape index: {}]   ;;  %s9283_s7 = inlined_call_operand.vmem [shape: f32[16,16,256], index: 7, kind: output, shape index: {0}]   ;;  %s9284_s8 = inlined_call_operand.hbm [shape: f32[16,128], index: 8, kind: output, shape index: {1}]  }
   0x1   :  { %16 = vsyncpa [#allocation5 + $0x1], 0  ;;  %s6868_s27 = smov 0   ;;  %s6870_s28 = smov 0  }
   0x2   :  { %s6872_s29 = smov 0   ;;  %s6874_s30 = smov 0  }
   0x3 LB: > { %s6889_s9 = sadd.s32 4294967295, %s6819_s30   ;;  %s4910_s10 = sadd.s32 4294967294, %s6819_s30   ;;  %s6819_s30 = sphi %s6874_s30, %s9293_s30   ;;  %s6815_s29 = sphi %s6872_s29, %s9292_s29   ;;  %s6811_s28 = sphi %s6870_s28, %s9291_s28   ;;  %s6807_s27 = sphi %s6868_s27, %s9290_s27  }
   0x4   : > { %s6893_s11 = sadd.s32 1, %s6819_s30   ;;  %s29_s12 = sadd.s32 1, %s6815_s29 }
   0x5   : > { %s26_s13 = ssub.s32 %s6819_s30, %s6893_s11  ;;  %p36_p0 = scmp.ne.s32.totalorder %s6815_s29, %s6811_s28 }
   0x6   : > { %p27_p1 = scmp.eq.s32.totalorder %s26_s13, 0  ;;  %p37_p2 = scmp.eq.s32.totalorder %s6819_s30, 0 }
   0x7   : > { %p192_p3 = scmp.eq.s32.totalorder %s6889_s9, 1  ;;  %p223_p4 = scmp.ne.s32.totalorder %s6811_s28, %s6807_s27 }
   0x8   : > { %s6905_s14 = scalar_select %p27_p1, %s6815_s29, %s29_s12  }
   0x9   : > { %p38_p5 = por %p37_p2, %p36_p0  ;;  %p6907_p6 = por %p192_p3, %p36_p0 }
   0xa   : > { %p224_p7 = scmp.eq.s32.totalorder %s4910_s10, 1  ;;  %p4912_p9 = scmp.ge.s32.totalorder %s6819_s30, 2 }
   0xc   : > { %p6911_p8 = por %p224_p7, %p223_p4  ;;  %258 = sbr.rel (%p4912_p9) target bundleno = 53 (0x35), region = 40 }
  0x11   : > { %261 = sbr.rel (!%p38_p5) target bundleno = 53 (0x35), region = 44  ;;  %s263_s17 = sand.u32 (%p38_p5), 1, %s6815_s29  }
  0x12   : > { %s4914_s18 = sshll.u32 (%p38_p5), %s6819_s30, 3  ;;  %s4913_s19 = sshll.u32 (%p38_p5), %s263_s17, 8 }
  0x13   : > { %s6923_s22 = scalar_lea.vmem (%p38_p5), %s9276_s0, %s4914_s18  ;;  %s6928_s23 = scalar_lea.vmem (%p38_p5), [#allocation2], %s4913_s19 }
  0x14   : > { %v358_v0 = vld [vmem:[%s6923_s22] sm:$0xff] (%p38_p5)  ;;  %v360_v1 = vld [vmem:[%s6923_s22 + $0x10] sm:$0xff] (%p38_p5) }
  0x15   : > { %v362_v2 = vld [vmem:[%s6923_s22 + $0x20] sm:$0xff] (%p38_p5)  ;;  %359 = vst [vmem:[%s6928_s23] sm:$0xff] (%p38_p5), %v358_v0  ;;  %v364_v3 = vld [vmem:[%s6923_s22 + $0x30] sm:$0xff] (%p38_p5) }
  0x16   : > { %361 = vst [vmem:[%s6928_s23 + $0x8] sm:$0xff] %v360_v1  ;;  %v366_v4 = vld [vmem:[%s6923_s22 + $0x40] sm:$0xff]  ;;  %v368_v5 = vld [vmem:[%s6923_s22 + $0x50] sm:$0xff] }
  0x17   : > { %363 = vst [vmem:[%s6928_s23 + $0x10] sm:$0xff] %v362_v2  ;;  %v370_v6 = vld [vmem:[%s6923_s22 + $0x60] sm:$0xff]  ;;  %v372_v7 = vld [vmem:[%s6923_s22 + $0x70] sm:$0xff] }
  0x18   : > { %365 = vst [vmem:[%s6928_s23 + $0x18] sm:$0xff] %v364_v3  ;;  %v374_v8 = vld [vmem:[%s6923_s22 + $0x80] sm:$0xff]  ;;  %v376_v9 = vld [vmem:[%s6923_s22 + $0x90] sm:$0xff] }
  0x19   : > { %367 = vst [vmem:[%s6928_s23 + $0x20] sm:$0xff] %v366_v4  ;;  %v378_v10 = vld [vmem:[%s6923_s22 + $0xa0] sm:$0xff]  ;;  %v380_v11 = vld [vmem:[%s6923_s22 + $0xb0] sm:$0xff] }
  0x1a   : > { %369 = vst [vmem:[%s6928_s23 + $0x28] sm:$0xff] %v368_v5  ;;  %v382_v12 = vld [vmem:[%s6923_s22 + $0xc0] sm:$0xff]  ;;  %v384_v13 = vld [vmem:[%s6923_s22 + $0xd0] sm:$0xff] }
  0x1b   : > { %371 = vst [vmem:[%s6928_s23 + $0x30] sm:$0xff] %v370_v6  ;;  %v386_v14 = vld [vmem:[%s6923_s22 + $0xe0] sm:$0xff]  ;;  %v388_v15 = vld [vmem:[%s6923_s22 + $0xf0] sm:$0xff] }
  0x1c   : > { %373 = vst [vmem:[%s6928_s23 + $0x38] sm:$0xff] %v372_v7  ;;  %v390_v16 = vld [vmem:[%s6923_s22 + $0x100] sm:$0xff]  ;;  %v392_v17 = vld [vmem:[%s6923_s22 + $0x110] sm:$0xff] }
  0x1d   : > { %375 = vst [vmem:[%s6928_s23 + $0x40] sm:$0xff] %v374_v8  ;;  %v394_v18 = vld [vmem:[%s6923_s22 + $0x120] sm:$0xff]  ;;  %v396_v19 = vld [vmem:[%s6923_s22 + $0x130] sm:$0xff] }
  0x1e   : > { %377 = vst [vmem:[%s6928_s23 + $0x48] sm:$0xff] %v376_v9  ;;  %v398_v20 = vld [vmem:[%s6923_s22 + $0x140] sm:$0xff]  ;;  %v400_v21 = vld [vmem:[%s6923_s22 + $0x150] sm:$0xff] }
  0x1f   : > { %379 = vst [vmem:[%s6928_s23 + $0x50] sm:$0xff] %v378_v10  ;;  %v402_v22 = vld [vmem:[%s6923_s22 + $0x160] sm:$0xff]  ;;  %v404_v23 = vld [vmem:[%s6923_s22 + $0x170] sm:$0xff] }
  0x20   : > { %381 = vst [vmem:[%s6928_s23 + $0x58] sm:$0xff] %v380_v11  ;;  %v406_v24 = vld [vmem:[%s6923_s22 + $0x180] sm:$0xff]  ;;  %v408_v25 = vld [vmem:[%s6923_s22 + $0x190] sm:$0xff] }
  0x21   : > { %383 = vst [vmem:[%s6928_s23 + $0x60] sm:$0xff] %v382_v12  ;;  %v410_v26 = vld [vmem:[%s6923_s22 + $0x1a0] sm:$0xff]  ;;  %v412_v27 = vld [vmem:[%s6923_s22 + $0x1b0] sm:$0xff] }
  0x22   : > { %385 = vst [vmem:[%s6928_s23 + $0x68] sm:$0xff] %v384_v13  ;;  %v414_v28 = vld [vmem:[%s6923_s22 + $0x1c0] sm:$0xff]  ;;  %v416_v29 = vld [vmem:[%s6923_s22 + $0x1d0] sm:$0xff] }
  0x23   : > { %387 = vst [vmem:[%s6928_s23 + $0x70] sm:$0xff] %v386_v14  ;;  %v418_v30 = vld [vmem:[%s6923_s22 + $0x1e0] sm:$0xff]  ;;  %v420_v31 = vld [vmem:[%s6923_s22 + $0x1f0] sm:$0xff] }
  0x24   : > { %389 = vst [vmem:[%s6928_s23 + $0x78] sm:$0xff] %v388_v15 }
  0x25   : > { %391 = vst [vmem:[%s6928_s23 + $0x80] sm:$0xff] %v390_v16 }
  0x26   : > { %393 = vst [vmem:[%s6928_s23 + $0x88] sm:$0xff] %v392_v17 }
  0x27   : > { %395 = vst [vmem:[%s6928_s23 + $0x90] sm:$0xff] %v394_v18 }
  0x28   : > { %397 = vst [vmem:[%s6928_s23 + $0x98] sm:$0xff] %v396_v19 }
  0x29   : > { %399 = vst [vmem:[%s6928_s23 + $0xa0] sm:$0xff] %v398_v20 }
  0x2a   : > { %401 = vst [vmem:[%s6928_s23 + $0xa8] sm:$0xff] %v400_v21 }
  0x2b   : > { %403 = vst [vmem:[%s6928_s23 + $0xb0] sm:$0xff] %v402_v22 }
  0x2c   : > { %405 = vst [vmem:[%s6928_s23 + $0xb8] sm:$0xff] %v404_v23 }
  0x2d   : > { %407 = vst [vmem:[%s6928_s23 + $0xc0] sm:$0xff] %v406_v24 }
  0x2e   : > { %409 = vst [vmem:[%s6928_s23 + $0xc8] sm:$0xff] %v408_v25 }
  0x2f   : > { %411 = vst [vmem:[%s6928_s23 + $0xd0] sm:$0xff] %v410_v26 }
  0x30   : > { %413 = vst [vmem:[%s6928_s23 + $0xd8] sm:$0xff] %v412_v27 }
  0x31   : > { %415 = vst [vmem:[%s6928_s23 + $0xe0] sm:$0xff] %v414_v28 }
  0x32   : > { %417 = vst [vmem:[%s6928_s23 + $0xe8] sm:$0xff] %v416_v29 }
  0x33   : > { %419 = vst [vmem:[%s6928_s23 + $0xf0] sm:$0xff] %v418_v30 }
  0x34   : > { %421 = vst [vmem:[%s6928_s23 + $0xf8] sm:$0xff] %v420_v31 }
  0x35 PF: > { %p4915_p10 = scmp.ge.s32.totalorder %s6819_s30, 1  ;;  %p426_p11 = scmp.lt.s32.totalorder %s6819_s30, 3 }
  0x37   : > { %p427_p12 = pnand %p4915_p10, %p426_p11 }
  0x38   : > { %s7126_s21 = sand.u32 (!%p427_p12), 1, %s6811_s28  }
  0x39   : > { %430 = sbr.rel (%p427_p12) target bundleno = 1089 (0x441), region = 82  ;;  %s9285_s26 = sshll.u32 (!%p427_p12), %s7126_s21, 8 }
  0x3a   : > { %s7143_s18 = scalar_lea.vmem (!%p427_p12), [#allocation2], %s9285_s26  ;;  %s9288_s25 = sshll.u32 (!%p427_p12), %s7126_s21, 8 }
  0x3b   : > { %s8237_s10 = scalar_lea.vmem (!%p427_p12), [#allocation3], %s9288_s25  ;;  %s4918_s25 = sshll.u32 (!%p427_p12), %s7126_s21, 3 }
  0x3e   : > { %v5001_v32 = vld [vmem:[%s9277_s1 + $0xa0] sm:$0xf]  ;;  %v6388_v33 = vld [vmem:[%s9277_s1 + $0xac] sm:$0xf0]  ;;  %v6386_v34 = vld [vmem:[%s9277_s1 + $0xa4] sm:$0xf] }
  0x3f   : > { %v5002_v35 = vor.u32 %v6388_v33, %v5001_v32  ;;  %v5003_v36 = vld [vmem:[%s9277_s1 + $0xb0] sm:$0xf0]  ;;  %v5009_v37 = vld [vmem:[%s9277_s1 + $0xa8] sm:$0xf]  ;;  %v6389_v38 = vld [vmem:[%s9277_s1 + $0xb4] sm:$0xf0] }
  0x40   : > { %v5006_v39 = vor.u32 %v6386_v34, %v5003_v36  ;;  %v5010_v40 = vor.u32 %v6389_v38, %v5009_v37  ;;  %v6387_v41 = vld [vmem:[%s9277_s1 + $0xac] sm:$0xf]  ;;  %v5011_v42 = vld [vmem:[%s9277_s1 + $0xb8] sm:$0xf0]  ;;  %v4985_v43 = vld [vmem:[%s9277_s1 + $0x80] sm:$0xf] }
  0x41   : > { %724 = vmatpush.bf16.msra.mxu0 %v5002_v35  ;;  %v5014_v44 = vor.u32 %v6387_v41, %v5011_v42  ;;  %v6384_v45 = vld [vmem:[%s9277_s1 + $0x8c] sm:$0xf0]  ;;  %v6382_v46 = vld [vmem:[%s9277_s1 + $0x84] sm:$0xf]  ;;  %v4987_v47 = vld [vmem:[%s9277_s1 + $0x90] sm:$0xf0] }
  0x42   : > { %809 = vmatpush.bf16.msra.mxu1 %v5006_v39  ;;  %894 = vmatpush.bf16.msra.mxu2 %v5010_v40  ;;  %v4986_v48 = vor.u32 %v6384_v45, %v4985_v43  ;;  %v4990_v49 = vor.u32 %v6382_v46, %v4987_v47  ;;  %v4993_v50 = vld [vmem:[%s9277_s1 + $0x88] sm:$0xf]  ;;  %v6385_v51 = vld [vmem:[%s9277_s1 + $0x94] sm:$0xf0]  ;;  %v6383_v52 = vld [vmem:[%s9277_s1 + $0x8c] sm:$0xf] }
  0x43   : > { %979 = vmatpush.bf16.msra.mxu3 %v5014_v44  ;;  %v4994_v53 = vor.u32 %v6385_v51, %v4993_v50  ;;  %v4995_v54 = vld [vmem:[%s9277_s1 + $0x98] sm:$0xf0]  ;;  %v4969_v55 = vld [vmem:[%s9277_s1 + $0x60] sm:$0xf]  ;;  %v6380_v56 = vld [vmem:[%s9277_s1 + $0x6c] sm:$0xf0] }
  0x44   : > { %v4998_v57 = vor.u32 %v6383_v52, %v4995_v54  ;;  %v6378_v58 = vld [vmem:[%s9277_s1 + $0x64] sm:$0xf]  ;;  %v4971_v59 = vld [vmem:[%s9277_s1 + $0x70] sm:$0xf0]  ;;  %v4977_v60 = vld [vmem:[%s9277_s1 + $0x68] sm:$0xf]  ;;  %v4970_v61 = vor.u32 %v6380_v56, %v4969_v55 }
  0x45   : > { %725 = vmatpush.bf16.msra.mxu0 %v4986_v48  ;;  %v6381_v62 = vld [vmem:[%s9277_s1 + $0x74] sm:$0xf0]  ;;  %v6379_v63 = vld [vmem:[%s9277_s1 + $0x6c] sm:$0xf]  ;;  %v4979_v0 = vld [vmem:[%s9277_s1 + $0x78] sm:$0xf0]  ;;  %v4974_v1 = vor.u32 %v6378_v58, %v4971_v59 }
  0x46   : > { %810 = vmatpush.bf16.msra.mxu1 %v4990_v49  ;;  %895 = vmatpush.bf16.msra.mxu2 %v4994_v53  ;;  %v4978_v2 = vor.u32 %v6381_v62, %v4977_v60  ;;  %v4953_v3 = vld [vmem:[%s9277_s1 + $0x40] sm:$0xf]  ;;  %v6376_v4 = vld [vmem:[%s9277_s1 + $0x4c] sm:$0xf0]  ;;  %v6374_v5 = vld [vmem:[%s9277_s1 + $0x44] sm:$0xf]  ;;  %v4982_v6 = vor.u32 %v6379_v63, %v4979_v0 }
  0x47   : > { %980 = vmatpush.bf16.msra.mxu3 %v4998_v57  ;;  %v4955_v7 = vld [vmem:[%s9277_s1 + $0x50] sm:$0xf0]  ;;  %v4961_v8 = vld [vmem:[%s9277_s1 + $0x48] sm:$0xf]  ;;  %v6377_v9 = vld [vmem:[%s9277_s1 + $0x54] sm:$0xf0]  ;;  %v4954_v12 = vor.u32 %v6376_v4, %v4953_v3 }
  0x48   : > { %v6375_v10 = vld [vmem:[%s9277_s1 + $0x4c] sm:$0xf]  ;;  %v4963_v11 = vld [vmem:[%s9277_s1 + $0x58] sm:$0xf0]  ;;  %v4958_v13 = vor.u32 %v6374_v5, %v4955_v7  ;;  %v4962_v14 = vor.u32 %v6377_v9, %v4961_v8  ;;  %v4937_v15 = vld [vmem:[%s9277_s1 + $0x20] sm:$0xf] }
  0x49   : > { %726 = vmatpush.bf16.msra.mxu0 %v4970_v61  ;;  %v6372_v16 = vld [vmem:[%s9277_s1 + $0x2c] sm:$0xf0]  ;;  %v6370_v17 = vld [vmem:[%s9277_s1 + $0x24] sm:$0xf]  ;;  %v4966_v18 = vor.u32 %v6375_v10, %v4963_v11  ;;  %v4939_v19 = vld [vmem:[%s9277_s1 + $0x30] sm:$0xf0] }
  0x4a   : > { %811 = vmatpush.bf16.msra.mxu1 %v4974_v1  ;;  %896 = vmatpush.bf16.msra.mxu2 %v4978_v2  ;;  %v4945_v20 = vld [vmem:[%s9277_s1 + $0x28] sm:$0xf]  ;;  %v6373_v21 = vld [vmem:[%s9277_s1 + $0x34] sm:$0xf0]  ;;  %v6371_v22 = vld [vmem:[%s9277_s1 + $0x2c] sm:$0xf]  ;;  %v4938_v24 = vor.u32 %v6372_v16, %v4937_v15  ;;  %v4942_v28 = vor.u32 %v6370_v17, %v4939_v19 }
  0x4b   : > { %981 = vmatpush.bf16.msra.mxu3 %v4982_v6  ;;  %v4947_v23 = vld [vmem:[%s9277_s1 + $0x38] sm:$0xf0]  ;;  %v4921_v25 = vld [vmem:[%s9277_s1] sm:$0xf]  ;;  %v6368_v26 = vld [vmem:[%s9277_s1 + $0xc] sm:$0xf0]  ;;  %v4946_v29 = vor.u32 %v6373_v21, %v4945_v20 }
  0x4c   : > { %v6366_v27 = vld [vmem:[%s9277_s1 + $0x4] sm:$0xf]  ;;  %v4923_v30 = vld [vmem:[%s9277_s1 + $0x10] sm:$0xf0]  ;;  %v4950_v31 = vor.u32 %v6371_v22, %v4947_v23  ;;  %v4929_v32 = vld [vmem:[%s9277_s1 + $0x8] sm:$0xf]  ;;  %v4922_v36 = vor.u32 %v6368_v26, %v4921_v25 }
  0x4d   : > { %727 = vmatpush.bf16.msra.mxu0 %v4954_v12  ;;  %v6369_v33 = vld [vmem:[%s9277_s1 + $0x14] sm:$0xf0]  ;;  %v6367_v34 = vld [vmem:[%s9277_s1 + $0xc] sm:$0xf]  ;;  %v4931_v35 = vld [vmem:[%s9277_s1 + $0x18] sm:$0xf0]  ;;  %v4926_v39 = vor.u32 %v6366_v27, %v4923_v30 }
  0x4e   : > { %812 = vmatpush.bf16.msra.mxu1 %v4958_v13  ;;  %897 = vmatpush.bf16.msra.mxu2 %v4962_v14  ;;  %v471_v37 = vld [vmem:[%s7143_s18] sm:$0xff]  ;;  %v472_v38 = vld [vmem:[%s7143_s18 + $0x8] sm:$0xff]  ;;  %v4930_v40 = vor.u32 %v6369_v33, %v4929_v32  ;;  %v4934_v41 = vor.u32 %v6367_v34, %v4931_v35  ;;  %vm673_vm0 = vcmask 785408   ;;  %v473_v43 = vld [vmem:[%s7143_s18 + $0x10] sm:$0xff]  ;;  %s6710_s13 = sshll.u32 (%p6907_p6), %s6889_s9, 4 }
  0x4f   : > { %982 = vmatpush.bf16.msra.mxu3 %v4966_v18  ;;  %v503_v42 = vpack.c.bf16 %v472_v38, %v471_v37  ;;  %v474_v44 = vld [vmem:[%s7143_s18 + $0x18] sm:$0xff]  ;;  %v475_v46 = vld [vmem:[%s7143_s18 + $0x20] sm:$0xff]  ;;  %v476_v47 = vld [vmem:[%s7143_s18 + $0x28] sm:$0xff]  ;;  %s9177_s19 = scalar_lea.vmem (%p6907_p6), %s9283_s7, %s6710_s13 }
  0x50   : > { %v504_v45 = vpack.c.bf16 %v474_v44, %v473_v43  ;;  %v505_v48 = vpack.c.bf16 %v476_v47, %v475_v46  ;;  %v5265_v49 = vld [vmem:[%s9279_s3 + $0x170] sm:$0xf]  ;;  %v6437_v50 = vld [vmem:[%s9279_s3 + $0x174] sm:$0xf0]  ;;  %v479_v0 = vld [vmem:[%s7143_s18 + $0x40] sm:$0xff] }
  0x51   : > { %728 = vmatpush.bf16.msra.mxu0 %v4938_v24  ;;  %v5137_v51 = vld [vmem:[%s9279_s3 + $0x70] sm:$0xf]  ;;  %v5266_v52 = vor.u32 %v6437_v50, %v5265_v49  ;;  %v6405_v53 = vld [vmem:[%s9279_s3 + $0x74] sm:$0xf0]  ;;  %v480_v1 = vld [vmem:[%s7143_s18 + $0x48] sm:$0xff] }
  0x52   : > { %813 = vmatpush.bf16.msra.mxu1 %v4942_v28  ;;  %898 = vmatpush.bf16.msra.mxu2 %v4946_v29  ;;  %v5329_v54 = vld [vmem:[%s9279_s3 + $0x1f0] sm:$0xf]  ;;  %v6453_v55 = vld [vmem:[%s9279_s3 + $0x1f4] sm:$0xf0]  ;;  %v5138_v56 = vor.u32 %v6405_v53, %v5137_v51  ;;  %v507_v2 = vpack.c.bf16 %v480_v1, %v479_v0  ;;  %v5257_v3 = vld [vmem:[%s9279_s3 + $0x160] sm:$0xf] }
  0x53   : > { %983 = vmatpush.bf16.msra.mxu3 %v4950_v31  ;;  %v5330_v57 = vor.u32 %v6453_v55, %v5329_v54  ;;  %v5201_v58 = vld [vmem:[%s9279_s3 + $0xf0] sm:$0xf]  ;;  %v6421_v59 = vld [vmem:[%s9279_s3 + $0xf4] sm:$0xf0]  ;;  %v6435_v4 = vld [vmem:[%s9279_s3 + $0x164] sm:$0xf0] }
  0x54   : > { %v5202_v60 = vor.u32 %v6421_v59, %v5201_v58  ;;  %v477_v61 = vld [vmem:[%s7143_s18 + $0x30] sm:$0xff]  ;;  %v478_v62 = vld [vmem:[%s7143_s18 + $0x38] sm:$0xff]  ;;  %v5129_v5 = vld [vmem:[%s9279_s3 + $0x60] sm:$0xf]  ;;  %v5258_v6 = vor.u32 %v6435_v4, %v5257_v3 }
  0x55   : > { %729 = vmatpush.bf16.msra.mxu0 %v4922_v36  ;;  %v506_v63 = vpack.c.bf16 %v478_v62, %v477_v61  ;;  %v6403_v7 = vld [vmem:[%s9279_s3 + $0x64] sm:$0xf0]  ;;  %v5321_v8 = vld [vmem:[%s9279_s3 + $0x1e0] sm:$0xf]  ;;  %v481_v15 = vld [vmem:[%s7143_s18 + $0x50] sm:$0xff] }
  0x56   : > { %814 = vmatpush.bf16.msra.mxu1 %v4926_v39  ;;  %899 = vmatpush.bf16.msra.mxu2 %v4930_v40  ;;  %v6451_v9 = vld [vmem:[%s9279_s3 + $0x1e4] sm:$0xf0]  ;;  %v5130_v10 = vor.u32 %v6403_v7, %v5129_v5  ;;  %v5193_v12 = vld [vmem:[%s9279_s3 + $0xe0] sm:$0xf]  ;;  %v482_v16 = vld [vmem:[%s7143_s18 + $0x58] sm:$0xff] }
  0x57   : > { %984 = vmatpush.bf16.msra.mxu3 %v4934_v41  ;;  %v5322_v11 = vor.u32 %v6451_v9, %v5321_v8  ;;  %v6419_v13 = vld [vmem:[%s9279_s3 + $0xe4] sm:$0xf0]  ;;  %v508_v17 = vpack.c.bf16 %v482_v16, %v481_v15  ;;  %v483_v18 = vld [vmem:[%s7143_s18 + $0x60] sm:$0xff]  ;;  %v485_v21 = vld [vmem:[%s7143_s18 + $0x70] sm:$0xff] }
  0x58   : > { %5015 = vmatmul.msk.bf16.vlgmr.msra.gmra.mxu0 %vm673_vm0, %v503_v42  ;;  %v5194_v14 = vor.u32 %v6419_v13, %v5193_v12  ;;  %v484_v19 = vld [vmem:[%s7143_s18 + $0x68] sm:$0xff]  ;;  %v486_v22 = vld [vmem:[%s7143_s18 + $0x78] sm:$0xff]  ;;  %v5249_v23 = vld [vmem:[%s9279_s3 + $0x150] sm:$0xf] }
  0x59   : > { %5031 = vmatmul.msk.bf16.vlgmr.msra.gmra.mxu1 %vm673_vm0, %v503_v42  ;;  %5047 = vmatmul.msk.bf16.vlgmr.msra.gmra.mxu2 %vm673_vm0, %v503_v42  ;;  %v509_v20 = vpack.c.bf16 %v484_v19, %v483_v18  ;;  %v6433_v24 = vld [vmem:[%s9279_s3 + $0x154] sm:$0xf0]  ;;  %v510_v26 = vpack.c.bf16 %v486_v22, %v485_v21  ;;  %v5121_v27 = vld [vmem:[%s9279_s3 + $0x50] sm:$0xf]  ;;  %v487_v36 = vld [vmem:[%s7143_s18 + $0x80] sm:$0xff] }
  0x5a   : > { %5063 = vmatmul.msk.bf16.vlgmr.msra.gmra.mxu3 %vm673_vm0, %v503_v42  ;;  %1969 = vmatpush.bf16.msrb.mxu2 %v5266_v52  ;;  %v5250_v25 = vor.u32 %v6433_v24, %v5249_v23  ;;  %v6401_v28 = vld [vmem:[%s9279_s3 + $0x54] sm:$0xf0]  ;;  %v5313_v29 = vld [vmem:[%s9279_s3 + $0x1d0] sm:$0xf]  ;;  %v488_v37 = vld [vmem:[%s7143_s18 + $0x88] sm:$0xff] }
  0x5b   : > { %1871 = vmatpush.bf16.msrb.mxu0 %v5138_v56  ;;  %2018 = vmatpush.bf16.msrb.mxu3 %v5330_v57  ;;  %v5122_v30 = vor.u32 %v6401_v28, %v5121_v27  ;;  %v6449_v31 = vld [vmem:[%s9279_s3 + $0x1d4] sm:$0xf0]  ;;  %v5185_v32 = vld [vmem:[%s9279_s3 + $0xd0] sm:$0xf]  ;;  %v543_v38 = vld [vmem:[%s9278_s2] sm:$0xf]  ;;  %v511_v39 = vpack.c.bf16 %v488_v37, %v487_v36 }
  0x5c   : > { %1920 = vmatpush.bf16.msrb.mxu1 %v5202_v60  ;;  %v6417_v33 = vld [vmem:[%s9279_s3 + $0xd4] sm:$0xf0]  ;;  %v5314_v34 = vor.u32 %v6449_v31, %v5313_v29  ;;  %v7270_v40 = vperm.slane %v543_v38, 0  ;;  %v7272_v42 = vperm.slane %v543_v38, 1  ;;  %v7282_v47 = vperm.slane %v543_v38, 3  ;;  %v489_v59 = vld [vmem:[%s7143_s18 + $0x90] sm:$0xff] }
  0x5d   : > { %v5186_v35 = vor.u32 %v6417_v33, %v5185_v32  ;;  %v490_v60 = vld [vmem:[%s7143_s18 + $0x98] sm:$0xff]  ;;  %v5241_v62 = vld [vmem:[%s9279_s3 + $0x140] sm:$0xf]  ;;  %v6399_v19 = vld [vmem:[%s9279_s3 + $0x44] sm:$0xf0] }
  0x5e   : > { %1970 = vmatpush.bf16.msrb.mxu2 %v5258_v6  ;;  %v512_v4 = vpack.c.bf16 %v490_v60, %v489_v59  ;;  %v5113_v18 = vld [vmem:[%s9279_s3 + $0x40] sm:$0xf]  ;;  %v6447_v22 = vld [vmem:[%s9279_s3 + $0x1c4] sm:$0xf0] }
  0x5f   : > { %1872 = vmatpush.bf16.msrb.mxu0 %v5130_v10  ;;  %2019 = vmatpush.bf16.msrb.mxu3 %v5322_v11  ;;  %v5114_v21 = vor.u32 %v6399_v19, %v5113_v18  ;;  %v5177_v23 = vld [vmem:[%s9279_s3 + $0xc0] sm:$0xf]  ;;  %v6415_v24 = vld [vmem:[%s9279_s3 + $0xc4] sm:$0xf0] }
  0x60   : > { %1921 = vmatpush.bf16.msrb.mxu1 %v5194_v14  ;;  %v5178_v27 = vor.u32 %v6415_v24, %v5177_v23 }
  0x62   : > { %1971 = vmatpush.bf16.msrb.mxu2 %v5250_v25 }
  0x63   : > { %1873 = vmatpush.bf16.msrb.mxu0 %v5122_v30  ;;  %2020 = vmatpush.bf16.msrb.mxu3 %v5314_v34 }
  0x64   : > { %1922 = vmatpush.bf16.msrb.mxu1 %v5186_v35 }
  0x67   : > { %1874 = vmatpush.bf16.msrb.mxu0 %v5114_v21 }
  0x68   : > { %5016 = vmatmul.msk.bf16.gmra.mxu0 %vm673_vm0, %v504_v45  ;;  %1923 = vmatpush.bf16.msrb.mxu1 %v5178_v27 }
  0x69   : > { %5032 = vmatmul.msk.bf16.gmra.mxu1 %vm673_vm0, %v504_v45  ;;  %5048 = vmatmul.msk.bf16.gmra.mxu2 %vm673_vm0, %v504_v45 }
  0x6a   : > { %5064 = vmatmul.msk.bf16.gmra.mxu3 %vm673_vm0, %v504_v45  ;;  %v7278_v45 = vperm.slane %v543_v38, 2  ;;  %v491_v38 = vld [vmem:[%s7143_s18 + $0xa0] sm:$0xff] }
  0x78   : > { %5017 = vmatmul.msk.bf16.gmra.mxu0 %vm673_vm0, %v505_v48 }
  0x79   : > { %5033 = vmatmul.msk.bf16.gmra.mxu1 %vm673_vm0, %v505_v48  ;;  %5049 = vmatmul.msk.bf16.gmra.mxu2 %vm673_vm0, %v505_v48 }
  0x7a   : > { %5065 = vmatmul.msk.bf16.gmra.mxu3 %vm673_vm0, %v505_v48 }
  0x88   : > { %5018 = vmatmul.msk.bf16.gmra.mxu0 %vm673_vm0, %v506_v63 }
  0x89   : > { %5034 = vmatmul.msk.bf16.gmra.mxu1 %vm673_vm0, %v506_v63  ;;  %5050 = vmatmul.msk.bf16.gmra.mxu2 %vm673_vm0, %v506_v63 }
  0x8a   : > { %5066 = vmatmul.msk.bf16.gmra.mxu3 %vm673_vm0, %v506_v63  ;;  %v6431_v63 = vld [vmem:[%s9279_s3 + $0x144] sm:$0xf0] }
  0x8b   : > { %v5242_v1 = vor.u32 %v6431_v63, %v5241_v62 }
  0x8d   : > { %1972 = vmatpush.bf16.msrb.mxu2 %v5242_v1 }
  0x98   : > { %5019 = vmatmul.msk.bf16.gmra.mxu0 %vm673_vm0, %v507_v2 }
  0x99   : > { %5035 = vmatmul.msk.bf16.gmra.mxu1 %vm673_vm0, %v507_v2  ;;  %5051 = vmatmul.msk.bf16.gmra.mxu2 %vm673_vm0, %v507_v2 }
  0x9a   : > { %5067 = vmatmul.msk.bf16.gmra.mxu3 %vm673_vm0, %v507_v2 }
  0xa8   : > { %5020 = vmatmul.msk.bf16.gmra.mxu0 %vm673_vm0, %v508_v17 }
  0xa9   : > { %5036 = vmatmul.msk.bf16.gmra.mxu1 %vm673_vm0, %v508_v17  ;;  %5052 = vmatmul.msk.bf16.gmra.mxu2 %vm673_vm0, %v508_v17 }
  0xaa   : > { %5068 = vmatmul.msk.bf16.gmra.mxu3 %vm673_vm0, %v508_v17 }
  0xb8   : > { %5021 = vmatmul.msk.bf16.gmra.mxu0 %vm673_vm0, %v509_v20 }
  0xb9   : > { %5037 = vmatmul.msk.bf16.gmra.mxu1 %vm673_vm0, %v509_v20  ;;  %5053 = vmatmul.msk.bf16.gmra.mxu2 %vm673_vm0, %v509_v20 }
  0xba   : > { %5069 = vmatmul.msk.bf16.gmra.mxu3 %vm673_vm0, %v509_v20  ;;  %v5305_v20 = vld [vmem:[%s9279_s3 + $0x1c0] sm:$0xf] }
  0xc8   : > { %5022 = vmatmul.msk.bf16.gmra.mxu0 %vm673_vm0, %v510_v26 }
  0xc9   : > { %5038 = vmatmul.msk.bf16.gmra.mxu1 %vm673_vm0, %v510_v26  ;;  %5054 = vmatmul.msk.bf16.gmra.mxu2 %vm673_vm0, %v510_v26 }
  0xca   : > { %5070 = vmatmul.msk.bf16.gmra.mxu3 %vm673_vm0, %v510_v26  ;;  %v5306_v26 = vor.u32 %v6447_v22, %v5305_v20 }
  0xcc   : > { %2021 = vmatpush.bf16.msrb.mxu3 %v5306_v26 }
  0xd5   : > { %v731_v41 = vpop.f32.mrf.mxu0 }
  0xd6   : > { %v816_v43 = vpop.f32.mrf.mxu1  ;;  %v732_v44 = vadd.f32 %v731_v41, %v7270_v40 }
  0xd7   : > { %v817_v46 = vadd.f32 %v816_v43, %v7272_v42 }
  0xd8   : > { %5023 = vmatmul.msk.bf16.gmra.mxu0 %vm673_vm0, %v511_v39  ;;  %v1062_v49 = vmax.f32 %v732_v44, 0.0 }
  0xd9   : > { %5039 = vmatmul.msk.bf16.gmra.mxu1 %vm673_vm0, %v511_v39  ;;  %5055 = vmatmul.msk.bf16.gmra.mxu2 %vm673_vm0, %v511_v39  ;;  %v1063_v53 = vmax.f32 %v817_v46, 0.0 }
  0xda   : > { %5071 = vmatmul.msk.bf16.gmra.mxu3 %vm673_vm0, %v511_v39  ;;  %v492_v39 = vld [vmem:[%s7143_s18 + $0xa8] sm:$0xff] }
  0xdc   : > { %v901_v48 = vpop.f32.mrf.mxu2 }
  0xdd   : > { %v902_v50 = vadd.f32 %v901_v48, %v7278_v45  ;;  %v986_v51 = vpop.f32.mrf.mxu3  ;;  %v733_v52 = vpop.f32.mrf.mxu0  ;;  %v513_v48 = vpack.c.bf16 %v492_v39, %v491_v38  ;;  %v6397_v38 = vld [vmem:[%s9279_s3 + $0x34] sm:$0xf0]  ;;  %v5297_v39 = vld [vmem:[%s9279_s3 + $0x1b0] sm:$0xf] }
  0xde   : > { %v987_v54 = vadd.f32 %v986_v51, %v7282_v47  ;;  %v818_v55 = vpop.f32.mrf.mxu1  ;;  %v734_v0 = vadd.f32 %v733_v52, %v7270_v40 }
  0xdf   : > { %v1064_v56 = vmax.f32 %v902_v50, 0.0  ;;  %v819_v2 = vadd.f32 %v818_v55, %v7272_v42 }
  0xe0   : > { %v1065_v57 = vmax.f32 %v987_v54, 0.0  ;;  %v1066_v10 = vmax.f32 %v734_v0, 0.0 }
  0xe1   : > { %v7286_v58 = vmax.f32 %v1062_v49, %v1064_v56  ;;  %v1067_v12 = vmax.f32 %v819_v2, 0.0 }
  0xe2   : > { %v7290_v61 = vmax.f32 %v1063_v53, %v1065_v57 }
  0xe4   : > { %v903_v3 = vpop.f32.mrf.mxu2 }
  0xe5   : > { %v904_v5 = vadd.f32 %v903_v3, %v7278_v45  ;;  %v988_v6 = vpop.f32.mrf.mxu3  ;;  %v736_v7 = vpop.f32.mrf.mxu0 }
  0xe6   : > { %v989_v8 = vadd.f32 %v988_v6, %v7282_v47  ;;  %v821_v9 = vpop.f32.mrf.mxu1  ;;  %v737_v15 = vadd.f32 %v736_v7, %v7270_v40 }
  0xe7   : > { %v1068_v11 = vmax.f32 %v904_v5, 0.0  ;;  %v822_v17 = vadd.f32 %v821_v9, %v7272_v42 }
  0xe8   : > { %v1069_v13 = vmax.f32 %v989_v8, 0.0  ;;  %5024 = vmatmul.msk.bf16.gmra.mxu0 %vm673_vm0, %v512_v4  ;;  %v1070_v28 = vmax.f32 %v737_v15, 0.0  ;;  %v5233_v15 = vld [vmem:[%s9279_s3 + $0x130] sm:$0xf] }
  0xe9   : > { %v7303_v14 = vmax.f32 %v1066_v10, %v1068_v11  ;;  %5040 = vmatmul.msk.bf16.gmra.mxu1 %vm673_vm0, %v512_v4  ;;  %5056 = vmatmul.msk.bf16.gmra.mxu2 %vm673_vm0, %v512_v4  ;;  %v1071_v32 = vmax.f32 %v822_v17, 0.0  ;;  %v493_v11 = vld [vmem:[%s7143_s18 + $0xb0] sm:$0xff]  ;;  %v6429_v17 = vld [vmem:[%s9279_s3 + $0x134] sm:$0xf0] }
  0xea   : > { %v7308_v16 = vmax.f32 %v1067_v12, %v1069_v13  ;;  %5072 = vmatmul.msk.bf16.gmra.mxu3 %vm673_vm0, %v512_v4  ;;  %v494_v12 = vld [vmem:[%s7143_s18 + $0xb8] sm:$0xff]  ;;  %v5234_v19 = vor.u32 %v6429_v17, %v5233_v15 }
  0xeb   : > { %v514_v22 = vpack.c.bf16 %v494_v12, %v493_v11 }
  0xec   : > { %v906_v25 = vpop.f32.mrf.mxu2  ;;  %1973 = vmatpush.bf16.msrb.mxu2 %v5234_v19 }
  0xed   : > { %v907_v29 = vadd.f32 %v906_v25, %v7278_v45  ;;  %v991_v30 = vpop.f32.mrf.mxu3  ;;  %v738_v31 = vpop.f32.mrf.mxu0 }
  0xee   : > { %v992_v33 = vadd.f32 %v991_v30, %v7282_v47  ;;  %v823_v34 = vpop.f32.mrf.mxu1  ;;  %v739_v43 = vadd.f32 %v738_v31, %v7270_v40 }
  0xef   : > { %v1072_v35 = vmax.f32 %v907_v29, 0.0  ;;  %v824_v44 = vadd.f32 %v823_v34, %v7272_v42 }
  0xf0   : > { %v1073_v36 = vmax.f32 %v992_v33, 0.0  ;;  %v1074_v54 = vmax.f32 %v739_v43, 0.0 }
  0xf1   : > { %v7332_v37 = vmax.f32 %v1070_v28, %v1072_v35  ;;  %v1075_v56 = vmax.f32 %v824_v44, 0.0  ;;  %v6445_v44 = vld [vmem:[%s9279_s3 + $0x1b4] sm:$0xf0] }
  0xf2   : > { %v7336_v41 = vmax.f32 %v1071_v32, %v1073_v36  ;;  %v5105_v36 = vld [vmem:[%s9279_s3 + $0x30] sm:$0xf] }
  0xf3   : > { %v5106_v43 = vor.u32 %v6397_v38, %v5105_v36 }
  0xf4   : > { %v908_v46 = vpop.f32.mrf.mxu2 }
  0xf5   : > { %v909_v49 = vadd.f32 %v908_v46, %v7278_v45  ;;  %v993_v50 = vpop.f32.mrf.mxu3  ;;  %v741_v51 = vpop.f32.mrf.mxu0  ;;  %v5169_v46 = vld [vmem:[%s9279_s3 + $0xb0] sm:$0xf]  ;;  %1875 = vmatpush.bf16.msrb.mxu0 %v5106_v43 }
  0xf6   : > { %v994_v52 = vadd.f32 %v993_v50, %v7282_v47  ;;  %v826_v53 = vpop.f32.mrf.mxu1  ;;  %v742_v60 = vadd.f32 %v741_v51, %v7270_v40  ;;  %v5298_v50 = vor.u32 %v6445_v44, %v5297_v39  ;;  %v497_v43 = vld [vmem:[%s7143_s18 + $0xd0] sm:$0xff]  ;;  %v498_v44 = vld [vmem:[%s7143_s18 + $0xd8] sm:$0xff] }
  0xf7   : > { %v1076_v55 = vmax.f32 %v909_v49, 0.0  ;;  %v827_v63 = vadd.f32 %v826_v53, %v7272_v42 }
  0xf8   : > { %v1077_v57 = vmax.f32 %v994_v52, 0.0  ;;  %5025 = vmatmul.msk.bf16.gmra.mxu0 %vm673_vm0, %v513_v48  ;;  %v1078_v1 = vmax.f32 %v742_v60, 0.0  ;;  %2022 = vmatpush.bf16.msrb.mxu3 %v5298_v50 }
  0xf9   : > { %v7343_v59 = vmax.f32 %v1074_v54, %v1076_v55  ;;  %5041 = vmatmul.msk.bf16.gmra.mxu1 %vm673_vm0, %v513_v48  ;;  %5057 = vmatmul.msk.bf16.gmra.mxu2 %vm673_vm0, %v513_v48  ;;  %v1079_v5 = vmax.f32 %v827_v63, 0.0 }
  0xfa   : > { %v7348_v62 = vmax.f32 %v1075_v56, %v1077_v57  ;;  %5073 = vmatmul.msk.bf16.gmra.mxu3 %vm673_vm0, %v513_v48  ;;  %v6413_v48 = vld [vmem:[%s9279_s3 + $0xb4] sm:$0xf0] }
  0xfb   : > { %v5170_v51 = vor.u32 %v6413_v48, %v5169_v46  ;;  %v5225_v48 = vld [vmem:[%s9279_s3 + $0x120] sm:$0xf] }
  0xfc   : > { %v911_v0 = vpop.f32.mrf.mxu2 }
  0xfd   : > { %v912_v2 = vadd.f32 %v911_v0, %v7278_v45  ;;  %v996_v3 = vpop.f32.mrf.mxu3  ;;  %v743_v4 = vpop.f32.mrf.mxu0  ;;  %1924 = vmatpush.bf16.msrb.mxu1 %v5170_v51 }
  0xfe   : > { %v997_v6 = vadd.f32 %v996_v3, %v7282_v47  ;;  %v828_v7 = vpop.f32.mrf.mxu1  ;;  %v744_v18 = vadd.f32 %v743_v4, %v7270_v40  ;;  %v496_v3 = vld [vmem:[%s7143_s18 + $0xc8] sm:$0xff] }
  0xff   : > { %v1080_v8 = vmax.f32 %v912_v2, 0.0  ;;  %v829_v20 = vadd.f32 %v828_v7, %v7272_v42  ;;  %v495_v2 = vld [vmem:[%s7143_s18 + $0xc0] sm:$0xff] }
 0x100   : > { %v1081_v9 = vmax.f32 %v997_v6, 0.0  ;;  %v1082_v28 = vmax.f32 %v744_v18, 0.0 }
 0x101   : > { %v7354_v10 = vmax.f32 %v1078_v1, %v1080_v8  ;;  %v1083_v30 = vmax.f32 %v829_v20, 0.0  ;;  %v515_v8 = vpack.c.bf16 %v496_v3, %v495_v2  ;;  %v6443_v3 = vld [vmem:[%s9279_s3 + $0x1a4] sm:$0xf0] }
 0x102   : > { %v7358_v13 = vmax.f32 %v1079_v5, %v1081_v9 }
 0x104   : > { %v913_v21 = vpop.f32.mrf.mxu2 }
 0x105   : > { %v914_v23 = vadd.f32 %v913_v21, %v7278_v45  ;;  %v998_v24 = vpop.f32.mrf.mxu3  ;;  %v746_v25 = vpop.f32.mrf.mxu0 }
 0x106   : > { %v999_v26 = vadd.f32 %v998_v24, %v7282_v47  ;;  %v831_v27 = vpop.f32.mrf.mxu1  ;;  %v747_v33 = vadd.f32 %v746_v25, %v7270_v40 }
 0x107   : > { %v1084_v29 = vmax.f32 %v914_v23, 0.0  ;;  %v832_v35 = vadd.f32 %v831_v27, %v7272_v42 }
 0x108   : > { %v1085_v31 = vmax.f32 %v999_v26, 0.0  ;;  %5026 = vmatmul.msk.bf16.gmra.mxu0 %vm673_vm0, %v514_v22  ;;  %v1086_v52 = vmax.f32 %v747_v33, 0.0 }
 0x109   : > { %v7371_v32 = vmax.f32 %v1082_v28, %v1084_v29  ;;  %5042 = vmatmul.msk.bf16.gmra.mxu1 %vm673_vm0, %v514_v22  ;;  %5058 = vmatmul.msk.bf16.gmra.mxu2 %vm673_vm0, %v514_v22  ;;  %v1087_v56 = vmax.f32 %v832_v35, 0.0 }
 0x10a   : > { %v7376_v34 = vmax.f32 %v1083_v30, %v1085_v31  ;;  %5074 = vmatmul.msk.bf16.gmra.mxu3 %vm673_vm0, %v514_v22 }
 0x10c   : > { %v916_v49 = vpop.f32.mrf.mxu2 }
 0x10d   : > { %v917_v53 = vadd.f32 %v916_v49, %v7278_v45  ;;  %v1001_v54 = vpop.f32.mrf.mxu3  ;;  %v748_v55 = vpop.f32.mrf.mxu0  ;;  %v6427_v49 = vld [vmem:[%s9279_s3 + $0x124] sm:$0xf0] }
 0x10e   : > { %v1002_v57 = vadd.f32 %v1001_v54, %v7282_v47  ;;  %v833_v60 = vpop.f32.mrf.mxu1  ;;  %v749_v5 = vadd.f32 %v748_v55, %v7270_v40  ;;  %v5226_v50 = vor.u32 %v6427_v49, %v5225_v48 }
 0x10f   : > { %v1088_v63 = vmax.f32 %v917_v53, 0.0  ;;  %v834_v6 = vadd.f32 %v833_v60, %v7272_v42  ;;  %v5097_v60 = vld [vmem:[%s9279_s3 + $0x20] sm:$0xf] }
 0x110   : > { %v1089_v0 = vmax.f32 %v1002_v57, 0.0  ;;  %v1090_v18 = vmax.f32 %v749_v5, 0.0  ;;  %1974 = vmatpush.bf16.msrb.mxu2 %v5226_v50  ;;  %v5161_v5 = vld [vmem:[%s9279_s3 + $0xa0] sm:$0xf] }
 0x111   : > { %v7400_v1 = vmax.f32 %v1086_v52, %v1088_v63  ;;  %v1091_v20 = vmax.f32 %v834_v6, 0.0  ;;  %v516_v52 = vpack.c.bf16 %v498_v44, %v497_v43  ;;  %v6395_v63 = vld [vmem:[%s9279_s3 + $0x24] sm:$0xf0] }
 0x112   : > { %v7404_v4 = vmax.f32 %v1087_v56, %v1089_v0  ;;  %v5289_v0 = vld [vmem:[%s9279_s3 + $0x1a0] sm:$0xf]  ;;  %v5098_v2 = vor.u32 %v6395_v63, %v5097_v60  ;;  %v6411_v6 = vld [vmem:[%s9279_s3 + $0xa4] sm:$0xf0]  ;;  %v5089_v60 = vld [vmem:[%s9279_s3 + $0x10] sm:$0xf] }
 0x113   : > { %v6393_v63 = vld [vmem:[%s9279_s3 + $0x14] sm:$0xf0] }
 0x114   : > { %v918_v7 = vpop.f32.mrf.mxu2  ;;  %1876 = vmatpush.bf16.msrb.mxu0 %v5098_v2 }
 0x115   : > { %v919_v9 = vadd.f32 %v918_v7, %v7278_v45  ;;  %v1003_v11 = vpop.f32.mrf.mxu3  ;;  %v751_v12 = vpop.f32.mrf.mxu0 }
 0x116   : > { %v1004_v15 = vadd.f32 %v1003_v11, %v7282_v47  ;;  %v836_v17 = vpop.f32.mrf.mxu1  ;;  %v752_v23 = vadd.f32 %v751_v12, %v7270_v40 }
 0x117   : > { %v1092_v19 = vmax.f32 %v919_v9, 0.0  ;;  %v837_v25 = vadd.f32 %v836_v17, %v7272_v42  ;;  %v5162_v9 = vor.u32 %v6411_v6, %v5161_v5  ;;  %v6409_v5 = vld [vmem:[%s9279_s3 + $0x94] sm:$0xf0] }
 0x118   : > { %v1093_v21 = vmax.f32 %v1004_v15, 0.0  ;;  %5027 = vmatmul.msk.bf16.gmra.mxu0 %vm673_vm0, %v515_v8  ;;  %v1094_v27 = vmax.f32 %v752_v23, 0.0 }
 0x119   : > { %v7411_v22 = vmax.f32 %v1090_v18, %v1092_v19  ;;  %5043 = vmatmul.msk.bf16.gmra.mxu1 %vm673_vm0, %v515_v8  ;;  %5059 = vmatmul.msk.bf16.gmra.mxu2 %vm673_vm0, %v515_v8  ;;  %v1095_v31 = vmax.f32 %v837_v25, 0.0 }
 0x11a   : > { %v7416_v24 = vmax.f32 %v1091_v20, %v1093_v21  ;;  %5075 = vmatmul.msk.bf16.gmra.mxu3 %vm673_vm0, %v515_v8  ;;  %v5290_v8 = vor.u32 %v6443_v3, %v5289_v0  ;;  %1925 = vmatpush.bf16.msrb.mxu1 %v5162_v9  ;;  %v5153_v0 = vld [vmem:[%s9279_s3 + $0x90] sm:$0xf]  ;;  %v5090_v3 = vor.u32 %v6393_v63, %v5089_v60  ;;  %v6423_v60 = vld [vmem:[%s9279_s3 + $0x104] sm:$0xf0]  ;;  %v5273_v63 = vld [vmem:[%s9279_s3 + $0x180] sm:$0xf] }
 0x11b   : > { %v501_v9 = vld [vmem:[%s7143_s18 + $0xf0] sm:$0xff] }
 0x11c   : > { %v921_v26 = vpop.f32.mrf.mxu2  ;;  %2023 = vmatpush.bf16.msrb.mxu3 %v5290_v8  ;;  %1877 = vmatpush.bf16.msrb.mxu0 %v5090_v3 }
 0x11d   : > { %v922_v28 = vadd.f32 %v921_v26, %v7278_v45  ;;  %v1006_v29 = vpop.f32.mrf.mxu3  ;;  %v7421_v30 = vpop.f32.mrf.mxu0  ;;  %v499_v26 = vld [vmem:[%s7143_s18 + $0xe0] sm:$0xff] }
 0x11e   : > { %v1007_v33 = vadd.f32 %v1006_v29, %v7282_v47  ;;  %v7424_v35 = vpop.f32.mrf.mxu1 }
 0x11f   : > { %v1096_v36 = vmax.f32 %v922_v28, 0.0 }
 0x120   : > { %v1097_v38 = vmax.f32 %v1007_v33, 0.0 }
 0x121   : > { %v7426_v39 = vmax.f32 %v1094_v27, %v1096_v36  ;;  %v500_v27 = vld [vmem:[%s7143_s18 + $0xe8] sm:$0xff] }
 0x122   : > { %v7430_v46 = vmax.f32 %v1095_v31, %v1097_v38  ;;  %v517_v31 = vpack.c.bf16 %v500_v27, %v499_v26 }
 0x124   : > { %v7438_v51 = vpop.f32.mrf.mxu2 }
 0x125   : > { %v7440_v53 = vpop.f32.mrf.mxu3  ;;  %v756_v54 = vpop.f32.mrf.mxu0 }
 0x126   : > { %v841_v55 = vpop.f32.mrf.mxu1  ;;  %v757_v56 = vadd.f32 %v756_v54, %v7270_v40 }
 0x127   : > { %v842_v57 = vadd.f32 %v841_v55, %v7272_v42 }
 0x128   : > { %5028 = vmatmul.msk.bf16.gmra.mxu0 %vm673_vm0, %v516_v52  ;;  %v1102_v11 = vmax.f32 %v757_v56, 0.0 }
 0x129   : > { %5044 = vmatmul.msk.bf16.gmra.mxu1 %vm673_vm0, %v516_v52  ;;  %5060 = vmatmul.msk.bf16.gmra.mxu2 %vm673_vm0, %v516_v52  ;;  %v1103_v18 = vmax.f32 %v842_v57, 0.0 }
 0x12a   : > { %5076 = vmatmul.msk.bf16.gmra.mxu3 %vm673_vm0, %v516_v52 }
 0x12c   : > { %v926_v7 = vpop.f32.mrf.mxu2 }
 0x12d   : > { %v927_v12 = vadd.f32 %v926_v7, %v7278_v45  ;;  %v1011_v15 = vpop.f32.mrf.mxu3  ;;  %v7467_v17 = vpop.f32.mrf.mxu0  ;;  %v5154_v7 = vor.u32 %v6409_v5, %v5153_v0 }
 0x12e   : > { %v1012_v19 = vadd.f32 %v1011_v15, %v7282_v47  ;;  %v7470_v20 = vpop.f32.mrf.mxu1  ;;  %v5081_v15 = vld [vmem:[%s9279_s3] sm:$0xf] }
 0x12f   : > { %v1104_v21 = vmax.f32 %v927_v12, 0.0  ;;  %1926 = vmatpush.bf16.msrb.mxu1 %v5154_v7 }
 0x130   : > { %v1105_v23 = vmax.f32 %v1012_v19, 0.0  ;;  %v5145_v19 = vld [vmem:[%s9279_s3 + $0x80] sm:$0xf] }
 0x131   : > { %v7472_v25 = vmax.f32 %v1102_v11, %v1104_v21  ;;  %v502_v11 = vld [vmem:[%s7143_s18 + $0xf8] sm:$0xff]  ;;  %s9165_s18 = scalar_lea.vmem [#allocation4], %s4918_s25 }
 0x132   : > { %v7476_v28 = vmax.f32 %v1103_v18, %v1105_v23  ;;  %v6391_v18 = vld [vmem:[%s9279_s3 + $0x4] sm:$0xf0]  ;;  %v518_v27 = vpack.c.bf16 %v502_v11, %v501_v9 }
 0x133   : > { %v5082_v21 = vor.u32 %v6391_v18, %v5081_v15  ;;  %v6407_v23 = vld [vmem:[%s9279_s3 + $0x84] sm:$0xf0] }
 0x134   : > { %v7478_v29 = vpop.f32.mrf.mxu2 }
 0x135   : > { %v7480_v33 = vpop.f32.mrf.mxu3  ;;  %v761_v36 = vpop.f32.mrf.mxu0  ;;  %1878 = vmatpush.bf16.msrb.mxu0 %v5082_v21 }
 0x136   : > { %v846_v38 = vpop.f32.mrf.mxu1  ;;  %v762_v43 = vadd.f32 %v761_v36, %v7270_v40 }
 0x137   : > { %v847_v44 = vadd.f32 %v846_v38, %v7272_v42 }
 0x138   : > { %5029 = vmatmul.msk.bf16.gmra.mxu0 %vm673_vm0, %v517_v31  ;;  %v1110_v49 = vmax.f32 %v762_v43, 0.0 }
 0x139   : > { %5045 = vmatmul.msk.bf16.gmra.mxu1 %vm673_vm0, %v517_v31  ;;  %5061 = vmatmul.msk.bf16.gmra.mxu2 %vm673_vm0, %v517_v31  ;;  %v1111_v50 = vmax.f32 %v847_v44, 0.0  ;;  %v5217_v44 = vld [vmem:[%s9279_s3 + $0x110] sm:$0xf] }
 0x13a   : > { %5077 = vmatmul.msk.bf16.gmra.mxu3 %vm673_vm0, %v517_v31  ;;  %v5146_v31 = vor.u32 %v6407_v23, %v5145_v19 }
 0x13c   : > { %v931_v48 = vpop.f32.mrf.mxu2  ;;  %1927 = vmatpush.bf16.msrb.mxu1 %v5146_v31 }
 0x13d   : > { %v932_v52 = vadd.f32 %v931_v48, %v7278_v45  ;;  %v1016_v54 = vpop.f32.mrf.mxu3  ;;  %v7489_v55 = vpop.f32.mrf.mxu0  ;;  %v6425_v48 = vld [vmem:[%s9279_s3 + $0x114] sm:$0xf0] }
 0x13e   : > { %v1017_v56 = vadd.f32 %v1016_v54, %v7282_v47  ;;  %v7492_v57 = vpop.f32.mrf.mxu1 }
 0x13f   : > { %v1112_v2 = vmax.f32 %v932_v52, 0.0  ;;  %v6441_v52 = vld [vmem:[%s9279_s3 + $0x194] sm:$0xf0] }
 0x140   : > { %v1113_v6 = vmax.f32 %v1017_v56, 0.0  ;;  %v5209_v56 = vld [vmem:[%s9279_s3 + $0x100] sm:$0xf] }
 0x141   : > { %v7506_v8 = vmax.f32 %v1110_v49, %v1112_v2  ;;  %v5281_v49 = vld [vmem:[%s9279_s3 + $0x190] sm:$0xf]  ;;  %v5210_v0 = vor.u32 %v6423_v60, %v5209_v56  ;;  %v6439_v2 = vld [vmem:[%s9279_s3 + $0x184] sm:$0xf0] }
 0x142   : > { %v7510_v12 = vmax.f32 %v1111_v50, %v1113_v6  ;;  %v5218_v50 = vor.u32 %v6425_v48, %v5217_v44  ;;  %v5282_v54 = vor.u32 %v6441_v52, %v5281_v49  ;;  %v5274_v5 = vor.u32 %v6439_v2, %v5273_v63 }
 0x144   : > { %v7524_v26 = vpop.f32.mrf.mxu2  ;;  %1975 = vmatpush.bf16.msrb.mxu2 %v5218_v50  ;;  %2024 = vmatpush.bf16.msrb.mxu3 %v5282_v54 }
 0x145   : > { %v7526_v36 = vpop.f32.mrf.mxu3  ;;  %v766_v38 = vpop.f32.mrf.mxu0 }
 0x146   : > { %v851_v43 = vpop.f32.mrf.mxu1 }
 0x148   : > { %5030 = vmatmul.msk.bf16.gmra.mxu0 %vm673_vm0, %v518_v27  ;;  %1976 = vmatpush.bf16.msrb.mxu2 %v5210_v0 }
 0x149   : > { %5046 = vmatmul.msk.bf16.gmra.mxu1 %vm673_vm0, %v518_v27  ;;  %5062 = vmatmul.msk.bf16.gmra.mxu2 %vm673_vm0, %v518_v27 }
 0x14a   : > { %5078 = vmatmul.msk.bf16.gmra.mxu3 %vm673_vm0, %v518_v27 }
 0x14b   : > { %2025 = vmatpush.bf16.msrb.mxu3 %v5274_v5 }
 0x14c   : > { %v936_v3 = vpop.f32.mrf.mxu2 }
 0x14d   : > { %v1021_v6 = vpop.f32.mrf.mxu3  ;;  %v767_v7 = vpop.f32.mrf.mxu0 }
 0x14e   : > { %v852_v9 = vpop.f32.mrf.mxu1  ;;  %v6821_v6 = vmov 0.0  }
 0x154   : > { %v937_v11 = vpop.f32.mrf.mxu2 }
 0x155   : > { %v1022_v15 = vpop.f32.mrf.mxu3  ;;  %v769_v18 = vpop.f32.mrf.mxu0 }
 0x156   : > { %v854_v19 = vpop.f32.mrf.mxu1  ;;  %v770_v21 = vadd.f32 %v769_v18, %v7270_v40 }
 0x157   : > { %v855_v23 = vadd.f32 %v854_v19, %v7272_v42 }
 0x158   : > { %v1118_v31 = vmax.f32 %v770_v21, 0.0 }
 0x159   : > { %v1119_v48 = vmax.f32 %v855_v23, 0.0 }
 0x15c   : > { %v939_v27 = vpop.f32.mrf.mxu2 }
 0x15d   : > { %v940_v38 = vadd.f32 %v939_v27, %v7278_v45  ;;  %v1024_v43 = vpop.f32.mrf.mxu3  ;;  %v771_v44 = vpop.f32.mrf.mxu0 }
 0x15e   : > { %v1025_v49 = vadd.f32 %v1024_v43, %v7282_v47  ;;  %v856_v50 = vpop.f32.mrf.mxu1  ;;  %v772_v0 = vadd.f32 %v771_v44, %v7270_v40 }
 0x15f   : > { %v1120_v52 = vmax.f32 %v940_v38, 0.0  ;;  %v857_v3 = vadd.f32 %v856_v50, %v7272_v42 }
 0x160   : > { %v1121_v54 = vmax.f32 %v1025_v49, 0.0 }
 0x161   : > { %v1202_v56 = vmax.f32 %v1118_v31, %v1120_v52 }
 0x162   : > { %v1203_v60 = vmax.f32 %v1119_v48, %v1121_v54 }
 0x163   : > { %v1230_v63 = vmax.f32 %v7286_v58, %v1202_v56  ;;  %v1122_v58 = vmax.f32 %v772_v0, 0.0 }
 0x164   : > { %v1231_v2 = vmax.f32 %v7290_v61, %v1203_v60  ;;  %v941_v5 = vpop.f32.mrf.mxu2  ;;  %v1123_v61 = vmax.f32 %v857_v3, 0.0 }
 0x165   : > { %v7564_v7 = vpack.c.bf16 %v1230_v63, %v6821_v6  ;;  %v942_v9 = vadd.f32 %v941_v5, %v7278_v45  ;;  %v1026_v11 = vpop.f32.mrf.mxu3  ;;  %v774_v15 = vpop.f32.mrf.mxu0 }
 0x166   : > { %v7567_v18 = vpack.c.bf16 %v1231_v2, %v6821_v6  ;;  %v1027_v19 = vadd.f32 %v1026_v11, %v7282_v47  ;;  %v859_v21 = vpop.f32.mrf.mxu1  ;;  %v775_v38 = vadd.f32 %v774_v15, %v7270_v40 }
 0x167   : > { %v1124_v23 = vmax.f32 %v942_v9, 0.0  ;;  %1879 = vmatmul.bf16.vlgmr.msrb.gmra.mxu0 %v7564_v7  ;;  %v860_v44 = vadd.f32 %v859_v21, %v7272_v42 }
 0x168   : > { %v1125_v27 = vmax.f32 %v1027_v19, 0.0  ;;  %1928 = vmatmul.bf16.vlgmr.msrb.gmra.mxu1 %v7567_v18  ;;  %v1126_v52 = vmax.f32 %v775_v38, 0.0 }
 0x169   : > { %v1204_v31 = vmax.f32 %v1122_v58, %v1124_v23  ;;  %v1127_v3 = vmax.f32 %v860_v44, 0.0 }
 0x16a   : > { %v1205_v43 = vmax.f32 %v1123_v61, %v1125_v27 }
 0x16b   : > { %v1232_v48 = vmax.f32 %v7303_v14, %v1204_v31 }
 0x16c   : > { %v1233_v49 = vmax.f32 %v7308_v16, %v1205_v43  ;;  %v944_v50 = vpop.f32.mrf.mxu2 }
 0x16d   : > { %v945_v54 = vadd.f32 %v944_v50, %v7278_v45  ;;  %v1029_v56 = vpop.f32.mrf.mxu3  ;;  %v776_v60 = vpop.f32.mrf.mxu0  ;;  %v7577_v0 = vpack.c.bf16 %v1232_v48, %v1230_v63 }
 0x16e   : > { %v1030_v5 = vadd.f32 %v1029_v56, %v7282_v47  ;;  %v861_v6 = vpop.f32.mrf.mxu1  ;;  %v7580_v9 = vpack.c.bf16 %v1233_v49, %v1231_v2  ;;  %v777_v21 = vadd.f32 %v776_v60, %v7270_v40 }
 0x16f   : > { %v1128_v11 = vmax.f32 %v945_v54, 0.0  ;;  %1977 = vmatmul.bf16.vlgmr.msrb.gmra.mxu2 %v7577_v0  ;;  %v862_v58 = vadd.f32 %v861_v6, %v7272_v42 }
 0x170   : > { %v1129_v14 = vmax.f32 %v1030_v5, 0.0  ;;  %2026 = vmatmul.bf16.vlgmr.msrb.gmra.mxu3 %v7580_v9  ;;  %v1130_v50 = vmax.f32 %v777_v21, 0.0 }
 0x171   : > { %v1206_v16 = vmax.f32 %v1126_v52, %v1128_v11  ;;  %v1131_v52 = vmax.f32 %v862_v58, 0.0 }
 0x172   : > { %v1207_v15 = vmax.f32 %v1127_v3, %v1129_v14 }
 0x173   : > { %v1234_v19 = vmax.f32 %v7332_v37, %v1206_v16 }
 0x174   : > { %v1235_v63 = vmax.f32 %v7336_v41, %v1207_v15  ;;  %v946_v23 = vpop.f32.mrf.mxu2 }
 0x175   : > { %v7588_v61 = vpack.c.bf16 %v1234_v19, %v1232_v48  ;;  %v947_v2 = vadd.f32 %v946_v23, %v7278_v45  ;;  %v1031_v27 = vpop.f32.mrf.mxu3  ;;  %v779_v31 = vpop.f32.mrf.mxu0 }
 0x176   : > { %v7591_v38 = vpack.c.bf16 %v1235_v63, %v1233_v49  ;;  %v1032_v43 = vadd.f32 %v1031_v27, %v7282_v47  ;;  %v864_v44 = vpop.f32.mrf.mxu1  ;;  %v780_v48 = vadd.f32 %v779_v31, %v7270_v40 }
 0x177   : > { %v1132_v37 = vmax.f32 %v947_v2, 0.0  ;;  %1884 = vmatmul.bf16.gmra.mxu0 %v7588_v61  ;;  %v865_v60 = vadd.f32 %v864_v44, %v7272_v42 }
 0x178   : > { %v1133_v41 = vmax.f32 %v1032_v43, 0.0  ;;  %1933 = vmatmul.bf16.gmra.mxu1 %v7591_v38  ;;  %v1134_v6 = vmax.f32 %v780_v48, 0.0 }
 0x179   : > { %v1208_v54 = vmax.f32 %v1130_v50, %v1132_v37  ;;  %v1135_v21 = vmax.f32 %v865_v60, 0.0 }
 0x17a   : > { %v1209_v56 = vmax.f32 %v1131_v52, %v1133_v41  ;;  %v5139_v52 = vld [vmem:[%s9279_s3 + $0x78] sm:$0xf0] }
 0x17b   : > { %v1236_v49 = vmax.f32 %v7343_v59, %v1208_v54 }
 0x17c   : > { %v949_v3 = vpop.f32.mrf.mxu2  ;;  %v1237_v5 = vmax.f32 %v7348_v62, %v1209_v56 }
 0x17d   : > { %v950_v11 = vadd.f32 %v949_v3, %v7278_v45  ;;  %v1034_v14 = vpop.f32.mrf.mxu3  ;;  %v781_v16 = vpop.f32.mrf.mxu0  ;;  %v7601_v15 = vpack.c.bf16 %v1236_v49, %v1234_v19 }
 0x17e   : > { %v1035_v58 = vadd.f32 %v1034_v14, %v7282_v47  ;;  %v866_v23 = vpop.f32.mrf.mxu1  ;;  %v7604_v2 = vpack.c.bf16 %v1237_v5, %v1235_v63  ;;  %v782_v44 = vadd.f32 %v781_v16, %v7270_v40  ;;  %v6404_v63 = vld [vmem:[%s9279_s3 + $0x74] sm:$0xf] }
 0x17f   : > { %v1136_v27 = vmax.f32 %v950_v11, 0.0  ;;  %1982 = vmatmul.bf16.gmra.mxu2 %v7601_v15  ;;  %v867_v50 = vadd.f32 %v866_v23, %v7272_v42  ;;  %v5142_v56 = vor.u32 %v6404_v63, %v5139_v52 }
 0x180   : > { %v1137_v59 = vmax.f32 %v1035_v58, 0.0  ;;  %2031 = vmatmul.bf16.gmra.mxu3 %v7604_v2 }
 0x181   : > { %v1210_v62 = vmax.f32 %v1134_v6, %v1136_v27  ;;  %v1138_v6 = vmax.f32 %v782_v44, 0.0  ;;  %2165 = vmatpush.bf16.msra.mxu2 %v5142_v56  ;;  %v1139_v14 = vmax.f32 %v867_v50, 0.0  ;;  %v6469_v27 = vld [vmem:[%s9279_s3 + $0x274] sm:$0xf0]  ;;  %v5203_v44 = vld [vmem:[%s9279_s3 + $0xf8] sm:$0xf0] }
 0x182   : > { %v1211_v31 = vmax.f32 %v1135_v21, %v1137_v59  ;;  %v6420_v59 = vld [vmem:[%s9279_s3 + $0xf4] sm:$0xf]  ;;  %v5457_v50 = vld [vmem:[%s9279_s3 + $0x2f0] sm:$0xf] }
 0x183   : > { %v1238_v43 = vmax.f32 %v7354_v10, %v1210_v62 }
 0x184   : > { %v1239_v19 = vmax.f32 %v7358_v13, %v1211_v31  ;;  %v951_v37 = vpop.f32.mrf.mxu2 }
 0x185   : > { %v952_v41 = vadd.f32 %v951_v37, %v7278_v45  ;;  %v1036_v54 = vpop.f32.mrf.mxu3  ;;  %v784_v48 = vpop.f32.mrf.mxu0  ;;  %v7619_v10 = vpack.c.bf16 %v1238_v43, %v1236_v49  ;;  %v6485_v37 = vld [vmem:[%s9279_s3 + $0x2f4] sm:$0xf0] }
 0x186   : > { %v1037_v13 = vadd.f32 %v1036_v54, %v7282_v47  ;;  %v869_v60 = vpop.f32.mrf.mxu1  ;;  %v7622_v3 = vpack.c.bf16 %v1239_v19, %v1237_v5  ;;  %v785_v58 = vadd.f32 %v784_v48, %v7270_v40  ;;  %v5393_v5 = vld [vmem:[%s9279_s3 + $0x270] sm:$0xf]  ;;  %v5458_v54 = vor.u32 %v6485_v37, %v5457_v50 }
 0x187   : > { %v1140_v11 = vmax.f32 %v952_v41, 0.0  ;;  %1889 = vmatmul.bf16.gmra.mxu0 %v7619_v10  ;;  %v870_v23 = vadd.f32 %v869_v60, %v7272_v42  ;;  %v5394_v31 = vor.u32 %v6469_v27, %v5393_v5  ;;  %v5206_v41 = vor.u32 %v6420_v59, %v5203_v44  ;;  %v6402_v59 = vld [vmem:[%s9279_s3 + $0x64] sm:$0xf] }
 0x188   : > { %v1141_v16 = vmax.f32 %v1037_v13, 0.0  ;;  %1938 = vmatmul.bf16.gmra.mxu1 %v7622_v3  ;;  %v1142_v48 = vmax.f32 %v785_v58, 0.0 }
 0x189   : > { %v1212_v21 = vmax.f32 %v1138_v6, %v1140_v11  ;;  %2067 = vmatpush.bf16.msra.mxu0 %v5394_v31  ;;  %v1143_v6 = vmax.f32 %v870_v23, 0.0  ;;  %2214 = vmatpush.bf16.msra.mxu3 %v5206_v41  ;;  %v5131_v31 = vld [vmem:[%s9279_s3 + $0x68] sm:$0xf0] }
 0x18a   : > { %v1213_v49 = vmax.f32 %v1139_v14, %v1141_v16  ;;  %2116 = vmatpush.bf16.msra.mxu1 %v5458_v54 }
 0x18b   : > { %v1240_v62 = vmax.f32 %v7371_v32, %v1212_v21 }
 0x18c   : > { %v954_v63 = vpop.f32.mrf.mxu2  ;;  %v1241_v52 = vmax.f32 %v7376_v34, %v1213_v49 }
 0x18d   : > { %v955_v32 = vadd.f32 %v954_v63, %v7278_v45  ;;  %v1039_v56 = vpop.f32.mrf.mxu3  ;;  %v786_v13 = vpop.f32.mrf.mxu0  ;;  %v7649_v60 = vpack.c.bf16 %v1240_v62, %v1238_v43  ;;  %v5134_v63 = vor.u32 %v6402_v59, %v5131_v31 }
 0x18e   : > { %v1040_v11 = vadd.f32 %v1039_v56, %v7282_v47  ;;  %v871_v14 = vpop.f32.mrf.mxu1  ;;  %v7652_v16 = vpack.c.bf16 %v1241_v52, %v1239_v19  ;;  %v787_v5 = vadd.f32 %v786_v13, %v7270_v40 }
 0x18f   : > { %v1144_v21 = vmax.f32 %v955_v32, 0.0  ;;  %1987 = vmatmul.bf16.gmra.mxu2 %v7649_v60  ;;  %v872_v27 = vadd.f32 %v871_v14, %v7272_v42 }
 0x190   : > { %v1145_v34 = vmax.f32 %v1040_v11, 0.0  ;;  %2036 = vmatmul.bf16.gmra.mxu3 %v7652_v16  ;;  %2166 = vmatpush.bf16.msra.mxu2 %v5134_v63 }
 0x191   : > { %v1214_v58 = vmax.f32 %v1142_v48, %v1144_v21  ;;  %v1146_v48 = vmax.f32 %v787_v5, 0.0  ;;  %v1147_v56 = vmax.f32 %v872_v27, 0.0  ;;  %v6467_v21 = vld [vmem:[%s9279_s3 + $0x264] sm:$0xf0]  ;;  %v5195_v5 = vld [vmem:[%s9279_s3 + $0xe8] sm:$0xf0] }
 0x192   : > { %v1215_v49 = vmax.f32 %v1143_v6, %v1145_v34  ;;  %v6418_v34 = vld [vmem:[%s9279_s3 + $0xe4] sm:$0xf]  ;;  %v5449_v27 = vld [vmem:[%s9279_s3 + $0x2e0] sm:$0xf] }
 0x193   : > { %v1242_v43 = vmax.f32 %v7400_v1, %v1214_v58 }
 0x194   : > { %v1243_v23 = vmax.f32 %v7404_v4, %v1215_v49  ;;  %v956_v19 = vpop.f32.mrf.mxu2 }
 0x195   : > { %v957_v44 = vadd.f32 %v956_v19, %v7278_v45  ;;  %v1041_v50 = vpop.f32.mrf.mxu3  ;;  %v789_v37 = vpop.f32.mrf.mxu0  ;;  %v7667_v1 = vpack.c.bf16 %v1242_v43, %v1240_v62  ;;  %v6483_v19 = vld [vmem:[%s9279_s3 + $0x2e4] sm:$0xf0] }
 0x196   : > { %v1042_v4 = vadd.f32 %v1041_v50, %v7282_v47  ;;  %v874_v41 = vpop.f32.mrf.mxu1  ;;  %v7670_v54 = vpack.c.bf16 %v1243_v23, %v1241_v52  ;;  %v790_v11 = vadd.f32 %v789_v37, %v7270_v40  ;;  %v5385_v52 = vld [vmem:[%s9279_s3 + $0x260] sm:$0xf]  ;;  %v5450_v50 = vor.u32 %v6483_v19, %v5449_v27 }
 0x197   : > { %v1148_v32 = vmax.f32 %v957_v44, 0.0  ;;  %1894 = vmatmul.bf16.gmra.mxu0 %v7667_v1  ;;  %v875_v14 = vadd.f32 %v874_v41, %v7272_v42  ;;  %v5386_v49 = vor.u32 %v6467_v21, %v5385_v52  ;;  %v5198_v44 = vor.u32 %v6418_v34, %v5195_v5 }
 0x198   : > { %v1149_v13 = vmax.f32 %v1042_v4, 0.0  ;;  %1943 = vmatmul.bf16.gmra.mxu1 %v7670_v54  ;;  %v1150_v37 = vmax.f32 %v790_v11, 0.0  ;;  %v924_v11 = vadd.f32 %v7438_v51, %v7278_v45  ;;  %v839_v34 = vadd.f32 %v7424_v35, %v7272_v42 }
 0x199   : > { %v1216_v6 = vmax.f32 %v1146_v48, %v1148_v32  ;;  %2068 = vmatpush.bf16.msra.mxu0 %v5386_v49  ;;  %v1151_v48 = vmax.f32 %v875_v14, 0.0  ;;  %2215 = vmatpush.bf16.msra.mxu3 %v5198_v44 }
 0x19a   : > { %v1217_v62 = vmax.f32 %v1147_v56, %v1149_v13  ;;  %2117 = vmatpush.bf16.msra.mxu1 %v5450_v50  ;;  %v1100_v27 = vmax.f32 %v924_v11, 0.0 }
 0x19b   : > { %v1244_v58 = vmax.f32 %v7411_v22, %v1216_v6 }
 0x19c   : > { %v959_v59 = vpop.f32.mrf.mxu2  ;;  %v1245_v31 = vmax.f32 %v7416_v24, %v1217_v62  ;;  %v1009_v62 = vadd.f32 %v7440_v53, %v7282_v47  ;;  %v6400_v53 = vld [vmem:[%s9279_s3 + $0x54] sm:$0xf] }
 0x19d   : > { %v960_v22 = vadd.f32 %v959_v59, %v7278_v45  ;;  %v1044_v63 = vpop.f32.mrf.mxu3  ;;  %v791_v4 = vpop.f32.mrf.mxu0  ;;  %v7697_v41 = vpack.c.bf16 %v1244_v58, %v1242_v43 }
 0x19e   : > { %v1045_v32 = vadd.f32 %v1044_v63, %v7282_v47  ;;  %v876_v56 = vpop.f32.mrf.mxu1  ;;  %v7700_v13 = vpack.c.bf16 %v1245_v31, %v1243_v23  ;;  %v754_v23 = vadd.f32 %v7421_v30, %v7270_v40  ;;  %v792_v21 = vadd.f32 %v791_v4, %v7270_v40  ;;  %v5123_v30 = vld [vmem:[%s9279_s3 + $0x58] sm:$0xf0] }
 0x19f   : > { %v1152_v6 = vmax.f32 %v960_v22, 0.0  ;;  %1992 = vmatmul.bf16.gmra.mxu2 %v7697_v41  ;;  %v877_v5 = vadd.f32 %v876_v56, %v7272_v42  ;;  %v5126_v35 = vor.u32 %v6400_v53, %v5123_v30  ;;  %v5441_v53 = vld [vmem:[%s9279_s3 + $0x2d0] sm:$0xf]  ;;  %v6481_v30 = vld [vmem:[%s9279_s3 + $0x2d4] sm:$0xf0] }
 0x1a0   : > { %v1153_v24 = vmax.f32 %v1045_v32, 0.0  ;;  %2041 = vmatmul.bf16.gmra.mxu3 %v7700_v13  ;;  %v1098_v63 = vmax.f32 %v754_v23, 0.0  ;;  %v1154_v4 = vmax.f32 %v792_v21, 0.0  ;;  %v1099_v32 = vmax.f32 %v839_v34, 0.0  ;;  %v6465_v23 = vld [vmem:[%s9279_s3 + $0x254] sm:$0xf0] }
 0x1a1   : > { %v1218_v43 = vmax.f32 %v1150_v37, %v1152_v6  ;;  %2167 = vmatpush.bf16.msra.mxu2 %v5126_v35  ;;  %v1155_v56 = vmax.f32 %v877_v5, 0.0  ;;  %v6416_v21 = vld [vmem:[%s9279_s3 + $0xd4] sm:$0xf] }
 0x1a2   : > { %v1219_v14 = vmax.f32 %v1151_v48, %v1153_v24 }
 0x1a3   : > { %v1246_v52 = vmax.f32 %v7426_v39, %v1218_v43 }
 0x1a4   : > { %v1247_v49 = vmax.f32 %v7430_v46, %v1219_v14  ;;  %v961_v51 = vpop.f32.mrf.mxu2  ;;  %v1101_v46 = vmax.f32 %v1009_v62, 0.0  ;;  %v5377_v14 = vld [vmem:[%s9279_s3 + $0x250] sm:$0xf] }
 0x1a5   : > { %v962_v39 = vadd.f32 %v961_v51, %v7278_v45  ;;  %v1046_v19 = vpop.f32.mrf.mxu3  ;;  %v794_v59 = vpop.f32.mrf.mxu0  ;;  %v7723_v44 = vpack.c.bf16 %v1246_v52, %v1244_v58  ;;  %v1192_v58 = vmax.f32 %v1098_v63, %v1100_v27  ;;  %v5378_v5 = vor.u32 %v6465_v23, %v5377_v14  ;;  %v5187_v51 = vld [vmem:[%s9279_s3 + $0xd8] sm:$0xf0]  ;;  %v6463_v14 = vld [vmem:[%s9279_s3 + $0x244] sm:$0xf0] }
 0x1a6   : > { %v1047_v50 = vadd.f32 %v1046_v19, %v7282_v47  ;;  %v879_v37 = vpop.f32.mrf.mxu1  ;;  %v7726_v22 = vpack.c.bf16 %v1247_v49, %v1245_v31  ;;  %v795_v11 = vadd.f32 %v794_v59, %v7270_v40  ;;  %v1193_v43 = vmax.f32 %v1099_v32, %v1101_v46 }
 0x1a7   : > { %v1156_v48 = vmax.f32 %v962_v39, 0.0  ;;  %1899 = vmatmul.bf16.gmra.mxu0 %v7723_v44  ;;  %v880_v31 = vadd.f32 %v879_v37, %v7272_v42  ;;  %v5190_v19 = vor.u32 %v6416_v21, %v5187_v51  ;;  %v5442_v59 = vor.u32 %v6481_v30, %v5441_v53 }
 0x1a8   : > { %v1157_v6 = vmax.f32 %v1047_v50, 0.0  ;;  %1948 = vmatmul.bf16.gmra.mxu1 %v7726_v22  ;;  %v1158_v35 = vmax.f32 %v795_v11, 0.0  ;;  %2069 = vmatpush.bf16.msra.mxu0 %v5378_v5  ;;  %v759_v11 = vadd.f32 %v7467_v17, %v7270_v40  ;;  %v5433_v5 = vld [vmem:[%s9279_s3 + $0x2c0] sm:$0xf]  ;;  %v6479_v17 = vld [vmem:[%s9279_s3 + $0x2c4] sm:$0xf0]  ;;  %v844_v51 = vadd.f32 %v7470_v20, %v7272_v42 }
 0x1a9   : > { %v1220_v24 = vmax.f32 %v1154_v4, %v1156_v48  ;;  %v1159_v4 = vmax.f32 %v880_v31, 0.0  ;;  %2216 = vmatpush.bf16.msra.mxu3 %v5190_v19  ;;  %2118 = vmatpush.bf16.msra.mxu1 %v5442_v59  ;;  %v5179_v19 = vld [vmem:[%s9279_s3 + $0xc8] sm:$0xf0] }
 0x1aa   : > { %v1221_v62 = vmax.f32 %v1155_v56, %v1157_v6 }
 0x1ab   : > { %v1248_v34 = vmax.f32 %v1192_v58, %v1220_v24  ;;  %v929_v58 = vadd.f32 %v7478_v29, %v7278_v45  ;;  %v5369_v29 = vld [vmem:[%s9279_s3 + $0x240] sm:$0xf] }
 0x1ac   : > { %v964_v27 = vpop.f32.mrf.mxu2  ;;  %v1249_v39 = vmax.f32 %v1193_v43, %v1221_v62  ;;  %v1014_v43 = vadd.f32 %v7480_v33, %v7282_v47  ;;  %v5370_v21 = vor.u32 %v6463_v14, %v5369_v29  ;;  %v6414_v33 = vld [vmem:[%s9279_s3 + $0xc4] sm:$0xf] }
 0x1ad   : > { %v965_v46 = vadd.f32 %v964_v27, %v7278_v45  ;;  %v1049_v50 = vpop.f32.mrf.mxu3  ;;  %v796_v37 = vpop.f32.mrf.mxu0  ;;  %v7751_v63 = vpack.c.bf16 %v1248_v34, %v1246_v52  ;;  %v6398_v52 = vld [vmem:[%s9279_s3 + $0x44] sm:$0xf]  ;;  %v5434_v27 = vor.u32 %v6479_v17, %v5433_v5  ;;  %v1108_v59 = vmax.f32 %v929_v58, 0.0  ;;  %v5353_v5 = vld [vmem:[%s9279_s3 + $0x220] sm:$0xf] }
 0x1ae   : > { %v1050_v48 = vadd.f32 %v1049_v50, %v7282_v47  ;;  %v881_v32 = vpop.f32.mrf.mxu1  ;;  %v7754_v56 = vpack.c.bf16 %v1249_v39, %v1247_v49  ;;  %v5115_v49 = vld [vmem:[%s9279_s3 + $0x48] sm:$0xf0]  ;;  %v797_v30 = vadd.f32 %v796_v37, %v7270_v40  ;;  %2070 = vmatpush.bf16.msra.mxu0 %v5370_v21  ;;  %v1109_v20 = vmax.f32 %v1014_v43, 0.0  ;;  %v6459_v17 = vld [vmem:[%s9279_s3 + $0x224] sm:$0xf0] }
 0x1af   : > { %v1160_v6 = vmax.f32 %v965_v46, 0.0  ;;  %1997 = vmatmul.bf16.gmra.mxu2 %v7751_v63  ;;  %v5118_v31 = vor.u32 %v6398_v52, %v5115_v49  ;;  %v882_v46 = vadd.f32 %v881_v32, %v7272_v42  ;;  %2119 = vmatpush.bf16.msra.mxu1 %v5434_v27  ;;  %v6461_v32 = vld [vmem:[%s9279_s3 + $0x234] sm:$0xf0]  ;;  %v5354_v27 = vor.u32 %v6459_v17, %v5353_v5  ;;  %v5107_v5 = vld [vmem:[%s9279_s3 + $0x38] sm:$0xf0] }
 0x1b0   : > { %v1161_v24 = vmax.f32 %v1050_v48, 0.0  ;;  %2046 = vmatmul.bf16.gmra.mxu3 %v7754_v56  ;;  %v1106_v48 = vmax.f32 %v759_v11, 0.0  ;;  %v1107_v11 = vmax.f32 %v844_v51, 0.0  ;;  %v1162_v43 = vmax.f32 %v797_v30, 0.0  ;;  %v6412_v17 = vld [vmem:[%s9279_s3 + $0xb4] sm:$0xf] }
 0x1b1   : > { %v1222_v62 = vmax.f32 %v1158_v35, %v1160_v6  ;;  %2168 = vmatpush.bf16.msra.mxu2 %v5118_v31  ;;  %v6477_v31 = vld [vmem:[%s9279_s3 + $0x2b4] sm:$0xf0]  ;;  %v1163_v14 = vmax.f32 %v882_v46, 0.0 }
 0x1b2   : > { %v1223_v23 = vmax.f32 %v1159_v4, %v1161_v24  ;;  %v5182_v4 = vor.u32 %v6414_v33, %v5179_v19  ;;  %v1196_v29 = vmax.f32 %v1106_v48, %v1108_v59  ;;  %v5417_v19 = vld [vmem:[%s9279_s3 + $0x2a0] sm:$0xf]  ;;  %v6475_v59 = vld [vmem:[%s9279_s3 + $0x2a4] sm:$0xf0]  ;;  %v1197_v46 = vmax.f32 %v1107_v11, %v1109_v20 }
 0x1b3   : > { %v1250_v53 = vmax.f32 %v7472_v25, %v1222_v62  ;;  %v7839_v20 = vadd.f32 %v7526_v36, %v7282_v47  ;;  %v5409_v36 = vld [vmem:[%s9279_s3 + $0x290] sm:$0xf] }
 0x1b4   : > { %v1251_v35 = vmax.f32 %v7476_v28, %v1223_v23  ;;  %v966_v50 = vpop.f32.mrf.mxu2  ;;  %2217 = vmatpush.bf16.msra.mxu3 %v5182_v4  ;;  %v5361_v28 = vld [vmem:[%s9279_s3 + $0x230] sm:$0xf]  ;;  %v5418_v4 = vor.u32 %v6475_v59, %v5417_v19 }
 0x1b5   : > { %v967_v25 = vadd.f32 %v966_v50, %v7278_v45  ;;  %v1051_v6 = vpop.f32.mrf.mxu3  ;;  %v799_v37 = vpop.f32.mrf.mxu0  ;;  %v7795_v24 = vpack.c.bf16 %v1250_v53, %v1248_v34  ;;  %v5425_v34 = vld [vmem:[%s9279_s3 + $0x2b0] sm:$0xf]  ;;  %v1117_v19 = vmax.f32 %v7839_v20, 0.0  ;;  %v6394_v20 = vld [vmem:[%s9279_s3 + $0x24] sm:$0xf] }
 0x1b6   : > { %v1052_v52 = vadd.f32 %v1051_v6, %v7282_v47  ;;  %v884_v49 = vpop.f32.mrf.mxu1  ;;  %v7798_v58 = vpack.c.bf16 %v1251_v35, %v1249_v39  ;;  %v5362_v39 = vor.u32 %v6461_v32, %v5361_v28  ;;  %v5426_v21 = vor.u32 %v6477_v31, %v5425_v34 }
 0x1b7   : > { %v1164_v62 = vmax.f32 %v967_v25, 0.0  ;;  %1904 = vmatmul.bf16.gmra.mxu0 %v7795_v24  ;;  %v800_v51 = vadd.f32 %v799_v37, %v7270_v40  ;;  %v885_v30 = vadd.f32 %v884_v49, %v7272_v42 }
 0x1b8   : > { %v1165_v23 = vmax.f32 %v1052_v52, 0.0  ;;  %1953 = vmatmul.bf16.gmra.mxu1 %v7798_v58  ;;  %2071 = vmatpush.bf16.msra.mxu0 %v5362_v39 }
 0x1b9   : > { %v1224_v33 = vmax.f32 %v1162_v43, %v1164_v62  ;;  %2120 = vmatpush.bf16.msra.mxu1 %v5426_v21  ;;  %v1166_v37 = vmax.f32 %v800_v51, 0.0  ;;  %v1167_v52 = vmax.f32 %v885_v30, 0.0  ;;  %v7835_v43 = vadd.f32 %v7524_v26, %v7278_v45  ;;  %v6457_v26 = vld [vmem:[%s9279_s3 + $0x214] sm:$0xf0]  ;;  %v5171_v30 = vld [vmem:[%s9279_s3 + $0xb8] sm:$0xf0] }
 0x1ba   : > { %v1225_v50 = vmax.f32 %v1163_v14, %v1165_v23  ;;  %v6396_v14 = vld [vmem:[%s9279_s3 + $0x34] sm:$0xf] }
 0x1bb   : > { %v1252_v48 = vmax.f32 %v1196_v29, %v1224_v33  ;;  %v5110_v51 = vor.u32 %v6396_v14, %v5107_v5 }
 0x1bc   : > { %v969_v25 = vpop.f32.mrf.mxu2  ;;  %v7828_v6 = vmax.f32 %v1197_v46, %v1225_v50  ;;  %2072 = vmatpush.bf16.msra.mxu0 %v5354_v27  ;;  %v1116_v27 = vmax.f32 %v7835_v43, 0.0  ;;  %v5174_v46 = vor.u32 %v6412_v17, %v5171_v30  ;;  %v5337_v50 = vld [vmem:[%s9279_s3 + $0x200] sm:$0xf]  ;;  %v6471_v43 = vld [vmem:[%s9279_s3 + $0x284] sm:$0xf0] }
 0x1bd   : > { %v970_v49 = vadd.f32 %v969_v25, %v7278_v45  ;;  %v1054_v28 = vpop.f32.mrf.mxu3  ;;  %v801_v32 = vpop.f32.mrf.mxu0  ;;  %v7831_v34 = vpack.c.bf16 %v1252_v48, %v1250_v53  ;;  %2121 = vmatpush.bf16.msra.mxu1 %v5418_v4  ;;  %v5345_v53 = vld [vmem:[%s9279_s3 + $0x210] sm:$0xf]  ;;  %v6455_v4 = vld [vmem:[%s9279_s3 + $0x204] sm:$0xf0]  ;;  %v764_v25 = vadd.f32 %v7489_v55, %v7270_v40  ;;  %2169 = vmatpush.bf16.msra.mxu2 %v5110_v51 }
 0x1be   : > { %v1055_v11 = vadd.f32 %v1054_v28, %v7282_v47  ;;  %v886_v62 = vpop.f32.mrf.mxu1  ;;  %v7843_v39 = vpack.c.bf16 %v7828_v6, %v1251_v35  ;;  %v5346_v29 = vor.u32 %v6457_v26, %v5345_v53  ;;  %v6473_v35 = vld [vmem:[%s9279_s3 + $0x294] sm:$0xf0]  ;;  %v5338_v28 = vor.u32 %v6455_v4, %v5337_v50  ;;  %2218 = vmatpush.bf16.msra.mxu3 %v5174_v46  ;;  %v5099_v53 = vld [vmem:[%s9279_s3 + $0x28] sm:$0xf0]  ;;  %v6410_v26 = vld [vmem:[%s9279_s3 + $0xa4] sm:$0xf] }
 0x1bf   : > { %v1168_v31 = vmax.f32 %v970_v49, 0.0  ;;  %2002 = vmatmul.bf16.gmra.mxu2 %v7831_v34  ;;  %v5410_v21 = vor.u32 %v6473_v35, %v5409_v36  ;;  %v802_v49 = vadd.f32 %v801_v32, %v7270_v40  ;;  %v849_v55 = vadd.f32 %v7492_v57, %v7272_v42  ;;  %v5163_v36 = vld [vmem:[%s9279_s3 + $0xa8] sm:$0xf0] }
 0x1c0   : > { %v1169_v23 = vmax.f32 %v1055_v11, 0.0  ;;  %2051 = vmatmul.bf16.gmra.mxu3 %v7843_v39  ;;  %2073 = vmatpush.bf16.msra.mxu0 %v5346_v29  ;;  %v887_v40 = vadd.f32 %v886_v62, %v7272_v42  ;;  %v5102_v62 = vor.u32 %v6394_v20, %v5099_v53  ;;  %v5166_v29 = vor.u32 %v6410_v26, %v5163_v36 }
 0x1c1   : > { %v1226_v33 = vmax.f32 %v1166_v37, %v1168_v31  ;;  %2122 = vmatpush.bf16.msra.mxu1 %v5410_v21  ;;  %v6392_v21 = vld [vmem:[%s9279_s3 + $0x14] sm:$0xf]  ;;  %v1114_v5 = vmax.f32 %v764_v25, 0.0  ;;  %v1170_v17 = vmax.f32 %v802_v49, 0.0  ;;  %v1115_v51 = vmax.f32 %v849_v55, 0.0 }
 0x1c2   : > { %v1227_v59 = vmax.f32 %v1167_v52, %v1169_v23  ;;  %v5401_v52 = vld [vmem:[%s9279_s3 + $0x280] sm:$0xf]  ;;  %2170 = vmatpush.bf16.msra.mxu2 %v5102_v62  ;;  %v1171_v30 = vmax.f32 %v887_v40, 0.0  ;;  %2219 = vmatpush.bf16.msra.mxu3 %v5166_v29 }
 0x1c3   : > { %v1254_v37 = vmax.f32 %v7506_v8, %v1226_v33  ;;  %v5402_v11 = vor.u32 %v6471_v43, %v5401_v52  ;;  %v5155_v33 = vld [vmem:[%s9279_s3 + $0x98] sm:$0xf0]  ;;  %v1200_v50 = vmax.f32 %v1114_v5, %v1116_v27  ;;  %v1201_v25 = vmax.f32 %v1115_v51, %v1117_v19  ;;  %v5083_v52 = vld [vmem:[%s9279_s3 + $0x8] sm:$0xf0]  ;;  %v6406_v43 = vld [vmem:[%s9279_s3 + $0x84] sm:$0xf] }
 0x1c4   : > { %v1255_v8 = vmax.f32 %v7510_v12, %v1227_v59  ;;  %v971_v32 = vpop.f32.mrf.mxu2  ;;  %2074 = vmatpush.bf16.msra.mxu0 %v5338_v28  ;;  %v6390_v28 = vld [vmem:[%s9279_s3 + $0x4] sm:$0xf]  ;;  %v5147_v27 = vld [vmem:[%s9279_s3 + $0x88] sm:$0xf0] }
 0x1c5   : > { %v972_v57 = vadd.f32 %v971_v32, %v7278_v45  ;;  %v1056_v12 = vpop.f32.mrf.mxu3  ;;  %v7906_v31 = vpack.c.bf16 %v1254_v37, %v1252_v48  ;;  %v804_v42 = vpop.f32.mrf.mxu0  ;;  %2123 = vmatpush.bf16.msra.mxu1 %v5402_v11  ;;  %v5091_v45 = vld [vmem:[%s9279_s3 + $0x18] sm:$0xf0]  ;;  %v6408_v48 = vld [vmem:[%s9279_s3 + $0x94] sm:$0xf]  ;;  %v5086_v40 = vor.u32 %v6390_v28, %v5083_v52  ;;  %v5150_v26 = vor.u32 %v6406_v43, %v5147_v27 }
 0x1c6   : > { %v1057_v35 = vadd.f32 %v1056_v12, %v7282_v47  ;;  %v7910_v14 = vpack.c.bf16 %v1255_v8, %v7828_v6  ;;  %v889_v23 = vpop.f32.mrf.mxu1  ;;  %v5094_v6 = vor.u32 %v6392_v21, %v5091_v45  ;;  %v5158_v46 = vor.u32 %v6408_v48, %v5155_v33 }
 0x1c7   : > { %v1172_v47 = vmax.f32 %v972_v57, 0.0  ;;  %1909 = vmatmul.bf16.gmra.mxu0 %v7906_v31 }
 0x1c8   : > { %v1173_v59 = vmax.f32 %v1057_v35, 0.0  ;;  %1958 = vmatmul.bf16.gmra.mxu1 %v7910_v14  ;;  %2171 = vmatpush.bf16.msra.mxu2 %v5094_v6 }
 0x1c9   : > { %v1228_v4 = vmax.f32 %v1170_v17, %v1172_v47  ;;  %2220 = vmatpush.bf16.msra.mxu3 %v5158_v46 }
 0x1ca   : > { %v1229_v49 = vmax.f32 %v1171_v30, %v1173_v59 }
 0x1cb   : > { %v1256_v20 = vmax.f32 %v1200_v50, %v1228_v4 }
 0x1cc   : > { %v1257_v19 = vmax.f32 %v1201_v25, %v1229_v49  ;;  %v974_v55 = vpop.f32.mrf.mxu2  ;;  %2172 = vmatpush.bf16.msra.mxu2 %v5086_v40 }
 0x1cd   : > { %v7938_v32 = vpack.c.bf16 %v1256_v20, %v1254_v37  ;;  %v805_v11 = vpop.f32.mrf.mxu0  ;;  %v1059_v53 = vpop.f32.mrf.mxu3  ;;  %2221 = vmatpush.bf16.msra.mxu3 %v5150_v26  ;;  %v7944_v42 = vpack.c.bf16 0.0, %v1256_v20  ;;  %v7953_v37 = vld [vmem:[%s9280_s4] sm:$0x3] }
 0x1ce   : > { %v7940_v36 = vpack.c.bf16 %v1257_v19, %v1255_v8  ;;  %v890_v57 = vpop.f32.mrf.mxu1  ;;  %v7946_v29 = vpack.c.bf16 0.0, %v1257_v19  ;;  %v6822_v8 = vmov 0.0|0.0   ;;  %v7958_v35 = vperm.slane %v7953_v37, 0 }
 0x1cf   : > { %2007 = vmatmul.bf16.gmra.mxu2 %v7938_v32 }
 0x1d0   : > { %2056 = vmatmul.bf16.gmra.mxu3 %v7940_v36 }
 0x1d4   : > { %v975_v12 = vpop.f32.mrf.mxu2 }
 0x1d5   : > { %v1060_v62 = vpop.f32.mrf.mxu3  ;;  %v6468_v12 = vld [vmem:[%s9279_s3 + $0x274] sm:$0xf] }
 0x1d6   : > { %v5395_v62 = vld [vmem:[%s9279_s3 + $0x278] sm:$0xf0] }
 0x1d7   : > { %1914 = vmatmul.bf16.gmra.mxu0 %v7944_v42 }
 0x1d8   : > { %1963 = vmatmul.bf16.gmra.mxu1 %v7946_v29 }
 0x1df   : > { %2012 = vmatmul.bf16.gmra.mxu2 %v6822_v8 }
 0x1e0   : > { %2061 = vmatmul.bf16.gmra.mxu3 %v6822_v8 }
 0x1e4   : > { %v1880_v23 = vpop.f32.mrf.mxu0 }
 0x1e5   : > { %v1881_v21 = vadd.f32 %v1880_v23, %v7958_v35  ;;  %v1929_v45 = vpop.f32.mrf.mxu1  ;;  %v5398_v23 = vor.u32 %v6468_v12, %v5395_v62 }
 0x1e7   : > { %v1930_v48 = vadd.f32 %v1929_v45, %v1881_v21  ;;  %2075 = vmatmul.bf16.vlgmr.msra.gmra.mxu0 %v7588_v61  ;;  %v6436_v45 = vld [vmem:[%s9279_s3 + $0x174] sm:$0xf]  ;;  %2361 = vmatpush.bf16.msrb.mxu2 %v5398_v23  ;;  %v6434_v23 = vld [vmem:[%s9279_s3 + $0x164] sm:$0xf] }
 0x1e8   : > { %2124 = vmatmul.bf16.vlgmr.msra.gmra.mxu1 %v7591_v38 }
 0x1ec   : > { %v1882_v5 = vpop.f32.mrf.mxu0 }
 0x1ed   : > { %v1883_v17 = vadd.f32 %v1882_v5, %v7958_v35  ;;  %v1931_v47 = vpop.f32.mrf.mxu1  ;;  %v6484_v5 = vld [vmem:[%s9279_s3 + $0x2f4] sm:$0xf] }
 0x1ef   : > { %v1932_v6 = vadd.f32 %v1931_v47, %v1883_v17  ;;  %2173 = vmatmul.bf16.vlgmr.msra.gmra.mxu2 %v7564_v7  ;;  %v5459_v47 = vld [vmem:[%s9279_s3 + $0x2f8] sm:$0xf0] }
 0x1f0   : > { %2222 = vmatmul.bf16.vlgmr.msra.gmra.mxu3 %v7567_v18 }
 0x1f2   : > { %v1978_v33 = vpop.f32.mrf.mxu2 }
 0x1f3   : > { %v1979_v51 = vadd.f32 %v1978_v33, %v1930_v48  ;;  %v2027_v30 = vpop.f32.mrf.mxu3  ;;  %v5267_v48 = vld [vmem:[%s9279_s3 + $0x178] sm:$0xf0] }
 0x1f4   : > { %v1885_v59 = vpop.f32.mrf.mxu0  ;;  %v5270_v17 = vor.u32 %v6436_v45, %v5267_v48  ;;  %v5331_v33 = vld [vmem:[%s9279_s3 + $0x1f8] sm:$0xf0]  ;;  %v6482_v45 = vld [vmem:[%s9279_s3 + $0x2e4] sm:$0xf] }
 0x1f5   : > { %v7966_v46 = vadd.f32 %v2027_v30, %v1979_v51  ;;  %v1886_v50 = vadd.f32 %v1885_v59, %v7958_v35  ;;  %v1934_v4 = vpop.f32.mrf.mxu1  ;;  %v5462_v51 = vor.u32 %v6484_v5, %v5459_v47  ;;  %v5451_v5 = vld [vmem:[%s9279_s3 + $0x2e8] sm:$0xf0] }
 0x1f6   : > { %2263 = vmatpush.bf16.msrb.mxu0 %v5270_v17  ;;  %v6450_v17 = vld [vmem:[%s9279_s3 + $0x1e4] sm:$0xf]  ;;  %v5323_v47 = vld [vmem:[%s9279_s3 + $0x1e8] sm:$0xf0] }
 0x1f7   : > { %v1935_v25 = vadd.f32 %v1934_v4, %v1886_v50  ;;  %2080 = vmatmul.bf16.gmra.mxu0 %v7619_v10  ;;  %2410 = vmatpush.bf16.msrb.mxu3 %v5462_v51 }
 0x1f8   : > { %2129 = vmatmul.bf16.gmra.mxu1 %v7622_v3 }
 0x1fa   : > { %v1980_v49 = vpop.f32.mrf.mxu2 }
 0x1fb   : > { %v1981_v28 = vadd.f32 %v1980_v49, %v1932_v6  ;;  %v2029_v52 = vpop.f32.mrf.mxu3  ;;  %v6452_v6 = vld [vmem:[%s9279_s3 + $0x1f4] sm:$0xf] }
 0x1fc   : > { %v1887_v7 = vpop.f32.mrf.mxu0  ;;  %v5334_v30 = vor.u32 %v6452_v6, %v5331_v33  ;;  %v5454_v6 = vor.u32 %v6482_v45, %v5451_v5  ;;  %v5326_v33 = vor.u32 %v6450_v17, %v5323_v47  ;;  %v6480_v45 = vld [vmem:[%s9279_s3 + $0x2d4] sm:$0xf]  ;;  %v5443_v5 = vld [vmem:[%s9279_s3 + $0x2d8] sm:$0xf0] }
 0x1fd   : > { %v7971_v43 = vadd.f32 %v2029_v52, %v1981_v28  ;;  %v1888_v18 = vadd.f32 %v1887_v7, %v7958_v35  ;;  %v1936_v20 = vpop.f32.mrf.mxu1  ;;  %v6448_v17 = vld [vmem:[%s9279_s3 + $0x1d4] sm:$0xf]  ;;  %v5315_v47 = vld [vmem:[%s9279_s3 + $0x1d8] sm:$0xf0] }
 0x1fe   : > { %2312 = vmatpush.bf16.msrb.mxu1 %v5334_v30  ;;  %2411 = vmatpush.bf16.msrb.mxu3 %v5454_v6  ;;  %v5446_v6 = vor.u32 %v6480_v45, %v5443_v5 }
 0x1ff   : > { %v1937_v27 = vadd.f32 %v1936_v20, %v1888_v18  ;;  %2178 = vmatmul.bf16.gmra.mxu2 %v7588_v61 }
 0x200   : > { %2227 = vmatmul.bf16.gmra.mxu3 %v7591_v38 }
 0x202   : > { %v1983_v19 = vpop.f32.mrf.mxu2  ;;  %2313 = vmatpush.bf16.msrb.mxu1 %v5326_v33  ;;  %v5318_v33 = vor.u32 %v6448_v17, %v5315_v47  ;;  %2412 = vmatpush.bf16.msrb.mxu3 %v5446_v6  ;;  %v6462_v17 = vld [vmem:[%s9279_s3 + $0x244] sm:$0xf]  ;;  %v6428_v6 = vld [vmem:[%s9279_s3 + $0x134] sm:$0xf] }
 0x203   : > { %v1984_v55 = vadd.f32 %v1983_v19, %v1935_v25  ;;  %v2032_v40 = vpop.f32.mrf.mxu3 }
 0x204   : > { %v1890_v11 = vpop.f32.mrf.mxu0 }
 0x205   : > { %v7976_v53 = vadd.f32 %v2032_v40, %v1984_v55  ;;  %v1891_v26 = vadd.f32 %v1890_v11, %v7958_v35  ;;  %v1939_v57 = vpop.f32.mrf.mxu1 }
 0x206   : > { %2314 = vmatpush.bf16.msrb.mxu1 %v5318_v33  ;;  %v5235_v33 = vld [vmem:[%s9279_s3 + $0x138] sm:$0xf0] }
 0x207   : > { %v1940_v21 = vadd.f32 %v1939_v57, %v1891_v26  ;;  %2085 = vmatmul.bf16.gmra.mxu0 %v7667_v1  ;;  %v6466_v26 = vld [vmem:[%s9279_s3 + $0x264] sm:$0xf]  ;;  %v5387_v57 = vld [vmem:[%s9279_s3 + $0x268] sm:$0xf0] }
 0x208   : > { %2134 = vmatmul.bf16.gmra.mxu1 %v7670_v54  ;;  %v5390_v12 = vor.u32 %v6466_v26, %v5387_v57  ;;  %v6464_v26 = vld [vmem:[%s9279_s3 + $0x254] sm:$0xf]  ;;  %v5379_v57 = vld [vmem:[%s9279_s3 + $0x258] sm:$0xf0] }
 0x20a   : > { %v1985_v59 = vpop.f32.mrf.mxu2  ;;  %2362 = vmatpush.bf16.msrb.mxu2 %v5390_v12  ;;  %v5382_v12 = vor.u32 %v6464_v26, %v5379_v57 }
 0x20b   : > { %v1986_v50 = vadd.f32 %v1985_v59, %v1937_v27  ;;  %v2034_v4 = vpop.f32.mrf.mxu3 }
 0x20c   : > { %v1892_v25 = vpop.f32.mrf.mxu0 }
 0x20d   : > { %v8005_v49 = vadd.f32 %v2034_v4, %v1986_v50  ;;  %v1893_v28 = vadd.f32 %v1892_v25, %v7958_v35  ;;  %v1941_v52 = vpop.f32.mrf.mxu1 }
 0x20e   : > { %2363 = vmatpush.bf16.msrb.mxu2 %v5382_v12  ;;  %v5307_v12 = vld [vmem:[%s9279_s3 + $0x1c8] sm:$0xf0] }
 0x20f   : > { %v1942_v7 = vadd.f32 %v1941_v52, %v1893_v28  ;;  %2183 = vmatmul.bf16.gmra.mxu2 %v7619_v10 }
 0x210   : > { %2232 = vmatmul.bf16.gmra.mxu3 %v7622_v3 }
 0x212   : > { %v1988_v18 = vpop.f32.mrf.mxu2 }
 0x213   : > { %v1989_v20 = vadd.f32 %v1988_v18, %v1940_v21  ;;  %v2037_v19 = vpop.f32.mrf.mxu3  ;;  %v5259_v21 = vld [vmem:[%s9279_s3 + $0x168] sm:$0xf0] }
 0x214   : > { %v1895_v55 = vpop.f32.mrf.mxu0  ;;  %v5262_v48 = vor.u32 %v6434_v23, %v5259_v21  ;;  %v5251_v21 = vld [vmem:[%s9279_s3 + $0x158] sm:$0xf0] }
 0x215   : > { %v8010_v40 = vadd.f32 %v2037_v19, %v1989_v20  ;;  %v1896_v27 = vadd.f32 %v1895_v55, %v7958_v35  ;;  %v1944_v11 = vpop.f32.mrf.mxu1 }
 0x216   : > { %2264 = vmatpush.bf16.msrb.mxu0 %v5262_v48 }
 0x217   : > { %v1945_v62 = vadd.f32 %v1944_v11, %v1896_v27  ;;  %2090 = vmatmul.bf16.gmra.mxu0 %v7723_v44 }
 0x218   : > { %2139 = vmatmul.bf16.gmra.mxu1 %v7726_v22 }
 0x21a   : > { %v1990_v51 = vpop.f32.mrf.mxu2 }
 0x21b   : > { %v1991_v30 = vadd.f32 %v1990_v51, %v1942_v7  ;;  %v2039_v59 = vpop.f32.mrf.mxu3 }
 0x21c   : > { %v1897_v50 = vpop.f32.mrf.mxu0 }
 0x21d   : > { %v8039_v4 = vadd.f32 %v2039_v59, %v1991_v30  ;;  %v1898_v25 = vadd.f32 %v1897_v50, %v7958_v35  ;;  %v1946_v28 = vpop.f32.mrf.mxu1 }
 0x21f   : > { %v1947_v52 = vadd.f32 %v1946_v28, %v1898_v25  ;;  %2188 = vmatmul.bf16.gmra.mxu2 %v7667_v1 }
 0x220   : > { %2237 = vmatmul.bf16.gmra.mxu3 %v7670_v54 }
 0x222   : > { %v1993_v18 = vpop.f32.mrf.mxu2 }
 0x223   : > { %v1994_v20 = vadd.f32 %v1993_v18, %v1945_v62  ;;  %v2042_v19 = vpop.f32.mrf.mxu3  ;;  %v6432_v62 = vld [vmem:[%s9279_s3 + $0x154] sm:$0xf] }
 0x224   : > { %v1900_v55 = vpop.f32.mrf.mxu0  ;;  %v5254_v48 = vor.u32 %v6432_v62, %v5251_v21 }
 0x225   : > { %v8044_v27 = vadd.f32 %v2042_v19, %v1994_v20  ;;  %v1901_v7 = vadd.f32 %v1900_v55, %v7958_v35  ;;  %v1949_v11 = vpop.f32.mrf.mxu1  ;;  %v6430_v55 = vld [vmem:[%s9279_s3 + $0x144] sm:$0xf] }
 0x226   : > { %2265 = vmatpush.bf16.msrb.mxu0 %v5254_v48 }
 0x227   : > { %v1950_v23 = vadd.f32 %v1949_v11, %v1901_v7  ;;  %2095 = vmatmul.bf16.gmra.mxu0 %v7795_v24  ;;  %v6446_v7 = vld [vmem:[%s9279_s3 + $0x1c4] sm:$0xf] }
 0x228   : > { %2144 = vmatmul.bf16.gmra.mxu1 %v7798_v58  ;;  %v5310_v21 = vor.u32 %v6446_v7, %v5307_v12  ;;  %v6426_v7 = vld [vmem:[%s9279_s3 + $0x124] sm:$0xf] }
 0x22a   : > { %v1995_v51 = vpop.f32.mrf.mxu2  ;;  %2315 = vmatpush.bf16.msrb.mxu1 %v5310_v21  ;;  %v5291_v21 = vld [vmem:[%s9279_s3 + $0x1a8] sm:$0xf0] }
 0x22b   : > { %v1996_v30 = vadd.f32 %v1995_v51, %v1947_v52  ;;  %v2044_v59 = vpop.f32.mrf.mxu3  ;;  %v5243_v52 = vld [vmem:[%s9279_s3 + $0x148] sm:$0xf0]  ;;  %v6444_v51 = vld [vmem:[%s9279_s3 + $0x1b4] sm:$0xf] }
 0x22c   : > { %v1902_v50 = vpop.f32.mrf.mxu0  ;;  %v5246_v57 = vor.u32 %v6430_v55, %v5243_v52 }
 0x22d   : > { %v8073_v25 = vadd.f32 %v2044_v59, %v1996_v30  ;;  %v1903_v28 = vadd.f32 %v1902_v50, %v7958_v35  ;;  %v1951_v18 = vpop.f32.mrf.mxu1  ;;  %v6478_v59 = vld [vmem:[%s9279_s3 + $0x2c4] sm:$0xf]  ;;  %v5435_v50 = vld [vmem:[%s9279_s3 + $0x2c8] sm:$0xf0] }
 0x22e   : > { %2266 = vmatpush.bf16.msrb.mxu0 %v5246_v57 }
 0x22f   : > { %v1952_v20 = vadd.f32 %v1951_v18, %v1903_v28  ;;  %2193 = vmatmul.bf16.gmra.mxu2 %v7723_v44  ;;  %v5238_v28 = vor.u32 %v6428_v6, %v5235_v33  ;;  %v5299_v18 = vld [vmem:[%s9279_s3 + $0x1b8] sm:$0xf0]  ;;  %v6424_v6 = vld [vmem:[%s9279_s3 + $0x114] sm:$0xf] }
 0x230   : > { %2242 = vmatmul.bf16.gmra.mxu3 %v7726_v22  ;;  %v5302_v55 = vor.u32 %v6444_v51, %v5299_v18  ;;  %v6440_v33 = vld [vmem:[%s9279_s3 + $0x194] sm:$0xf]  ;;  %v5363_v18 = vld [vmem:[%s9279_s3 + $0x238] sm:$0xf0] }
 0x232   : > { %v1998_v19 = vpop.f32.mrf.mxu2  ;;  %2267 = vmatpush.bf16.msrb.mxu0 %v5238_v28  ;;  %2316 = vmatpush.bf16.msrb.mxu1 %v5302_v55  ;;  %v6460_v28 = vld [vmem:[%s9279_s3 + $0x234] sm:$0xf] }
 0x233   : > { %v1999_v11 = vadd.f32 %v1998_v19, %v1950_v23  ;;  %v2047_v26 = vpop.f32.mrf.mxu3  ;;  %v5371_v23 = vld [vmem:[%s9279_s3 + $0x248] sm:$0xf0]  ;;  %v5438_v19 = vor.u32 %v6478_v59, %v5435_v50  ;;  %v5283_v50 = vld [vmem:[%s9279_s3 + $0x198] sm:$0xf0]  ;;  %v5366_v55 = vor.u32 %v6460_v28, %v5363_v18 }
 0x234   : > { %v1905_v62 = vpop.f32.mrf.mxu0  ;;  %v5374_v47 = vor.u32 %v6462_v17, %v5371_v23 }
 0x235   : > { %v8090_v45 = vadd.f32 %v2047_v26, %v1999_v11  ;;  %v1906_v48 = vadd.f32 %v1905_v62, %v7958_v35  ;;  %v1954_v5 = vpop.f32.mrf.mxu1  ;;  %2413 = vmatpush.bf16.msrb.mxu3 %v5438_v19  ;;  %v5227_v11 = vld [vmem:[%s9279_s3 + $0x128] sm:$0xf0]  ;;  %v6442_v26 = vld [vmem:[%s9279_s3 + $0x1a4] sm:$0xf]  ;;  %v5286_v19 = vor.u32 %v6440_v33, %v5283_v50 }
 0x236   : > { %2364 = vmatpush.bf16.msrb.mxu2 %v5374_v47  ;;  %v5230_v62 = vor.u32 %v6426_v7, %v5227_v11  ;;  %v5427_v7 = vld [vmem:[%s9279_s3 + $0x2b8] sm:$0xf0]  ;;  %v5419_v50 = vld [vmem:[%s9279_s3 + $0x2a8] sm:$0xf0] }
 0x237   : > { %v1955_v30 = vadd.f32 %v1954_v5, %v1906_v48  ;;  %2100 = vmatmul.bf16.gmra.mxu0 %v7906_v31  ;;  %v5294_v5 = vor.u32 %v6442_v26, %v5291_v21 }
 0x238   : > { %2149 = vmatmul.bf16.gmra.mxu1 %v7910_v14  ;;  %2268 = vmatpush.bf16.msrb.mxu0 %v5230_v62  ;;  %v6438_v62 = vld [vmem:[%s9279_s3 + $0x184] sm:$0xf] }
 0x239   : > { %2317 = vmatpush.bf16.msrb.mxu1 %v5294_v5 }
 0x23a   : > { %v2000_v52 = vpop.f32.mrf.mxu2  ;;  %2365 = vmatpush.bf16.msrb.mxu2 %v5366_v55 }
 0x23b   : > { %v2001_v57 = vadd.f32 %v2000_v52, %v1952_v20  ;;  %v2049_v12 = vpop.f32.mrf.mxu3  ;;  %v5219_v20 = vld [vmem:[%s9279_s3 + $0x118] sm:$0xf0]  ;;  %v6476_v52 = vld [vmem:[%s9279_s3 + $0x2b4] sm:$0xf] }
 0x23c   : > { %v1907_v48 = vpop.f32.mrf.mxu0  ;;  %v5222_v59 = vor.u32 %v6424_v6, %v5219_v20  ;;  %v5430_v11 = vor.u32 %v6476_v52, %v5427_v7  ;;  %v5355_v6 = vld [vmem:[%s9279_s3 + $0x228] sm:$0xf0]  ;;  %v6456_v52 = vld [vmem:[%s9279_s3 + $0x214] sm:$0xf]  ;;  %v5347_v7 = vld [vmem:[%s9279_s3 + $0x218] sm:$0xf0] }
 0x23d   : > { %v8131_v17 = vadd.f32 %v2049_v12, %v2001_v57  ;;  %v1908_v23 = vadd.f32 %v1907_v48, %v7958_v35  ;;  %v1956_v47 = vpop.f32.mrf.mxu1  ;;  %2318 = vmatpush.bf16.msrb.mxu1 %v5286_v19  ;;  %v6422_v57 = vld [vmem:[%s9279_s3 + $0x104] sm:$0xf]  ;;  %v5211_v12 = vld [vmem:[%s9279_s3 + $0x108] sm:$0xf0] }
 0x23e   : > { %2269 = vmatpush.bf16.msrb.mxu0 %v5222_v59  ;;  %2414 = vmatpush.bf16.msrb.mxu3 %v5430_v11  ;;  %v5214_v5 = vor.u32 %v6422_v57, %v5211_v12  ;;  %v6472_v11 = vld [vmem:[%s9279_s3 + $0x294] sm:$0xf]  ;;  %v5350_v57 = vor.u32 %v6456_v52, %v5347_v7  ;;  %v5411_v12 = vld [vmem:[%s9279_s3 + $0x298] sm:$0xf0] }
 0x23f   : > { %v1957_v51 = vadd.f32 %v1956_v47, %v1908_v23  ;;  %2198 = vmatmul.bf16.gmra.mxu2 %v7795_v24  ;;  %v5275_v23 = vld [vmem:[%s9279_s3 + $0x188] sm:$0xf0]  ;;  %v6458_v47 = vld [vmem:[%s9279_s3 + $0x224] sm:$0xf] }
 0x240   : > { %2247 = vmatmul.bf16.gmra.mxu3 %v7798_v58  ;;  %v5278_v33 = vor.u32 %v6438_v62, %v5275_v23  ;;  %v5358_v59 = vor.u32 %v6458_v47, %v5355_v6  ;;  %v5414_v62 = vor.u32 %v6472_v11, %v5411_v12  ;;  %v6470_v23 = vld [vmem:[%s9279_s3 + $0x284] sm:$0xf] }
 0x242   : > { %v2003_v26 = vpop.f32.mrf.mxu2  ;;  %2270 = vmatpush.bf16.msrb.mxu0 %v5214_v5  ;;  %2319 = vmatpush.bf16.msrb.mxu1 %v5278_v33  ;;  %v5339_v5 = vld [vmem:[%s9279_s3 + $0x208] sm:$0xf0] }
 0x243   : > { %v2004_v21 = vadd.f32 %v2003_v26, %v1955_v30  ;;  %v2052_v48 = vpop.f32.mrf.mxu3  ;;  %v6474_v30 = vld [vmem:[%s9279_s3 + $0x2a4] sm:$0xf]  ;;  %2366 = vmatpush.bf16.msrb.mxu2 %v5358_v59  ;;  %v5403_v33 = vld [vmem:[%s9279_s3 + $0x288] sm:$0xf0] }
 0x244   : > { %v1910_v20 = vpop.f32.mrf.mxu0  ;;  %v5422_v55 = vor.u32 %v6474_v30, %v5419_v50  ;;  %v5406_v30 = vor.u32 %v6470_v23, %v5403_v33 }
 0x245   : > { %v8184_v28 = vadd.f32 %v2052_v48, %v2004_v21  ;;  %v1911_v18 = vadd.f32 %v1910_v20, %v7958_v35  ;;  %v1959_v19 = vpop.f32.mrf.mxu1  ;;  %v6454_v48 = vld [vmem:[%s9279_s3 + $0x204] sm:$0xf] }
 0x246   : > { %2415 = vmatpush.bf16.msrb.mxu3 %v5422_v55  ;;  %v5342_v20 = vor.u32 %v6454_v48, %v5339_v5 }
 0x247   : > { %v1960_v26 = vadd.f32 %v1959_v19, %v1911_v18  ;;  %2105 = vmatmul.bf16.gmra.mxu0 %v7944_v42  ;;  %2367 = vmatpush.bf16.msrb.mxu2 %v5350_v57 }
 0x248   : > { %2154 = vmatmul.bf16.gmra.mxu1 %v7946_v29 }
 0x24a   : > { %v2005_v21 = vpop.f32.mrf.mxu2  ;;  %2416 = vmatpush.bf16.msrb.mxu3 %v5414_v62 }
 0x24b   : > { %v2006_v47 = vadd.f32 %v2005_v21, %v1957_v51  ;;  %v2054_v6 = vpop.f32.mrf.mxu3  ;;  %2368 = vmatpush.bf16.msrb.mxu2 %v5342_v20 }
 0x24c   : > { %v1912_v59 = vpop.f32.mrf.mxu0 }
 0x24d   : > { %v8213_v50 = vadd.f32 %v2054_v6, %v2006_v47  ;;  %v1913_v18 = vadd.f32 %v1912_v59, %v7958_v35  ;;  %v1961_v19 = vpop.f32.mrf.mxu1 }
 0x24e   : > { %2417 = vmatpush.bf16.msrb.mxu3 %v5406_v30 }
 0x24f   : > { %v1962_v55 = vadd.f32 %v1961_v19, %v1913_v18  ;;  %2203 = vmatmul.bf16.gmra.mxu2 %v7906_v31 }
 0x250   : > { %2252 = vmatmul.bf16.gmra.mxu3 %v7910_v14 }
 0x252   : > { %v2008_v51 = vpop.f32.mrf.mxu2 }
 0x253   : > { %v2009_v52 = vadd.f32 %v2008_v51, %v1960_v26  ;;  %v2057_v7 = vpop.f32.mrf.mxu3 }
 0x254   : > { %v1915_v11 = vpop.f32.mrf.mxu0 }
 0x255   : > { %v8218_v57 = vadd.f32 %v2057_v7, %v2009_v52  ;;  %v1916_v12 = vadd.f32 %v1915_v11, %v7958_v35  ;;  %v1964_v62 = vpop.f32.mrf.mxu1 }
 0x257   : > { %v1965_v21 = vadd.f32 %v1964_v62, %v1916_v12  ;;  %2110 = vmatmul.bf16.gmra.mxu0 %v6822_v8 }
 0x258   : > { %2159 = vmatmul.bf16.gmra.mxu1 %v6822_v8 }
 0x25a   : > { %v2010_v48 = vpop.f32.mrf.mxu2 }
 0x25b   : > { %v2011_v5 = vadd.f32 %v2010_v48, %v1962_v55  ;;  %v2059_v23 = vpop.f32.mrf.mxu3 }
 0x25c   : > { %v1917_v47 = vpop.f32.mrf.mxu0 }
 0x25d   : > { %v8223_v6 = vadd.f32 %v2059_v23, %v2011_v5  ;;  %v1918_v26 = vadd.f32 %v1917_v47, %v7958_v35  ;;  %v1966_v20 = vpop.f32.mrf.mxu1 }
 0x25f   : > { %v1967_v33 = vadd.f32 %v1966_v20, %v1918_v26  ;;  %2208 = vmatmul.bf16.gmra.mxu2 %v7944_v42 }
 0x260   : > { %2257 = vmatmul.bf16.gmra.mxu3 %v7946_v29 }
 0x262   : > { %v2013_v59 = vpop.f32.mrf.mxu2 }
 0x263   : > { %v2014_v30 = vadd.f32 %v2013_v59, %v1965_v21  ;;  %v2062_v18 = vpop.f32.mrf.mxu3 }
 0x264   : > { %v2076_v19 = vpop.f32.mrf.mxu0 }
 0x265   : > { %v8228_v51 = vadd.f32 %v2062_v18, %v2014_v30  ;;  %v2077_v55 = vadd.f32 %v2076_v19, %v7966_v46  ;;  %v2125_v52 = vpop.f32.mrf.mxu1 }
 0x267   : > { %v2126_v7 = vadd.f32 %v2125_v52, %v2077_v55  ;;  %2271 = vmatmul.bf16.vlgmr.msrb.gmra.mxu0 %v7577_v0 }
 0x268   : > { %2320 = vmatmul.bf16.vlgmr.msrb.gmra.mxu1 %v7580_v9  ;;  %v8246_v9 = vperm.slane %v7953_v37, 1 }
 0x269   : > { %v8233_v35 = vmax.f32 %v2126_v7, 0.0 }
 0x26a   : > { %v2015_v11 = vpop.f32.mrf.mxu2 }
 0x26b   : > { %2491 = vst [vmem:[%s8237_s10] sm:$0xff] %v8233_v35  ;;  %v2016_v12 = vadd.f32 %v2015_v11, %v1967_v33  ;;  %v2064_v62 = vpop.f32.mrf.mxu3 }
 0x26c   : > { %v2078_v21 = vpop.f32.mrf.mxu0 }
 0x26d   : > { %v8241_v46 = vadd.f32 %v2064_v62, %v2016_v12  ;;  %v2079_v48 = vadd.f32 %v2078_v21, %v7971_v43  ;;  %v2127_v0 = vpop.f32.mrf.mxu1 }
 0x26f   : > { %v2128_v5 = vadd.f32 %v2127_v0, %v2079_v48  ;;  %2369 = vmatmul.bf16.vlgmr.msrb.gmra.mxu2 %v7588_v61 }
 0x270   : > { %2418 = vmatmul.bf16.vlgmr.msrb.gmra.mxu3 %v7591_v38 }
 0x271   : > { %v8249_v23 = vmax.f32 %v2128_v5, 0.0 }
 0x272   : > { %v2174_v47 = vpop.f32.mrf.mxu2 }
 0x273   : > { %2493 = vst [vmem:[%s8237_s10 + $0x10] sm:$0xff] %v8249_v23  ;;  %v2175_v26 = vadd.f32 %v2174_v47, %v8246_v9  ;;  %v2223_v20 = vpop.f32.mrf.mxu3 }
 0x274   : > { %v2081_v33 = vpop.f32.mrf.mxu0 }
 0x275   : > { %v8254_v43 = vadd.f32 %v2223_v20, %v2175_v26  ;;  %v2082_v59 = vadd.f32 %v2081_v33, %v7976_v53  ;;  %v2130_v61 = vpop.f32.mrf.mxu1 }
 0x277   : > { %v2131_v30 = vadd.f32 %v2130_v61, %v2082_v59  ;;  %2276 = vmatmul.bf16.gmra.mxu0 %v7601_v15  ;;  %v6492_v61 = vld [vmem:[%s9281_s5 + $0x30] sm:$0xff] }
 0x278   : > { %2325 = vmatmul.bf16.gmra.mxu1 %v7604_v2 }
 0x279   : > { %v8259_v38 = vmax.f32 %v2131_v30, 0.0 }
 0x27a   : > { %v2176_v37 = vpop.f32.mrf.mxu2 }
 0x27b   : > { %2495 = vst [vmem:[%s8237_s10 + $0x20] sm:$0xff] %v8259_v38  ;;  %v2177_v18 = vadd.f32 %v2176_v37, %v8246_v9  ;;  %v2225_v19 = vpop.f32.mrf.mxu3 }
 0x27c   : > { %v2083_v55 = vpop.f32.mrf.mxu0 }
 0x27d   : > { %v8264_v52 = vadd.f32 %v2225_v19, %v2177_v18  ;;  %v2084_v53 = vadd.f32 %v2083_v55, %v8005_v49  ;;  %v2132_v7 = vpop.f32.mrf.mxu1 }
 0x27f   : > { %v2133_v11 = vadd.f32 %v2132_v7, %v2084_v53  ;;  %2374 = vmatmul.bf16.gmra.mxu2 %v7619_v10 }
 0x280   : > { %2423 = vmatmul.bf16.gmra.mxu3 %v7622_v3 }
 0x281   : > { %v8269_v15 = vmax.f32 %v2133_v11, 0.0 }
 0x282   : > { %v2179_v2 = vpop.f32.mrf.mxu2 }
 0x283   : > { %2497 = vst [vmem:[%s8237_s10 + $0x30] sm:$0xff] %v8269_v15  ;;  %v2180_v12 = vadd.f32 %v2179_v2, %v8246_v9  ;;  %v2228_v62 = vpop.f32.mrf.mxu3  ;;  %v6490_v2 = vld [vmem:[%s9281_s5 + $0x20] sm:$0xff] }
 0x284   : > { %v2086_v21 = vpop.f32.mrf.mxu0 }
 0x285   : > { %v8274_v48 = vadd.f32 %v2228_v62, %v2180_v12  ;;  %v2087_v49 = vadd.f32 %v2086_v21, %v8010_v40  ;;  %v2135_v0 = vpop.f32.mrf.mxu1  ;;  %v6493_v40 = vld [vmem:[%s9281_s5 + $0x38] sm:$0xff]  ;;  %v6508_v12 = vld [vmem:[%s9281_s5 + $0xb0] sm:$0xff] }
 0x286   : > { %4347 = vmatpush.bf16.msra.mxu0 %v6493_v40  ;;  %v6501_v40 = vld [vmem:[%s9281_s5 + $0x78] sm:$0xff] }
 0x287   : > { %v2136_v5 = vadd.f32 %v2135_v0, %v2087_v49  ;;  %2281 = vmatmul.bf16.gmra.mxu0 %v7649_v60  ;;  %v6489_v0 = vld [vmem:[%s9281_s5 + $0x18] sm:$0xff]  ;;  %4360 = vmatpush.bf16.msra.mxu1 %v6501_v40 }
 0x288   : > { %2330 = vmatmul.bf16.gmra.mxu1 %v7652_v16  ;;  %v6497_v40 = vld [vmem:[%s9281_s5 + $0x58] sm:$0xff] }
 0x289   : > { %v8279_v10 = vmax.f32 %v2136_v5, 0.0  ;;  %v6507_v5 = vld [vmem:[%s9281_s5 + $0xa8] sm:$0xff] }
 0x28a   : > { %v2181_v3 = vpop.f32.mrf.mxu2  ;;  %4348 = vmatpush.bf16.msra.mxu0 %v6492_v61 }
 0x28b   : > { %2499 = vst [vmem:[%s8237_s10 + $0x40] sm:$0xff] %v8279_v10  ;;  %v2182_v47 = vadd.f32 %v2181_v3, %v8246_v9  ;;  %v2230_v26 = vpop.f32.mrf.mxu3 }
 0x28c   : > { %v2088_v20 = vpop.f32.mrf.mxu0 }
 0x28d   : > { %v8287_v33 = vadd.f32 %v2230_v26, %v2182_v47  ;;  %v2089_v60 = vadd.f32 %v2088_v20, %v8039_v4  ;;  %v2137_v59 = vpop.f32.mrf.mxu1 }
 0x28f   : > { %v2138_v16 = vadd.f32 %v2137_v59, %v2089_v60  ;;  %2379 = vmatmul.bf16.gmra.mxu2 %v7667_v1  ;;  %v6491_v1 = vld [vmem:[%s9281_s5 + $0x28] sm:$0xff]  ;;  %v6488_v60 = vld [vmem:[%s9281_s5 + $0x10] sm:$0xff] }
 0x290   : > { %2428 = vmatmul.bf16.gmra.mxu3 %v7670_v54  ;;  %v6509_v54 = vld [vmem:[%s9281_s5 + $0xb8] sm:$0xff]  ;;  %4349 = vmatpush.bf16.msra.mxu0 %v6491_v1 }
 0x291   : > { %v8295_v30 = vmax.f32 %v2138_v16, 0.0  ;;  %4373 = vmatpush.bf16.msra.mxu2 %v6509_v54 }
 0x292   : > { %v2184_v37 = vpop.f32.mrf.mxu2 }
 0x293   : > { %2501 = vst [vmem:[%s8237_s10 + $0x50] sm:$0xff] %v8295_v30  ;;  %v2185_v18 = vadd.f32 %v2184_v37, %v8246_v9  ;;  %v2233_v4 = vpop.f32.mrf.mxu3  ;;  %v6487_v37 = vld [vmem:[%s9281_s5 + $0x8] sm:$0xff] }
 0x294   : > { %v2091_v19 = vpop.f32.mrf.mxu0  ;;  %4350 = vmatpush.bf16.msra.mxu0 %v6490_v2 }
 0x295   : > { %v8306_v55 = vadd.f32 %v2233_v4, %v2185_v18  ;;  %v2092_v53 = vadd.f32 %v2091_v19, %v8044_v27  ;;  %v2140_v7 = vpop.f32.mrf.mxu1  ;;  %4374 = vmatpush.bf16.msra.mxu2 %v6508_v12  ;;  %v6500_v18 = vld [vmem:[%s9281_s5 + $0x70] sm:$0xff]  ;;  %v6505_v4 = vld [vmem:[%s9281_s5 + $0x98] sm:$0xff] }
 0x296   : > { %4361 = vmatpush.bf16.msra.mxu1 %v6500_v18  ;;  %v6514_v18 = vld [vmem:[%s9281_s5 + $0xe0] sm:$0xff] }
 0x297   : > { %v2141_v11 = vadd.f32 %v2140_v7, %v2092_v53  ;;  %2286 = vmatmul.bf16.gmra.mxu0 %v7697_v41  ;;  %v6486_v7 = vld [vmem:[%s9281_s5] sm:$0xff] }
 0x298   : > { %2335 = vmatmul.bf16.gmra.mxu1 %v7700_v13  ;;  %v6517_v13 = vld [vmem:[%s9281_s5 + $0xf8] sm:$0xff]  ;;  %4351 = vmatpush.bf16.msra.mxu0 %v6489_v0 }
 0x299   : > { %v8317_v62 = vmax.f32 %v2141_v11, 0.0  ;;  %4386 = vmatpush.bf16.msra.mxu3 %v6517_v13  ;;  %4375 = vmatpush.bf16.msra.mxu2 %v6507_v5  ;;  %v6499_v11 = vld [vmem:[%s9281_s5 + $0x68] sm:$0xff]  ;;  %v6498_v13 = vld [vmem:[%s9281_s5 + $0x60] sm:$0xff] }
 0x29a   : > { %v2186_v21 = vpop.f32.mrf.mxu2  ;;  %4362 = vmatpush.bf16.msra.mxu1 %v6499_v11 }
 0x29b   : > { %2503 = vst [vmem:[%s8237_s10 + $0x60] sm:$0xff] %v8317_v62  ;;  %v2187_v27 = vadd.f32 %v2186_v21, %v8246_v9  ;;  %v2235_v41 = vpop.f32.mrf.mxu3 }
 0x29c   : > { %v2093_v49 = vpop.f32.mrf.mxu0  ;;  %4352 = vmatpush.bf16.msra.mxu0 %v6488_v60  ;;  %v6515_v60 = vld [vmem:[%s9281_s5 + $0xe8] sm:$0xff] }
 0x29d   : > { %v8331_v3 = vadd.f32 %v2235_v41, %v2187_v27  ;;  %v2094_v47 = vadd.f32 %v2093_v49, %v8073_v25  ;;  %v2142_v26 = vpop.f32.mrf.mxu1  ;;  %v6506_v25 = vld [vmem:[%s9281_s5 + $0xa0] sm:$0xff]  ;;  %v6516_v27 = vld [vmem:[%s9281_s5 + $0xf0] sm:$0xff]  ;;  %v6503_v49 = vld [vmem:[%s9281_s5 + $0x88] sm:$0xff] }
 0x29e   : > { %4376 = vmatpush.bf16.msra.mxu2 %v6506_v25  ;;  %4387 = vmatpush.bf16.msra.mxu3 %v6516_v27  ;;  %v6494_v27 = vld [vmem:[%s9281_s5 + $0x40] sm:$0xff] }
 0x29f   : > { %v2143_v20 = vadd.f32 %v2142_v26, %v2094_v47  ;;  %2384 = vmatmul.bf16.gmra.mxu2 %v7723_v44  ;;  %v6524_v26 = vld [vmem:[%s9281_s5 + $0x130] sm:$0xff]  ;;  %4363 = vmatpush.bf16.msra.mxu1 %v6498_v13 }
 0x2a0   : > { %2433 = vmatmul.bf16.gmra.mxu3 %v7726_v22  ;;  %4353 = vmatpush.bf16.msra.mxu0 %v6487_v37  ;;  %v6496_v37 = vld [vmem:[%s9281_s5 + $0x50] sm:$0xff] }
 0x2a1   : > { %v8345_v59 = vmax.f32 %v2143_v20, 0.0 }
 0x2a2   : > { %v2189_v16 = vpop.f32.mrf.mxu2  ;;  %4377 = vmatpush.bf16.msra.mxu2 %v6505_v4  ;;  %4388 = vmatpush.bf16.msra.mxu3 %v6515_v60  ;;  %v6532_v60 = vld [vmem:[%s9281_s5 + $0x170] sm:$0xff] }
 0x2a3   : > { %2505 = vst [vmem:[%s8237_s10 + $0x70] sm:$0xff] %v8345_v59  ;;  %v2190_v44 = vadd.f32 %v2189_v16, %v8246_v9  ;;  %v2238_v22 = vpop.f32.mrf.mxu3  ;;  %4364 = vmatpush.bf16.msra.mxu1 %v6497_v40 }
 0x2a4   : > { %v2096_v61 = vpop.f32.mrf.mxu0  ;;  %4354 = vmatpush.bf16.msra.mxu0 %v6486_v7  ;;  %v6540_v7 = vld [vmem:[%s9281_s5 + $0x1b0] sm:$0xff] }
 0x2a5   : > { %v8359_v19 = vadd.f32 %v2238_v22, %v2190_v44  ;;  %v2097_v1 = vadd.f32 %v2096_v61, %v8090_v45  ;;  %v2145_v54 = vpop.f32.mrf.mxu1  ;;  %v6504_v45 = vld [vmem:[%s9281_s5 + $0x90] sm:$0xff] }
 0x2a6   : > { %4378 = vmatpush.bf16.msra.mxu2 %v6504_v45  ;;  %4389 = vmatpush.bf16.msra.mxu3 %v6514_v18  ;;  %v6513_v45 = vld [vmem:[%s9281_s5 + $0xd8] sm:$0xff]  ;;  %v6518_v18 = vld [vmem:[%s9281_s5 + $0x100] sm:$0xff] }
 0x2a7   : > { %v2146_v53 = vadd.f32 %v2145_v54, %v2097_v1  ;;  %2291 = vmatmul.bf16.gmra.mxu0 %v7751_v63  ;;  %v6525_v63 = vld [vmem:[%s9281_s5 + $0x138] sm:$0xff]  ;;  %4365 = vmatpush.bf16.msra.mxu1 %v6496_v37 }
 0x2a8   : > { %2340 = vmatmul.bf16.gmra.mxu1 %v7754_v56  ;;  %4399 = vmatpush.bf16.msrb.mxu0 %v6525_v63 }
 0x2a9   : > { %v8373_v2 = vmax.f32 %v2146_v53, 0.0  ;;  %v6522_v53 = vld [vmem:[%s9281_s5 + $0x120] sm:$0xff] }
 0x2aa   : > { %v2191_v12 = vpop.f32.mrf.mxu2  ;;  %4379 = vmatpush.bf16.msra.mxu2 %v6503_v49  ;;  %4390 = vmatpush.bf16.msra.mxu3 %v6513_v45  ;;  %v6548_v45 = vld [vmem:[%s9281_s5 + $0x1f0] sm:$0xff] }
 0x2ab   : > { %2507 = vst [vmem:[%s8237_s10 + $0x80] sm:$0xff] %v8373_v2  ;;  %v2192_v56 = vadd.f32 %v2191_v12, %v8246_v9  ;;  %v2240_v21 = vpop.f32.mrf.mxu3  ;;  %v6521_v12 = vld [vmem:[%s9281_s5 + $0x118] sm:$0xff] }
 0x2ac   : > { %v2098_v41 = vpop.f32.mrf.mxu0  ;;  %4400 = vmatpush.bf16.msrb.mxu0 %v6524_v26  ;;  %v6538_v26 = vld [vmem:[%s9281_s5 + $0x1a0] sm:$0xff] }
 0x2ad   : > { %v8390_v0 = vadd.f32 %v2240_v21, %v2192_v56  ;;  %v2099_v5 = vadd.f32 %v2098_v41, %v8131_v17  ;;  %v2147_v47 = vpop.f32.mrf.mxu1  ;;  %v6502_v17 = vld [vmem:[%s9281_s5 + $0x80] sm:$0xff]  ;;  %v6512_v41 = vld [vmem:[%s9281_s5 + $0xd0] sm:$0xff] }
 0x2ae   : > { %4380 = vmatpush.bf16.msra.mxu2 %v6502_v17  ;;  %4391 = vmatpush.bf16.msra.mxu3 %v6512_v41  ;;  %v6519_v17 = vld [vmem:[%s9281_s5 + $0x108] sm:$0xff] }
 0x2af   : > { %v2148_v20 = vadd.f32 %v2147_v47, %v2099_v5  ;;  %2389 = vmatmul.bf16.gmra.mxu2 %v7795_v24  ;;  %v6523_v24 = vld [vmem:[%s9281_s5 + $0x128] sm:$0xff]  ;;  %v6520_v5 = vld [vmem:[%s9281_s5 + $0x110] sm:$0xff]  ;;  %v6533_v47 = vld [vmem:[%s9281_s5 + $0x178] sm:$0xff] }
 0x2b0   : > { %2438 = vmatmul.bf16.gmra.mxu3 %v7798_v58  ;;  %v6541_v58 = vld [vmem:[%s9281_s5 + $0x1b8] sm:$0xff]  ;;  %4401 = vmatpush.bf16.msrb.mxu0 %v6523_v24  ;;  %v6547_v41 = vld [vmem:[%s9281_s5 + $0x1e8] sm:$0xff] }
 0x2b1   : > { %v8407_v25 = vmax.f32 %v2148_v20, 0.0 }
 0x2b2   : > { %v2194_v16 = vpop.f32.mrf.mxu2  ;;  %4425 = vmatpush.bf16.msrb.mxu2 %v6541_v58 }
 0x2b3   : > { %2509 = vst [vmem:[%s8237_s10 + $0x90] sm:$0xff] %v8407_v25  ;;  %v2195_v44 = vadd.f32 %v2194_v16, %v8246_v9  ;;  %v2243_v22 = vpop.f32.mrf.mxu3 }
 0x2b4   : > { %v2101_v61 = vpop.f32.mrf.mxu0  ;;  %4402 = vmatpush.bf16.msrb.mxu0 %v6522_v53 }
 0x2b5   : > { %v8424_v4 = vadd.f32 %v2243_v22, %v2195_v44  ;;  %v2102_v1 = vadd.f32 %v2101_v61, %v8184_v28  ;;  %v2150_v54 = vpop.f32.mrf.mxu1  ;;  %v6495_v28 = vld [vmem:[%s9281_s5 + $0x48] sm:$0xff]  ;;  %v6510_v44 = vld [vmem:[%s9281_s5 + $0xc0] sm:$0xff] }
 0x2b6   : > { %4426 = vmatpush.bf16.msrb.mxu2 %v6540_v7  ;;  %4366 = vmatpush.bf16.msra.mxu1 %v6495_v28  ;;  %v6535_v28 = vld [vmem:[%s9281_s5 + $0x188] sm:$0xff] }
 0x2b7   : > { %v2151_v11 = vadd.f32 %v2150_v54, %v2102_v1  ;;  %2296 = vmatmul.bf16.gmra.mxu0 %v7831_v34  ;;  %v6539_v34 = vld [vmem:[%s9281_s5 + $0x1a8] sm:$0xff]  ;;  %v6536_v54 = vld [vmem:[%s9281_s5 + $0x190] sm:$0xff] }
 0x2b8   : > { %2345 = vmatmul.bf16.gmra.mxu1 %v7843_v39  ;;  %4403 = vmatpush.bf16.msrb.mxu0 %v6521_v12  ;;  %v6531_v1 = vld [vmem:[%s9281_s5 + $0x168] sm:$0xff] }
 0x2b9   : > { %v2479_v63 = vmax.f32 %v2151_v11, 0.0  ;;  %v6530_v11 = vld [vmem:[%s9281_s5 + $0x160] sm:$0xff] }
 0x2ba   : > { %v8447_v39 = vpop.f32.mrf.mxu2  ;;  %4427 = vmatpush.bf16.msrb.mxu2 %v6539_v34  ;;  %4367 = vmatpush.bf16.msra.mxu1 %v6494_v27  ;;  %v6534_v27 = vld [vmem:[%s9281_s5 + $0x180] sm:$0xff] }
 0x2bb   : > { %2511 = vst [vmem:[%s8237_s10 + $0xa0] sm:$0xff] %v2479_v63  ;;  %v8450_v56 = vpop.f32.mrf.mxu3 }
 0x2bc   : > { %v2103_v21 = vpop.f32.mrf.mxu0  ;;  %4404 = vmatpush.bf16.msrb.mxu0 %v6520_v5  ;;  %v6546_v5 = vld [vmem:[%s9281_s5 + $0x1e0] sm:$0xff] }
 0x2bd   : > { %v2104_v13 = vadd.f32 %v2103_v21, %v8213_v50  ;;  %v2152_v49 = vpop.f32.mrf.mxu1  ;;  %v6511_v50 = vld [vmem:[%s9281_s5 + $0xc8] sm:$0xff]  ;;  %v6529_v21 = vld [vmem:[%s9281_s5 + $0x158] sm:$0xff] }
 0x2be   : > { %4412 = vmatpush.bf16.msrb.mxu1 %v6533_v47  ;;  %4428 = vmatpush.bf16.msrb.mxu2 %v6538_v26 }
 0x2bf   : > { %v2153_v20 = vadd.f32 %v2152_v49, %v2104_v13  ;;  %2394 = vmatmul.bf16.gmra.mxu2 %v7906_v31  ;;  %v6537_v31 = vld [vmem:[%s9281_s5 + $0x198] sm:$0xff]  ;;  %4392 = vmatpush.bf16.msra.mxu3 %v6511_v50  ;;  %v6528_v49 = vld [vmem:[%s9281_s5 + $0x150] sm:$0xff] }
 0x2c0   : > { %2443 = vmatmul.bf16.gmra.mxu3 %v7910_v14  ;;  %4405 = vmatpush.bf16.msrb.mxu0 %v6519_v17  ;;  %v6527_v17 = vld [vmem:[%s9281_s5 + $0x148] sm:$0xff] }
 0x2c1   : > { %v2481_v40 = vmax.f32 %v2153_v20, 0.0 }
 0x2c2   : > { %v2199_v14 = vpop.f32.mrf.mxu2  ;;  %4413 = vmatpush.bf16.msrb.mxu1 %v6532_v60  ;;  %4429 = vmatpush.bf16.msrb.mxu2 %v6537_v31  ;;  %v6545_v60 = vld [vmem:[%s9281_s5 + $0x1d8] sm:$0xff] }
 0x2c3   : > { %2513 = vst [vmem:[%s8237_s10 + $0xb0] sm:$0xff] %v2481_v40  ;;  %v2200_v24 = vadd.f32 %v2199_v14, %v8246_v9  ;;  %v2248_v58 = vpop.f32.mrf.mxu3  ;;  %4393 = vmatpush.bf16.msra.mxu3 %v6510_v44 }
 0x2c4   : > { %v2106_v16 = vpop.f32.mrf.mxu0  ;;  %4406 = vmatpush.bf16.msrb.mxu0 %v6518_v18  ;;  %v6543_v18 = vld [vmem:[%s9281_s5 + $0x1c8] sm:$0xff] }
 0x2c5   : > { %v8487_v22 = vadd.f32 %v2248_v58, %v2200_v24  ;;  %v2107_v61 = vadd.f32 %v2106_v16, %v8218_v57  ;;  %v2155_v37 = vpop.f32.mrf.mxu1  ;;  %v6549_v57 = vld [vmem:[%s9281_s5 + $0x1f8] sm:$0xff]  ;;  %v6544_v24 = vld [vmem:[%s9281_s5 + $0x1d0] sm:$0xff] }
 0x2c6   : > { %4414 = vmatpush.bf16.msrb.mxu1 %v6531_v1  ;;  %4430 = vmatpush.bf16.msrb.mxu2 %v6536_v54 }
 0x2c7   : > { %v2156_v53 = vadd.f32 %v2155_v37, %v2107_v61  ;;  %2301 = vmatmul.bf16.gmra.mxu0 %v7938_v32  ;;  %4438 = vmatpush.bf16.msrb.mxu3 %v6549_v57 }
 0x2c8   : > { %2350 = vmatmul.bf16.gmra.mxu1 %v7940_v36 }
 0x2c9   : > { %v2483_v7 = vmax.f32 %v2156_v53, 0.0  ;;  %v6542_v53 = vld [vmem:[%s9281_s5 + $0x1c0] sm:$0xff] }
 0x2ca   : > { %v8513_v32 = vpop.f32.mrf.mxu2  ;;  %4415 = vmatpush.bf16.msrb.mxu1 %v6530_v11  ;;  %4431 = vmatpush.bf16.msrb.mxu2 %v6535_v28  ;;  %v6557_v28 = vld [vmem:[%s9281_s5 + $0x238] sm:$0xff] }
 0x2cb   : > { %2515 = vst [vmem:[%s8237_s10 + $0xc0] sm:$0xff] %v2483_v7  ;;  %v8516_v36 = vpop.f32.mrf.mxu3  ;;  %4439 = vmatpush.bf16.msrb.mxu3 %v6548_v45  ;;  %v2523_v45 = vpack.c.bf16 %v8233_v35, %v8233_v35  ;;  %v6555_v35 = vld [vmem:[%s9281_s5 + $0x228] sm:$0xff] }
 0x2cc   : > { %v2108_v63 = vpop.f32.mrf.mxu0 }
 0x2cd   : > { %v2109_v12 = vadd.f32 %v2108_v63, %v8223_v6  ;;  %v2157_v34 = vpop.f32.mrf.mxu1 }
 0x2ce   : > { %4416 = vmatpush.bf16.msrb.mxu1 %v6529_v21  ;;  %4432 = vmatpush.bf16.msrb.mxu2 %v6534_v27 }
 0x2cf   : > { %v2158_v13 = vadd.f32 %v2157_v34, %v2109_v12  ;;  %2399 = vmatmul.bf16.gmra.mxu2 %v7944_v42  ;;  %4440 = vmatpush.bf16.msrb.mxu3 %v6547_v41  ;;  %v6556_v12 = vld [vmem:[%s9281_s5 + $0x230] sm:$0xff]  ;;  %v6573_v41 = vld [vmem:[%s9281_s5 + $0x2b8] sm:$0xff] }
 0x2d0   : > { %2448 = vmatmul.bf16.gmra.mxu3 %v7946_v29 }
 0x2d1   : > { %v2485_v6 = vmax.f32 %v2158_v13, 0.0  ;;  %v2525_v13 = vpack.c.bf16 %v8249_v23, %v8249_v23 }
 0x2d2   : > { %v2204_v47 = vpop.f32.mrf.mxu2  ;;  %4417 = vmatpush.bf16.msrb.mxu1 %v6528_v49 }
 0x2d3   : > { %2517 = vst [vmem:[%s8237_s10 + $0xd0] sm:$0xff] %v2485_v6  ;;  %v2205_v26 = vadd.f32 %v2204_v47, %v8246_v9  ;;  %v2253_v20 = vpop.f32.mrf.mxu3  ;;  %4441 = vmatpush.bf16.msrb.mxu3 %v6546_v5  ;;  %v6554_v5 = vld [vmem:[%s9281_s5 + $0x220] sm:$0xff]  ;;  %v6572_v47 = vld [vmem:[%s9281_s5 + $0x2b0] sm:$0xff] }
 0x2d4   : > { %v2111_v42 = vpop.f32.mrf.mxu0 }
 0x2d5   : > { %v8538_v29 = vadd.f32 %v2253_v20, %v2205_v26  ;;  %v2112_v50 = vadd.f32 %v2111_v42, %v8228_v51  ;;  %v2160_v40 = vpop.f32.mrf.mxu1  ;;  %v6526_v51 = vld [vmem:[%s9281_s5 + $0x140] sm:$0xff] }
 0x2d6   : > { %4418 = vmatpush.bf16.msrb.mxu1 %v6527_v17  ;;  %v2527_v17 = vpack.c.bf16 %v8259_v38, %v8259_v38  ;;  %v6570_v38 = vld [vmem:[%s9281_s5 + $0x2a0] sm:$0xff] }
 0x2d7   : > { %v2161_v31 = vadd.f32 %v2160_v40, %v2112_v50  ;;  %2306 = vmatmul.bf16.gmra.mxu0 %v6822_v8  ;;  %4442 = vmatpush.bf16.msrb.mxu3 %v6545_v60  ;;  %v6571_v40 = vld [vmem:[%s9281_s5 + $0x2a8] sm:$0xff] }
 0x2d8   : > { %2355 = vmatmul.bf16.gmra.mxu1 %v6822_v8 }
 0x2d9   : > { %v2487_v14 = vmax.f32 %v2161_v31, 0.0 }
 0x2da   : > { %v8555_v58 = vpop.f32.mrf.mxu2  ;;  %4419 = vmatpush.bf16.msrb.mxu1 %v6526_v51 }
 0x2db   : > { %2519 = vst [vmem:[%s8237_s10 + $0xe0] sm:$0xff] %v2487_v14  ;;  %v8558_v16 = vpop.f32.mrf.mxu3  ;;  %4443 = vmatpush.bf16.msrb.mxu3 %v6544_v24  ;;  %v6552_v24 = vld [vmem:[%s9281_s5 + $0x210] sm:$0xff] }
 0x2dc   : > { %v2113_v44 = vpop.f32.mrf.mxu0 }
 0x2dd   : > { %v2114_v61 = vadd.f32 %v2113_v44, %v8241_v46  ;;  %v2162_v37 = vpop.f32.mrf.mxu1  ;;  %v6565_v44 = vld [vmem:[%s9281_s5 + $0x278] sm:$0xff] }
 0x2df   : > { %v2163_v1 = vadd.f32 %v2162_v37, %v2114_v61  ;;  %2404 = vmatmul.bf16.gmra.mxu2 %v6822_v8  ;;  %4444 = vmatpush.bf16.msrb.mxu3 %v6543_v18 }
 0x2e0   : > { %2453 = vmatmul.bf16.gmra.mxu3 %v6822_v8 }
 0x2e1   : > { %v2489_v54 = vmax.f32 %v2163_v1, 0.0 }
 0x2e2   : > { %v2209_v57 = vpop.f32.mrf.mxu2 }
 0x2e3   : > { %2521 = vst [vmem:[%s8237_s10 + $0xf0] sm:$0xff] %v2489_v54  ;;  %v2210_v46 = vadd.f32 %v2209_v57, %v8246_v9  ;;  %v2258_v7 = vpop.f32.mrf.mxu3  ;;  %4445 = vmatpush.bf16.msrb.mxu3 %v6542_v53  ;;  %v6551_v57 = vld [vmem:[%s9281_s5 + $0x208] sm:$0xff]  ;;  %v6564_v53 = vld [vmem:[%s9281_s5 + $0x270] sm:$0xff] }
 0x2e4   : > { %v2272_v11 = vpop.f32.mrf.mxu0 }
 0x2e5   : > { %v8576_v8 = vadd.f32 %v2258_v7, %v2210_v46  ;;  %v2321_v63 = vpop.f32.mrf.mxu1  ;;  %v2273_v6 = vadd.f32 %v2272_v11, %v8254_v43  ;;  %v6553_v43 = vld [vmem:[%s9281_s5 + $0x218] sm:$0xff]  ;;  %v2529_v46 = vpack.c.bf16 %v8269_v15, %v8269_v15  ;;  %v6563_v15 = vld [vmem:[%s9281_s5 + $0x268] sm:$0xff] }
 0x2e7   : > { %4355 = vmatmul.bf16.vlgmr.msra.gmra.mxu0 %v2523_v45  ;;  %v2322_v26 = vadd.f32 %v2321_v63, %v2273_v6  ;;  %v6569_v45 = vld [vmem:[%s9281_s5 + $0x298] sm:$0xff] }
 0x2e8   : > { %4451 = vmatpush.bf16.msra.mxu0 %v6557_v28  ;;  %v6589_v6 = vld [vmem:[%s9281_s5 + $0x338] sm:$0xff] }
 0x2ea   : > { %v8581_v34 = vpop.f32.mrf.mxu2 }
 0x2eb   : > { %v8583_v21 = vpop.f32.mrf.mxu3 }
 0x2ec   : > { %4452 = vmatpush.bf16.msra.mxu0 %v6556_v12  ;;  %v2274_v27 = vpop.f32.mrf.mxu0  ;;  %v6550_v12 = vld [vmem:[%s9281_s5 + $0x200] sm:$0xff] }
 0x2ed   : > { %v2323_v49 = vpop.f32.mrf.mxu1  ;;  %v2275_v60 = vadd.f32 %v2274_v27, %v8264_v52 }
 0x2ef   : > { %4381 = vmatmul.bf16.vlgmr.msra.gmra.mxu2 %v2525_v13  ;;  %v2324_v61 = vadd.f32 %v2323_v49, %v2275_v60 }
 0x2f0   : > { %4453 = vmatpush.bf16.msra.mxu0 %v6555_v35  ;;  %4477 = vmatpush.bf16.msra.mxu2 %v6573_v41  ;;  %v6568_v35 = vld [vmem:[%s9281_s5 + $0x290] sm:$0xff]  ;;  %v6581_v41 = vld [vmem:[%s9281_s5 + $0x2f8] sm:$0xff] }
 0x2f2   : > { %v2370_v20 = vpop.f32.mrf.mxu2 }
 0x2f3   : > { %v2371_v42 = vadd.f32 %v2370_v20, %v2322_v26  ;;  %v2419_v50 = vpop.f32.mrf.mxu3  ;;  %v6562_v26 = vld [vmem:[%s9281_s5 + $0x260] sm:$0xff]  ;;  %v2531_v20 = vpack.c.bf16 %v8279_v10, %v8279_v10 }
 0x2f4   : > { %4454 = vmatpush.bf16.msra.mxu0 %v6554_v5  ;;  %4478 = vmatpush.bf16.msra.mxu2 %v6572_v47  ;;  %v2277_v23 = vpop.f32.mrf.mxu0 }
 0x2f5   : > { %v2420_v31 = vadd.f32 %v2419_v50, %v2371_v42  ;;  %v2326_v14 = vpop.f32.mrf.mxu1  ;;  %v2278_v7 = vadd.f32 %v2277_v23, %v8274_v48 }
 0x2f7   : > { %v2460_v51 = vmax.f32 %v2420_v31, 0.0  ;;  %4407 = vmatmul.bf16.vlgmr.msrb.gmra.mxu0 %v2527_v17  ;;  %v2327_v48 = vadd.f32 %v2326_v14, %v2278_v7  ;;  %v6588_v17 = vld [vmem:[%s9281_s5 + $0x330] sm:$0xff]  ;;  %v6566_v14 = vld [vmem:[%s9281_s5 + $0x280] sm:$0xff] }
 0x2f8   : > { %4455 = vmatpush.bf16.msra.mxu0 %v6553_v43  ;;  %4479 = vmatpush.bf16.msra.mxu2 %v6571_v40  ;;  %v6567_v43 = vld [vmem:[%s9281_s5 + $0x288] sm:$0xff]  ;;  %v6580_v40 = vld [vmem:[%s9281_s5 + $0x2f0] sm:$0xff]  ;;  %v6586_v7 = vld [vmem:[%s9281_s5 + $0x320] sm:$0xff] }
 0x2f9   : > { %2492 = vst [vmem:[%s8237_s10 + $0x8] sm:$0xff] %v2460_v51  ;;  %v2524_v37 = vpack.c.bf16 %v2460_v51, %v2460_v51  ;;  %v6579_v51 = vld [vmem:[%s9281_s5 + $0x2e8] sm:$0xff] }
 0x2fa   : > { %v2372_v52 = vpop.f32.mrf.mxu2 }
 0x2fb   : > { %v2373_v18 = vadd.f32 %v2372_v52, %v2324_v61  ;;  %v2421_v1 = vpop.f32.mrf.mxu3  ;;  %4368 = vmatmul.bf16.vlgmr.msra.gmra.mxu1 %v2524_v37  ;;  %v6605_v61 = vld [vmem:[%s9281_s5 + $0x3b8] sm:$0xff] }
 0x2fc   : > { %4456 = vmatpush.bf16.msra.mxu0 %v6552_v24  ;;  %4464 = vmatpush.bf16.msra.mxu1 %v6565_v44  ;;  %v2279_v54 = vpop.f32.mrf.mxu0  ;;  %v6587_v44 = vld [vmem:[%s9281_s5 + $0x328] sm:$0xff] }
 0x2fd   : > { %v2422_v11 = vadd.f32 %v2421_v1, %v2373_v18  ;;  %4480 = vmatpush.bf16.msra.mxu2 %v6570_v38  ;;  %v2328_v28 = vpop.f32.mrf.mxu1  ;;  %v2280_v42 = vadd.f32 %v2279_v54, %v8287_v33  ;;  %v6561_v33 = vld [vmem:[%s9281_s5 + $0x258] sm:$0xff]  ;;  %v6560_v18 = vld [vmem:[%s9281_s5 + $0x250] sm:$0xff] }
 0x2ff   : > { %v2462_v63 = vmax.f32 %v2422_v11, 0.0  ;;  %4433 = vmatmul.bf16.vlgmr.msrb.gmra.mxu2 %v2529_v46  ;;  %v2329_v60 = vadd.f32 %v2328_v28, %v2280_v42  ;;  %v2533_v46 = vpack.c.bf16 %v8295_v30, %v8295_v30  ;;  %v6559_v28 = vld [vmem:[%s9281_s5 + $0x248] sm:$0xff] }
 0x300   : > { %4457 = vmatpush.bf16.msra.mxu0 %v6551_v57  ;;  %4465 = vmatpush.bf16.msra.mxu1 %v6564_v53  ;;  %v6578_v53 = vld [vmem:[%s9281_s5 + $0x2e0] sm:$0xff] }
 0x301   : > { %2494 = vst [vmem:[%s8237_s10 + $0x18] sm:$0xff] %v2462_v63  ;;  %v2526_v27 = vpack.c.bf16 %v2462_v63, %v2462_v63  ;;  %4481 = vmatpush.bf16.msra.mxu2 %v6569_v45  ;;  %v6577_v63 = vld [vmem:[%s9281_s5 + $0x2d8] sm:$0xff] }
 0x302   : > { %v2375_v13 = vpop.f32.mrf.mxu2 }
 0x303   : > { %v2376_v49 = vadd.f32 %v2375_v13, %v2327_v48  ;;  %v2424_v5 = vpop.f32.mrf.mxu3  ;;  %4394 = vmatmul.bf16.vlgmr.msra.gmra.mxu3 %v2526_v27  ;;  %v6603_v48 = vld [vmem:[%s9281_s5 + $0x3a8] sm:$0xff]  ;;  %v6558_v13 = vld [vmem:[%s9281_s5 + $0x240] sm:$0xff] }
 0x304   : > { %4458 = vmatpush.bf16.msra.mxu0 %v6550_v12  ;;  %4466 = vmatpush.bf16.msra.mxu1 %v6563_v15  ;;  %v2282_v47 = vpop.f32.mrf.mxu0  ;;  %v6585_v15 = vld [vmem:[%s9281_s5 + $0x318] sm:$0xff] }
 0x305   : > { %v2425_v50 = vadd.f32 %v2424_v5, %v2376_v49  ;;  %4482 = vmatpush.bf16.msra.mxu2 %v6568_v35  ;;  %4490 = vmatpush.bf16.msra.mxu3 %v6581_v41  ;;  %v2331_v23 = vpop.f32.mrf.mxu1  ;;  %v2283_v1 = vadd.f32 %v2282_v47, %v8306_v55  ;;  %v6604_v55 = vld [vmem:[%s9281_s5 + $0x3b0] sm:$0xff] }
 0x306   : > { %v6576_v47 = vld [vmem:[%s9281_s5 + $0x2d0] sm:$0xff] }
 0x307   : > { %v2464_v10 = vmax.f32 %v2425_v50, 0.0  ;;  %4459 = vmatmul.bf16.vlgmr.msra.gmra.mxu0 %v2531_v20  ;;  %v2332_v45 = vadd.f32 %v2331_v23, %v2283_v1  ;;  %v6584_v20 = vld [vmem:[%s9281_s5 + $0x310] sm:$0xff]  ;;  %v6621_v1 = vld [vmem:[%s9281_s5 + $0x438] sm:$0xff] }
 0x308   : > { %4503 = vmatpush.bf16.msrb.mxu0 %v6589_v6  ;;  %4467 = vmatpush.bf16.msra.mxu1 %v6562_v26  ;;  %v6597_v26 = vld [vmem:[%s9281_s5 + $0x378] sm:$0xff] }
 0x309   : > { %2496 = vst [vmem:[%s8237_s10 + $0x28] sm:$0xff] %v2464_v10  ;;  %v2528_v31 = vpack.c.bf16 %v2464_v10, %v2464_v10  ;;  %4483 = vmatpush.bf16.msra.mxu2 %v6567_v43  ;;  %4491 = vmatpush.bf16.msra.mxu3 %v6580_v40  ;;  %v6575_v43 = vld [vmem:[%s9281_s5 + $0x2c8] sm:$0xff]  ;;  %v6596_v40 = vld [vmem:[%s9281_s5 + $0x370] sm:$0xff] }
 0x30a   : > { %v2377_v24 = vpop.f32.mrf.mxu2  ;;  %v6583_v10 = vld [vmem:[%s9281_s5 + $0x308] sm:$0xff] }
 0x30b   : > { %v2378_v37 = vadd.f32 %v2377_v24, %v2329_v60  ;;  %v2426_v38 = vpop.f32.mrf.mxu3  ;;  %4420 = vmatmul.bf16.vlgmr.msrb.gmra.mxu1 %v2528_v31 }
 0x30c   : > { %4504 = vmatpush.bf16.msrb.mxu0 %v6588_v17  ;;  %4468 = vmatpush.bf16.msra.mxu1 %v6561_v33  ;;  %v2284_v52 = vpop.f32.mrf.mxu0  ;;  %v6601_v33 = vld [vmem:[%s9281_s5 + $0x398] sm:$0xff] }
 0x30d   : > { %v2427_v54 = vadd.f32 %v2426_v38, %v2378_v37  ;;  %4484 = vmatpush.bf16.msra.mxu2 %v6566_v14  ;;  %4492 = vmatpush.bf16.msra.mxu3 %v6579_v51  ;;  %v2333_v57 = vpop.f32.mrf.mxu1  ;;  %v2285_v6 = vadd.f32 %v2284_v52, %v8331_v3  ;;  %v6602_v3 = vld [vmem:[%s9281_s5 + $0x3a0] sm:$0xff]  ;;  %v6595_v37 = vld [vmem:[%s9281_s5 + $0x368] sm:$0xff] }
 0x30e   : > { %v6582_v38 = vld [vmem:[%s9281_s5 + $0x300] sm:$0xff] }
 0x30f   : > { %v2466_v11 = vmax.f32 %v2427_v54, 0.0  ;;  %v2334_v50 = vadd.f32 %v2333_v57, %v2285_v6 }
 0x310   : > { %4505 = vmatpush.bf16.msrb.mxu0 %v6587_v44  ;;  %4469 = vmatpush.bf16.msra.mxu1 %v6560_v18  ;;  %v6613_v18 = vld [vmem:[%s9281_s5 + $0x3f8] sm:$0xff] }
 0x311   : > { %4529 = vmatpush.bf16.msrb.mxu2 %v6605_v61  ;;  %2498 = vst [vmem:[%s8237_s10 + $0x38] sm:$0xff] %v2466_v11  ;;  %v2530_v30 = vpack.c.bf16 %v2466_v11, %v2466_v11  ;;  %4493 = vmatpush.bf16.msra.mxu3 %v6578_v53  ;;  %v6574_v61 = vld [vmem:[%s9281_s5 + $0x2c0] sm:$0xff] }
 0x312   : > { %4485 = vmatmul.bf16.vlgmr.msra.gmra.mxu2 %v2533_v46  ;;  %v2380_v12 = vpop.f32.mrf.mxu2  ;;  %v6594_v53 = vld [vmem:[%s9281_s5 + $0x360] sm:$0xff] }
 0x313   : > { %v2381_v27 = vadd.f32 %v2380_v12, %v2332_v45  ;;  %v2429_v35 = vpop.f32.mrf.mxu3  ;;  %4446 = vmatmul.bf16.vlgmr.msrb.gmra.mxu3 %v2530_v30  ;;  %v6612_v45 = vld [vmem:[%s9281_s5 + $0x3f0] sm:$0xff] }
 0x314   : > { %4506 = vmatpush.bf16.msrb.mxu0 %v6586_v7  ;;  %4470 = vmatpush.bf16.msra.mxu1 %v6559_v28  ;;  %v2287_v41 = vpop.f32.mrf.mxu0  ;;  %v6599_v7 = vld [vmem:[%s9281_s5 + $0x388] sm:$0xff]  ;;  %v6620_v30 = vld [vmem:[%s9281_s5 + $0x430] sm:$0xff] }
 0x315   : > { %4530 = vmatpush.bf16.msrb.mxu2 %v6604_v55  ;;  %v2430_v49 = vadd.f32 %v2429_v35, %v2381_v27  ;;  %4494 = vmatpush.bf16.msra.mxu3 %v6577_v63  ;;  %v2336_v5 = vpop.f32.mrf.mxu1  ;;  %v2288_v51 = vadd.f32 %v2287_v41, %v8359_v19  ;;  %v6600_v19 = vld [vmem:[%s9281_s5 + $0x390] sm:$0xff]  ;;  %v2535_v55 = vpack.c.bf16 %v8317_v62, %v8317_v62  ;;  %v6598_v27 = vld [vmem:[%s9281_s5 + $0x380] sm:$0xff]  ;;  %v6619_v41 = vld [vmem:[%s9281_s5 + $0x428] sm:$0xff] }
 0x317   : > { %v2468_v42 = vmax.f32 %v2430_v49, 0.0  ;;  %v2337_v54 = vadd.f32 %v2336_v5, %v2288_v51  ;;  %v6592_v49 = vld [vmem:[%s9281_s5 + $0x350] sm:$0xff] }
 0x318   : > { %4507 = vmatpush.bf16.msrb.mxu0 %v6585_v15  ;;  %4471 = vmatpush.bf16.msra.mxu1 %v6558_v13  ;;  %v6637_v13 = vld [vmem:[%s9281_s5 + $0x4b8] sm:$0xff] }
 0x319   : > { %4531 = vmatpush.bf16.msrb.mxu2 %v6603_v48  ;;  %2500 = vst [vmem:[%s8237_s10 + $0x48] sm:$0xff] %v2468_v42  ;;  %v2532_v23 = vpack.c.bf16 %v2468_v42, %v2468_v42  ;;  %4495 = vmatpush.bf16.msra.mxu3 %v6576_v47  ;;  %v6593_v48 = vld [vmem:[%s9281_s5 + $0x358] sm:$0xff]  ;;  %v2537_v47 = vpack.c.bf16 %v8345_v59, %v8345_v59  ;;  %v6618_v42 = vld [vmem:[%s9281_s5 + $0x420] sm:$0xff] }
 0x31a   : > { %v2382_v17 = vpop.f32.mrf.mxu2 }
 0x31b   : > { %v2383_v60 = vadd.f32 %v2382_v17, %v2334_v50  ;;  %v2431_v31 = vpop.f32.mrf.mxu3  ;;  %4472 = vmatmul.bf16.vlgmr.msra.gmra.mxu1 %v2532_v23  ;;  %v6636_v23 = vld [vmem:[%s9281_s5 + $0x4b0] sm:$0xff]  ;;  %v6591_v17 = vld [vmem:[%s9281_s5 + $0x348] sm:$0xff] }
 0x31c   : > { %4516 = vmatpush.bf16.msrb.mxu1 %v6597_v26  ;;  %4508 = vmatpush.bf16.msrb.mxu0 %v6584_v20  ;;  %v2289_v14 = vpop.f32.mrf.mxu0 }
 0x31d   : > { %4532 = vmatpush.bf16.msrb.mxu2 %v6602_v3  ;;  %v2432_v24 = vadd.f32 %v2431_v31, %v2383_v60  ;;  %4496 = vmatpush.bf16.msra.mxu3 %v6575_v43  ;;  %v2338_v44 = vpop.f32.mrf.mxu1  ;;  %v2290_v12 = vadd.f32 %v2289_v14, %v8390_v0  ;;  %v6611_v0 = vld [vmem:[%s9281_s5 + $0x3e8] sm:$0xff]  ;;  %v6610_v3 = vld [vmem:[%s9281_s5 + $0x3e0] sm:$0xff]  ;;  %v6609_v60 = vld [vmem:[%s9281_s5 + $0x3d8] sm:$0xff] }
 0x31e   : > { %v6635_v31 = vld [vmem:[%s9281_s5 + $0x4a8] sm:$0xff] }
 0x31f   : > { %v2470_v52 = vmax.f32 %v2432_v24, 0.0  ;;  %v2339_v6 = vadd.f32 %v2338_v44, %v2290_v12  ;;  %v6629_v24 = vld [vmem:[%s9281_s5 + $0x478] sm:$0xff] }
 0x320   : > { %4517 = vmatpush.bf16.msrb.mxu1 %v6596_v40  ;;  %4509 = vmatpush.bf16.msrb.mxu0 %v6583_v10  ;;  %v2197_v10 = vadd.f32 %v8447_v39, %v8246_v9  ;;  %v6590_v39 = vld [vmem:[%s9281_s5 + $0x340] sm:$0xff] }
 0x321   : > { %4533 = vmatpush.bf16.msrb.mxu2 %v6601_v33  ;;  %2502 = vst [vmem:[%s8237_s10 + $0x58] sm:$0xff] %v2470_v52  ;;  %v2534_v57 = vpack.c.bf16 %v2470_v52, %v2470_v52  ;;  %4497 = vmatpush.bf16.msra.mxu3 %v6574_v61 }
 0x322   : > { %v2385_v46 = vpop.f32.mrf.mxu2  ;;  %v2246_v44 = vadd.f32 %v8450_v56, %v2197_v10  ;;  %v6643_v10 = vld [vmem:[%s9281_s5 + $0x4e8] sm:$0xff] }
 0x323   : > { %v2386_v11 = vadd.f32 %v2385_v46, %v2337_v54  ;;  %v2434_v28 = vpop.f32.mrf.mxu3 }
 0x324   : > { %4518 = vmatpush.bf16.msrb.mxu1 %v6595_v37  ;;  %4510 = vmatpush.bf16.msrb.mxu0 %v6582_v38  ;;  %v2292_v63 = vpop.f32.mrf.mxu0  ;;  %v6608_v38 = vld [vmem:[%s9281_s5 + $0x3d0] sm:$0xff] }
 0x325   : > { %4534 = vmatpush.bf16.msrb.mxu2 %v6600_v19  ;;  %4542 = vmatpush.bf16.msrb.mxu3 %v6613_v18  ;;  %v2435_v15 = vadd.f32 %v2434_v28, %v2386_v11  ;;  %v2341_v62 = vpop.f32.mrf.mxu1  ;;  %v2293_v59 = vadd.f32 %v2292_v63, %v8424_v4  ;;  %v6617_v4 = vld [vmem:[%s9281_s5 + $0x418] sm:$0xff]  ;;  %v6616_v19 = vld [vmem:[%s9281_s5 + $0x410] sm:$0xff]  ;;  %v6634_v18 = vld [vmem:[%s9281_s5 + $0x4a0] sm:$0xff] }
 0x326   : > { %4498 = vmatmul.bf16.vlgmr.msra.gmra.mxu3 %v2534_v57  ;;  %v6633_v11 = vld [vmem:[%s9281_s5 + $0x498] sm:$0xff] }
 0x327   : > { %4511 = vmatmul.bf16.vlgmr.msrb.gmra.mxu0 %v2535_v55  ;;  %v8776_v35 = vmax.f32 %v2435_v15, 0.0  ;;  %v2342_v14 = vadd.f32 %v2341_v62, %v2293_v59  ;;  %v6615_v55 = vld [vmem:[%s9281_s5 + $0x408] sm:$0xff]  ;;  %v6606_v15 = vld [vmem:[%s9281_s5 + $0x3c0] sm:$0xff] }
 0x328   : > { %4555 = vmatpush.bf16.msra.mxu0 %v6621_v1  ;;  %4519 = vmatpush.bf16.msrb.mxu1 %v6594_v53  ;;  %v6628_v53 = vld [vmem:[%s9281_s5 + $0x470] sm:$0xff]  ;;  %v6614_v62 = vld [vmem:[%s9281_s5 + $0x400] sm:$0xff] }
 0x329   : > { %4535 = vmatpush.bf16.msrb.mxu2 %v6599_v7  ;;  %4543 = vmatpush.bf16.msrb.mxu3 %v6612_v45  ;;  %2504 = vst [vmem:[%s8237_s10 + $0x68] sm:$0xff] %v8776_v35  ;;  %v2536_v54 = vpack.c.bf16 %v8776_v35, %v8776_v35  ;;  %v6607_v7 = vld [vmem:[%s9281_s5 + $0x3c8] sm:$0xff]  ;;  %v6645_v35 = vld [vmem:[%s9281_s5 + $0x4f8] sm:$0xff] }
 0x32a   : > { %v2387_v5 = vpop.f32.mrf.mxu2 }
 0x32b   : > { %v2388_v26 = vadd.f32 %v2387_v5, %v2339_v6  ;;  %v2436_v20 = vpop.f32.mrf.mxu3  ;;  %v2202_v6 = vadd.f32 %v8513_v32, %v8246_v9  ;;  %v6626_v5 = vld [vmem:[%s9281_s5 + $0x460] sm:$0xff]  ;;  %v6631_v32 = vld [vmem:[%s9281_s5 + $0x488] sm:$0xff] }
 0x32c   : > { %4556 = vmatpush.bf16.msra.mxu0 %v6620_v30  ;;  %4520 = vmatpush.bf16.msrb.mxu1 %v6593_v48  ;;  %v2294_v50 = vpop.f32.mrf.mxu0  ;;  %v6627_v30 = vld [vmem:[%s9281_s5 + $0x468] sm:$0xff] }
 0x32d   : > { %4536 = vmatpush.bf16.msrb.mxu2 %v6598_v27  ;;  %4544 = vmatpush.bf16.msrb.mxu3 %v6611_v0  ;;  %v2437_v43 = vadd.f32 %v2436_v20, %v2388_v26  ;;  %v2343_v40 = vpop.f32.mrf.mxu1  ;;  %v2295_v1 = vadd.f32 %v2294_v50, %v2246_v44  ;;  %v6632_v27 = vld [vmem:[%s9281_s5 + $0x490] sm:$0xff]  ;;  %v2251_v50 = vadd.f32 %v8516_v36, %v2202_v6  ;;  %v6650_v44 = vld [vmem:[%s9281_s5 + $0x520] sm:$0xff]  ;;  %v6665_v6 = vld [vmem:[%s9281_s5 + $0x598] sm:$0xff] }
 0x32e   : > { %v6644_v20 = vld [vmem:[%s9281_s5 + $0x4f0] sm:$0xff] }
 0x32f   : > { %v8809_v33 = vmax.f32 %v2437_v43, 0.0  ;;  %v2344_v28 = vadd.f32 %v2343_v40, %v2295_v1  ;;  %v6625_v43 = vld [vmem:[%s9281_s5 + $0x458] sm:$0xff] }
 0x330   : > { %4557 = vmatpush.bf16.msra.mxu0 %v6619_v41  ;;  %4537 = vmatmul.bf16.vlgmr.msrb.gmra.mxu2 %v2537_v47  ;;  %v6641_v1 = vld [vmem:[%s9281_s5 + $0x4d8] sm:$0xff] }
 0x331   : > { %4581 = vmatpush.bf16.msra.mxu2 %v6637_v13  ;;  %4521 = vmatpush.bf16.msrb.mxu1 %v6592_v49  ;;  %2506 = vst [vmem:[%s8237_s10 + $0x78] sm:$0xff] %v8809_v33  ;;  %v6653_v13 = vld [vmem:[%s9281_s5 + $0x538] sm:$0xff]  ;;  %v2538_v47 = vpack.c.bf16 %v8809_v33, %v8809_v33 }
 0x332   : > { %4545 = vmatpush.bf16.msrb.mxu3 %v6610_v3  ;;  %v2390_v51 = vpop.f32.mrf.mxu2 }
 0x333   : > { %v2391_v61 = vadd.f32 %v2390_v51, %v2342_v14  ;;  %v2439_v37 = vpop.f32.mrf.mxu3  ;;  %v6624_v14 = vld [vmem:[%s9281_s5 + $0x450] sm:$0xff]  ;;  %v2541_v51 = vpack.c.bf16 %v8407_v25, %v8407_v25  ;;  %v6623_v25 = vld [vmem:[%s9281_s5 + $0x448] sm:$0xff] }
 0x334   : > { %4558 = vmatpush.bf16.msra.mxu0 %v6618_v42  ;;  %v2297_v52 = vpop.f32.mrf.mxu0 }
 0x335   : > { %4582 = vmatpush.bf16.msra.mxu2 %v6636_v23  ;;  %4522 = vmatpush.bf16.msrb.mxu1 %v6591_v17  ;;  %v2440_v56 = vadd.f32 %v2439_v37, %v2391_v61  ;;  %v2346_v57 = vpop.f32.mrf.mxu1  ;;  %v2298_v0 = vadd.f32 %v2297_v52, %v8487_v22  ;;  %v2539_v22 = vpack.c.bf16 %v8373_v2, %v8373_v2  ;;  %v6652_v2 = vld [vmem:[%s9281_s5 + $0x530] sm:$0xff]  ;;  %v6630_v17 = vld [vmem:[%s9281_s5 + $0x480] sm:$0xff] }
 0x336   : > { %4546 = vmatpush.bf16.msrb.mxu3 %v6609_v60  ;;  %v6651_v60 = vld [vmem:[%s9281_s5 + $0x528] sm:$0xff]  ;;  %v6668_v61 = vld [vmem:[%s9281_s5 + $0x5b0] sm:$0xff] }
 0x337   : > { %v8843_v46 = vmax.f32 %v2440_v56, 0.0  ;;  %v2347_v3 = vadd.f32 %v2346_v57, %v2298_v0  ;;  %v6649_v57 = vld [vmem:[%s9281_s5 + $0x518] sm:$0xff]  ;;  %v6639_v0 = vld [vmem:[%s9281_s5 + $0x4c8] sm:$0xff] }
 0x338   : > { %4559 = vmatpush.bf16.msra.mxu0 %v6617_v4  ;;  %v6669_v4 = vld [vmem:[%s9281_s5 + $0x5b8] sm:$0xff] }
 0x339   : > { %4583 = vmatpush.bf16.msra.mxu2 %v6635_v31  ;;  %4523 = vmatpush.bf16.msrb.mxu1 %v6590_v39  ;;  %2508 = vst [vmem:[%s8237_s10 + $0x88] sm:$0xff] %v8843_v46  ;;  %v6642_v39 = vld [vmem:[%s9281_s5 + $0x4e0] sm:$0xff] }
 0x33a   : > { %4547 = vmatpush.bf16.msrb.mxu3 %v6608_v38  ;;  %v2392_v45 = vpop.f32.mrf.mxu2 }
 0x33b   : > { %v2393_v63 = vadd.f32 %v2392_v45, %v2344_v28  ;;  %v2441_v12 = vpop.f32.mrf.mxu3  ;;  %v6661_v28 = vld [vmem:[%s9281_s5 + $0x578] sm:$0xff] }
 0x33c   : > { %4560 = vmatpush.bf16.msra.mxu0 %v6616_v19  ;;  %4524 = vmatmul.bf16.vlgmr.msrb.gmra.mxu1 %v2536_v54  ;;  %v2299_v48 = vpop.f32.mrf.mxu0 }
 0x33d   : > { %4568 = vmatpush.bf16.msra.mxu1 %v6629_v24  ;;  %4584 = vmatpush.bf16.msra.mxu2 %v6634_v18  ;;  %v2442_v41 = vadd.f32 %v2441_v12, %v2393_v63  ;;  %v2348_v26 = vpop.f32.mrf.mxu1  ;;  %v2300_v36 = vadd.f32 %v2299_v48, %v2251_v50  ;;  %v2540_v48 = vpack.c.bf16 %v8843_v46, %v8843_v46  ;;  %v6647_v46 = vld [vmem:[%s9281_s5 + $0x508] sm:$0xff] }
 0x33e   : > { %4548 = vmatpush.bf16.msrb.mxu3 %v6607_v7  ;;  %v2207_v7 = vadd.f32 %v8555_v58, %v8246_v9  ;;  %v6648_v58 = vld [vmem:[%s9281_s5 + $0x510] sm:$0xff] }
 0x33f   : > { %v8877_v49 = vmax.f32 %v2442_v41, 0.0  ;;  %v2349_v24 = vadd.f32 %v2348_v26, %v2300_v36  ;;  %v6660_v41 = vld [vmem:[%s9281_s5 + $0x570] sm:$0xff] }
 0x340   : > { %4561 = vmatpush.bf16.msra.mxu0 %v6615_v55  ;;  %v2256_v12 = vadd.f32 %v8558_v16, %v2207_v7  ;;  %v6682_v7 = vld [vmem:[%s9281_s5 + $0x620] sm:$0xff] }
 0x341   : > { %4569 = vmatpush.bf16.msra.mxu1 %v6628_v53  ;;  %4585 = vmatpush.bf16.msra.mxu2 %v6633_v11  ;;  %2510 = vst [vmem:[%s8237_s10 + $0x98] sm:$0xff] %v8877_v49  ;;  %v6667_v53 = vld [vmem:[%s9281_s5 + $0x5a8] sm:$0xff]  ;;  %v6640_v11 = vld [vmem:[%s9281_s5 + $0x4d0] sm:$0xff] }
 0x342   : > { %4549 = vmatpush.bf16.msrb.mxu3 %v6606_v15  ;;  %v2395_v42 = vpop.f32.mrf.mxu2 }
 0x343   : > { %v2396_v23 = vadd.f32 %v2395_v42, %v2347_v3  ;;  %v2444_v59 = vpop.f32.mrf.mxu3  ;;  %v6685_v42 = vld [vmem:[%s9281_s5 + $0x638] sm:$0xff] }
 0x344   : > { %4562 = vmatpush.bf16.msra.mxu0 %v6614_v62  ;;  %v2302_v40 = vpop.f32.mrf.mxu0 }
 0x345   : > { %4570 = vmatpush.bf16.msra.mxu1 %v6627_v30  ;;  %4586 = vmatpush.bf16.msra.mxu2 %v6632_v27  ;;  %v2445_v33 = vadd.f32 %v2444_v59, %v2396_v23  ;;  %v2351_v37 = vpop.f32.mrf.mxu1  ;;  %v2303_v56 = vadd.f32 %v2302_v40, %v8538_v29  ;;  %v6622_v29 = vld [vmem:[%s9281_s5 + $0x440] sm:$0xff] }
 0x346   : > { %4594 = vmatpush.bf16.msra.mxu3 %v6645_v35  ;;  %v6666_v30 = vld [vmem:[%s9281_s5 + $0x5a0] sm:$0xff] }
 0x347   : > { %4550 = vmatmul.bf16.vlgmr.msrb.gmra.mxu3 %v2538_v47  ;;  %4563 = vmatmul.bf16.vlgmr.msra.gmra.mxu0 %v2539_v22  ;;  %v8913_v31 = vmax.f32 %v2445_v33, 0.0  ;;  %v2352_v45 = vadd.f32 %v2351_v37, %v2303_v56  ;;  %v6638_v22 = vld [vmem:[%s9281_s5 + $0x4c0] sm:$0xff]  ;;  %v6659_v47 = vld [vmem:[%s9281_s5 + $0x568] sm:$0xff] }
 0x348   : > { %4607 = vmatpush.bf16.msrb.mxu0 %v6653_v13  ;;  %v6658_v40 = vld [vmem:[%s9281_s5 + $0x560] sm:$0xff]  ;;  %v6663_v33 = vld [vmem:[%s9281_s5 + $0x588] sm:$0xff] }
 0x349   : > { %4571 = vmatpush.bf16.msra.mxu1 %v6626_v5  ;;  %4587 = vmatpush.bf16.msra.mxu2 %v6631_v32  ;;  %2512 = vst [vmem:[%s8237_s10 + $0xa8] sm:$0xff] %v8913_v31  ;;  %v6646_v32 = vld [vmem:[%s9281_s5 + $0x500] sm:$0xff] }
 0x34a   : > { %4595 = vmatpush.bf16.msra.mxu3 %v6644_v20  ;;  %v2397_v38 = vpop.f32.mrf.mxu2  ;;  %v6664_v20 = vld [vmem:[%s9281_s5 + $0x590] sm:$0xff] }
 0x34b   : > { %v2398_v19 = vadd.f32 %v2397_v38, %v2349_v24  ;;  %v2446_v52 = vpop.f32.mrf.mxu3 }
 0x34c   : > { %4608 = vmatpush.bf16.msrb.mxu0 %v6652_v2  ;;  %v2304_v18 = vpop.f32.mrf.mxu0  ;;  %v6677_v2 = vld [vmem:[%s9281_s5 + $0x5f8] sm:$0xff] }
 0x34d   : > { %4572 = vmatpush.bf16.msra.mxu1 %v6625_v43  ;;  %4588 = vmatpush.bf16.msra.mxu2 %v6630_v17  ;;  %v2447_v54 = vadd.f32 %v2446_v52, %v2398_v19  ;;  %v2353_v27 = vpop.f32.mrf.mxu1  ;;  %v2305_v16 = vadd.f32 %v2304_v18, %v2256_v12  ;;  %v2542_v17 = vpack.c.bf16 %v8877_v49, %v8877_v49  ;;  %v6701_v19 = vld [vmem:[%s9281_s5 + $0x6b8] sm:$0xff]  ;;  %v6656_v18 = vld [vmem:[%s9281_s5 + $0x550] sm:$0xff] }
 0x34e   : > { %4596 = vmatpush.bf16.msra.mxu3 %v6643_v10  ;;  %v2212_v49 = vadd.f32 %v8581_v34, %v8246_v9  ;;  %v6675_v34 = vld [vmem:[%s9281_s5 + $0x5e8] sm:$0xff] }
 0x34f   : > { %v8946_v55 = vmax.f32 %v2447_v54, 0.0  ;;  %v2354_v26 = vadd.f32 %v2353_v27, %v2305_v16  ;;  %v6754_v54 = vld [vmem:[%s8237_s10 + $0xb0] sm:$0xff]  ;;  %v6654_v27 = vld [vmem:[%s9281_s5 + $0x540] sm:$0xff] }
 0x350   : > { %4609 = vmatpush.bf16.msrb.mxu0 %v6651_v60  ;;  %4589 = vmatmul.bf16.vlgmr.msra.gmra.mxu2 %v2541_v51  ;;  %v6753_v60 = vld [vmem:[%s8237_s10 + $0xa0] sm:$0xff]  ;;  %v6657_v51 = vld [vmem:[%s9281_s5 + $0x558] sm:$0xff]  ;;  %v2261_v37 = vadd.f32 %v8583_v21, %v2212_v49  ;;  %v6680_v16 = vld [vmem:[%s9281_s5 + $0x610] sm:$0xff] }
 0x351   : > { %4633 = vmatpush.bf16.msrb.mxu2 %v6669_v4  ;;  %4573 = vmatpush.bf16.msra.mxu1 %v6624_v14  ;;  %2514 = vst [vmem:[%s8237_s10 + $0xb8] sm:$0xff] %v8946_v55  ;;  %v2543_v4 = vpack.c.bf16 %v6753_v60, %v6753_v60  ;;  %v6676_v14 = vld [vmem:[%s9281_s5 + $0x5f0] sm:$0xff]  ;;  %v6674_v21 = vld [vmem:[%s9281_s5 + $0x5e0] sm:$0xff] }
 0x352   : > { %4597 = vmatpush.bf16.msra.mxu3 %v6642_v39  ;;  %v2400_v63 = vpop.f32.mrf.mxu2 }
 0x353   : > { %v2401_v15 = vadd.f32 %v2400_v63, %v2352_v45  ;;  %v2449_v62 = vpop.f32.mrf.mxu3  ;;  %v6681_v63 = vld [vmem:[%s9281_s5 + $0x618] sm:$0xff] }
 0x354   : > { %4610 = vmatpush.bf16.msrb.mxu0 %v6650_v44  ;;  %v2307_v35 = vpop.f32.mrf.mxu0  ;;  %v6662_v44 = vld [vmem:[%s9281_s5 + $0x580] sm:$0xff] }
 0x355   : > { %4634 = vmatpush.bf16.msrb.mxu2 %v6668_v61  ;;  %4574 = vmatpush.bf16.msra.mxu1 %v6623_v25  ;;  %v2450_v13 = vadd.f32 %v2449_v62, %v2401_v15  ;;  %v2356_v59 = vpop.f32.mrf.mxu1  ;;  %v2308_v10 = vadd.f32 %v2307_v35, %v8576_v8  ;;  %v6684_v8 = vld [vmem:[%s9281_s5 + $0x630] sm:$0xff]  ;;  %v6683_v61 = vld [vmem:[%s9281_s5 + $0x628] sm:$0xff] }
 0x356   : > { %4598 = vmatpush.bf16.msra.mxu3 %v6641_v1  ;;  %v6699_v15 = vld [vmem:[%s9281_s5 + $0x6a8] sm:$0xff] }
 0x357   : > { %v8980_v5 = vmax.f32 %v2450_v13, 0.0  ;;  %v2357_v24 = vadd.f32 %v2356_v59, %v2308_v10  ;;  %v6696_v59 = vld [vmem:[%s9281_s5 + $0x690] sm:$0xff] }
 0x358   : > { %4611 = vmatpush.bf16.msrb.mxu0 %v6649_v57  ;;  %v2545_v57 = vpack.c.bf16 %v6754_v54, %v6754_v54 }
 0x359   : > { %4635 = vmatpush.bf16.msrb.mxu2 %v6667_v53  ;;  %4575 = vmatpush.bf16.msra.mxu1 %v6622_v29  ;;  %2516 = vst [vmem:[%s8237_s10 + $0xc8] sm:$0xff] %v8980_v5 }
 0x35a   : > { %4599 = vmatpush.bf16.msra.mxu3 %v6640_v11  ;;  %v2402_v3 = vpop.f32.mrf.mxu2  ;;  %v6700_v11 = vld [vmem:[%s9281_s5 + $0x6b0] sm:$0xff] }
 0x35b   : > { %v2403_v50 = vadd.f32 %v2402_v3, %v2354_v26  ;;  %v2451_v23 = vpop.f32.mrf.mxu3  ;;  %v6671_v26 = vld [vmem:[%s9281_s5 + $0x5c8] sm:$0xff] }
 0x35c   : > { %4612 = vmatpush.bf16.msrb.mxu0 %v6648_v58  ;;  %4576 = vmatmul.bf16.vlgmr.msra.gmra.mxu1 %v2540_v48  ;;  %v2309_v43 = vpop.f32.mrf.mxu0 }
 0x35d   : > { %4620 = vmatpush.bf16.msrb.mxu1 %v6661_v28  ;;  %4636 = vmatpush.bf16.msrb.mxu2 %v6666_v30  ;;  %v2452_v36 = vadd.f32 %v2451_v23, %v2403_v50  ;;  %v2310_v1 = vadd.f32 %v2309_v43, %v2261_v37  ;;  %v2358_v53 = vpop.f32.mrf.mxu1  ;;  %v6655_v28 = vld [vmem:[%s9281_s5 + $0x548] sm:$0xff]  ;;  %v6673_v30 = vld [vmem:[%s9281_s5 + $0x5d8] sm:$0xff]  ;;  %v6678_v50 = vld [vmem:[%s9281_s5 + $0x600] sm:$0xff] }
 0x35e   : > { %4600 = vmatpush.bf16.msra.mxu3 %v6639_v0  ;;  %v6693_v0 = vld [vmem:[%s9281_s5 + $0x678] sm:$0xff]  ;;  %v6706_v37 = vld [vmem:[%s9281_s5 + $0x6e0] sm:$0xff] }
 0x35f   : > { %v9020_v39 = vmax.f32 %v2452_v36, 0.0  ;;  %v2359_v45 = vadd.f32 %v2358_v53, %v2310_v1  ;;  %v6709_v43 = vld [vmem:[%s9281_s5 + $0x6f8] sm:$0xff]  ;;  %v6690_v36 = vld [vmem:[%s9281_s5 + $0x660] sm:$0xff] }
 0x360   : > { %4613 = vmatpush.bf16.msrb.mxu0 %v6647_v46  ;;  %v6698_v46 = vld [vmem:[%s9281_s5 + $0x6a0] sm:$0xff] }
 0x361   : > { %4621 = vmatpush.bf16.msrb.mxu1 %v6660_v41  ;;  %4637 = vmatpush.bf16.msrb.mxu2 %v6665_v6  ;;  %2518 = vst [vmem:[%s8237_s10 + $0xd8] sm:$0xff] %v9020_v39  ;;  %v6672_v41 = vld [vmem:[%s9281_s5 + $0x5d0] sm:$0xff]  ;;  %v2544_v6 = vpack.c.bf16 %v8913_v31, %v8913_v31  ;;  %v6752_v31 = vld [vmem:[%s9282_s6] ss:$0 sm:$0xff] }
 0x362   : > { %4601 = vmatpush.bf16.msra.mxu3 %v6638_v22  ;;  %v2405_v9 = vpop.f32.mrf.mxu2  ;;  %v6692_v22 = vld [vmem:[%s9281_s5 + $0x670] sm:$0xff] }
 0x363   : > { %v2406_v38 = vadd.f32 %v2405_v9, %v2357_v24  ;;  %v2454_v52 = vpop.f32.mrf.mxu3  ;;  %v6694_v24 = vld [vmem:[%s9281_s5 + $0x680] sm:$0xff] }
 0x364   : > { %4614 = vmatpush.bf16.msrb.mxu0 %v6646_v32  ;;  %v4356_v25 = vpop.f32.mrf.mxu0  ;;  %v6679_v32 = vld [vmem:[%s9281_s5 + $0x608] sm:$0xff] }
 0x365   : > { %4622 = vmatpush.bf16.msrb.mxu1 %v6659_v47  ;;  %4638 = vmatpush.bf16.msrb.mxu2 %v6664_v20  ;;  %v2455_v56 = vadd.f32 %v2454_v52, %v2406_v38  ;;  %v6697_v20 = vld [vmem:[%s9281_s5 + $0x698] sm:$0xff]  ;;  %v4357_v23 = vadd.f32 %v6752_v31, %v4356_v25  ;;  %v6756_v38 = vld [vmem:[%s8237_s10 + $0xd0] sm:$0xff] }
 0x366   : > { %4646 = vmatpush.bf16.msrb.mxu3 %v6677_v2  ;;  %v6691_v2 = vld [vmem:[%s9281_s5 + $0x668] sm:$0xff] }
 0x367   : > { %4602 = vmatmul.bf16.vlgmr.msra.gmra.mxu3 %v2542_v17  ;;  %4615 = vmatmul.bf16.vlgmr.msrb.gmra.mxu0 %v2543_v4  ;;  %v2488_v29 = vmax.f32 %v2455_v56, 0.0  ;;  %v2546_v4 = vpack.c.bf16 %v8946_v55, %v8946_v55  ;;  %v6689_v55 = vld [vmem:[%s9281_s5 + $0x658] sm:$0xff] }
 0x368   : > { %4659 = vmatpush.bf16.msra.mxu0 %v6685_v42  ;;  %v6670_v42 = vld [vmem:[%s9281_s5 + $0x5c0] sm:$0xff]  ;;  %v6705_v56 = vld [vmem:[%s9281_s5 + $0x6d8] sm:$0xff] }
 0x369   : > { %4623 = vmatpush.bf16.msrb.mxu1 %v6658_v40  ;;  %4639 = vmatpush.bf16.msrb.mxu2 %v6663_v33  ;;  %2520 = vst [vmem:[%s8237_s10 + $0xe8] sm:$0xff] %v2488_v29  ;;  %v6755_v33 = vld [vmem:[%s8237_s10 + $0xc0] sm:$0xff]  ;;  %v6704_v29 = vld [vmem:[%s9281_s5 + $0x6d0] sm:$0xff] }
 0x36a   : > { %4647 = vmatpush.bf16.msrb.mxu3 %v6676_v14  ;;  %v2407_v58 = vpop.f32.mrf.mxu2  ;;  %v2547_v60 = vpack.c.bf16 %v6755_v33, %v6755_v33  ;;  %v6695_v14 = vld [vmem:[%s9281_s5 + $0x688] sm:$0xff] }
 0x36b   : > { %v2408_v12 = vadd.f32 %v2407_v58, %v2359_v45  ;;  %v2456_v62 = vpop.f32.mrf.mxu3  ;;  %v2548_v58 = vpack.c.bf16 %v8980_v5, %v8980_v5 }
 0x36c   : > { %4660 = vmatpush.bf16.msra.mxu0 %v6684_v8  ;;  %v4358_v48 = vpop.f32.mrf.mxu0  ;;  %v6708_v8 = vld [vmem:[%s9281_s5 + $0x6f0] sm:$0xff] }
 0x36d   : > { %4624 = vmatpush.bf16.msrb.mxu1 %v6657_v51  ;;  %4640 = vmatpush.bf16.msrb.mxu2 %v6662_v44  ;;  %v2457_v35 = vadd.f32 %v2456_v62, %v2408_v12  ;;  %v6707_v44 = vld [vmem:[%s9281_s5 + $0x6e8] sm:$0xff] }
 0x36e   : > { %4648 = vmatpush.bf16.msrb.mxu3 %v6675_v34 }
 0x36f   : > { %v2490_v13 = vmax.f32 %v2457_v35, 0.0 }
 0x370   : > { %4661 = vmatpush.bf16.msra.mxu0 %v6683_v61  ;;  %4641 = vmatmul.bf16.vlgmr.msrb.gmra.mxu2 %v2545_v57  ;;  %v6688_v61 = vld [vmem:[%s9281_s5 + $0x650] sm:$0xff] }
 0x371   : > { %4685 = vmatpush.bf16.msra.mxu2 %v6701_v19  ;;  %4625 = vmatpush.bf16.msrb.mxu1 %v6656_v18  ;;  %2522 = vst [vmem:[%s8237_s10 + $0xf8] sm:$0xff] %v2490_v13  ;;  %v2549_v19 = vpack.c.bf16 %v6756_v38, %v6756_v38  ;;  %v6687_v18 = vld [vmem:[%s9281_s5 + $0x648] sm:$0xff] }
 0x372   : > { %4649 = vmatpush.bf16.msrb.mxu3 %v6674_v21  ;;  %v4382_v47 = vpop.f32.mrf.mxu2  ;;  %v6686_v21 = vld [vmem:[%s9281_s5 + $0x640] sm:$0xff] }
 0x374   : > { %4662 = vmatpush.bf16.msra.mxu0 %v6682_v7  ;;  %v4408_v3 = vpop.f32.mrf.mxu0 }
 0x375   : > { %4686 = vmatpush.bf16.msra.mxu2 %v6700_v11  ;;  %4626 = vmatpush.bf16.msrb.mxu1 %v6655_v28 }
 0x376   : > { %4650 = vmatpush.bf16.msrb.mxu3 %v6673_v30  ;;  %v6703_v30 = vld [vmem:[%s9281_s5 + $0x6c8] sm:$0xff] }
 0x378   : > { %4663 = vmatpush.bf16.msra.mxu0 %v6681_v63  ;;  %v4369_v40 = vpop.f32.mrf.mxu1 }
 0x379   : > { %4687 = vmatpush.bf16.msra.mxu2 %v6699_v15  ;;  %4627 = vmatpush.bf16.msrb.mxu1 %v6654_v27  ;;  %v4370_v17 = vadd.f32 %v4369_v40, %v4357_v23  ;;  %v6702_v15 = vld [vmem:[%s9281_s5 + $0x6c0] sm:$0xff]  ;;  %v2550_v27 = vpack.c.bf16 %v9020_v39, %v9020_v39 }
 0x37a   : > { %4651 = vmatpush.bf16.msrb.mxu3 %v6672_v41  ;;  %v4384_v10 = vpop.f32.mrf.mxu2 }
 0x37b   : > { %v4383_v49 = vadd.f32 %v4382_v47, %v4370_v17 }
 0x37c   : > { %4664 = vmatpush.bf16.msra.mxu0 %v6680_v16  ;;  %4628 = vmatmul.bf16.vlgmr.msrb.gmra.mxu1 %v2544_v6  ;;  %v4410_v51 = vpop.f32.mrf.mxu0 }
 0x37d   : > { %4672 = vmatpush.bf16.msra.mxu1 %v6693_v0  ;;  %4688 = vmatpush.bf16.msra.mxu2 %v6698_v46 }
 0x37e   : > { %4652 = vmatpush.bf16.msrb.mxu3 %v6671_v26 }
 0x380   : > { %4665 = vmatpush.bf16.msra.mxu0 %v6679_v32  ;;  %v4371_v9 = vpop.f32.mrf.mxu1 }
 0x381   : > { %4673 = vmatpush.bf16.msra.mxu1 %v6692_v22  ;;  %4689 = vmatpush.bf16.msra.mxu2 %v6697_v20 }
 0x382   : > { %4653 = vmatpush.bf16.msrb.mxu3 %v6670_v42  ;;  %v4434_v34 = vpop.f32.mrf.mxu2 }
 0x384   : > { %4666 = vmatpush.bf16.msra.mxu0 %v6678_v50  ;;  %v4460_v52 = vpop.f32.mrf.mxu0 }
 0x385   : > { %4674 = vmatpush.bf16.msra.mxu1 %v6691_v2  ;;  %4690 = vmatpush.bf16.msra.mxu2 %v6696_v59 }
 0x386   : > { %4698 = vmatpush.bf16.msra.mxu3 %v6709_v43  ;;  %v4395_v25 = vpop.f32.mrf.mxu3 }
 0x387   : > { %4654 = vmatmul.bf16.vlgmr.msrb.gmra.mxu3 %v2546_v4  ;;  %4667 = vmatmul.bf16.vlgmr.msra.gmra.mxu0 %v2547_v60  ;;  %v4396_v1 = vadd.f32 %v4395_v25, %v4383_v49 }
 0x388   : > { %v4421_v54 = vpop.f32.mrf.mxu1 }
 0x389   : > { %4675 = vmatpush.bf16.msra.mxu1 %v6690_v36  ;;  %4691 = vmatpush.bf16.msra.mxu2 %v6695_v14  ;;  %v4409_v57 = vadd.f32 %v4408_v3, %v4396_v1 }
 0x38a   : > { %4699 = vmatpush.bf16.msra.mxu3 %v6708_v8  ;;  %v4436_v53 = vpop.f32.mrf.mxu2 }
 0x38b   : > { %v4422_v7 = vadd.f32 %v4421_v54, %v4409_v57 }
 0x38c   : > { %v4462_v11 = vpop.f32.mrf.mxu0 }
 0x38d   : > { %4676 = vmatpush.bf16.msra.mxu1 %v6689_v55  ;;  %4692 = vmatpush.bf16.msra.mxu2 %v6694_v24  ;;  %v4435_v28 = vadd.f32 %v4434_v34, %v4422_v7 }
 0x38e   : > { %4700 = vmatpush.bf16.msra.mxu3 %v6707_v44  ;;  %v4397_v45 = vpop.f32.mrf.mxu3 }
 0x390   : > { %4693 = vmatmul.bf16.vlgmr.msra.gmra.mxu2 %v2549_v19  ;;  %v4423_v63 = vpop.f32.mrf.mxu1 }
 0x391   : > { %4677 = vmatpush.bf16.msra.mxu1 %v6688_v61  ;;  %v4739_v63 = vld [vmem:[%s8237_s10] sm:$0xff] (%p6907_p6) }
 0x392   : > { %4701 = vmatpush.bf16.msra.mxu3 %v6706_v37  ;;  %4740 = vst [vmem:[%s9177_s19] sm:$0xff] (%p6907_p6), %v4739_v63 }
 0x395   : > { %4678 = vmatpush.bf16.msra.mxu1 %v6687_v18  ;;  %v4486_v12 = vpop.f32.mrf.mxu2 }
 0x396   : > { %4702 = vmatpush.bf16.msra.mxu3 %v6705_v56  ;;  %v4447_v62 = vpop.f32.mrf.mxu3 }
 0x397   : > { %v4448_v48 = vadd.f32 %v4447_v62, %v4435_v28  ;;  %v4745_v62 = vld [vmem:[%s8237_s10 + $0x18] sm:$0xff] (%p6907_p6) }
 0x398   : > { %v4473_v5 = vpop.f32.mrf.mxu1  ;;  %4746 = vst [vmem:[%s9177_s19 + $0x28] sm:$0xff] (%p6907_p6), %v4745_v62 }
 0x399   : > { %4679 = vmatpush.bf16.msra.mxu1 %v6686_v21  ;;  %v4461_v35 = vadd.f32 %v4460_v52, %v4448_v48  ;;  %v4747_v48 = vld [vmem:[%s8237_s10 + $0x20] sm:$0xff] (%p6907_p6) }
 0x39a   : > { %4703 = vmatpush.bf16.msra.mxu3 %v6704_v29  ;;  %4748 = vst [vmem:[%s9177_s19 + $0x40] sm:$0xff] (%p6907_p6), %v4747_v48 }
 0x39b   : > { %v4474_v0 = vadd.f32 %v4473_v5, %v4461_v35  ;;  %v4751_v5 = vld [vmem:[%s8237_s10 + $0x30] sm:$0xff] (%p6907_p6)  ;;  %v4753_v35 = vld [vmem:[%s8237_s10 + $0x38] sm:$0xff] (%p6907_p6) }
 0x39c   : > { %4680 = vmatmul.bf16.vlgmr.msra.gmra.mxu1 %v2548_v58  ;;  %4752 = vst [vmem:[%s9177_s19 + $0x60] sm:$0xff] (%p6907_p6), %v4751_v5 }
 0x39d   : > { %v4488_v41 = vpop.f32.mrf.mxu2  ;;  %v4487_v16 = vadd.f32 %v4486_v12, %v4474_v0  ;;  %v4741_v12 = vld [vmem:[%s8237_s10 + $0x8] sm:$0xff] (%p6907_p6)  ;;  %v4755_v0 = vld [vmem:[%s8237_s10 + $0x40] sm:$0xff] (%p6907_p6)  ;;  %4754 = vst [vmem:[%s9177_s19 + $0x68] sm:$0xff] (%p6907_p6), %v4753_v35 }
 0x39e   : > { %4704 = vmatpush.bf16.msra.mxu3 %v6703_v30  ;;  %v4449_v13 = vpop.f32.mrf.mxu3  ;;  %4742 = vst [vmem:[%s9177_s19 + $0x8] sm:$0xff] (%p6907_p6), %v4741_v12  ;;  %v4757_v41 = vld [vmem:[%s8237_s10 + $0x48] sm:$0xff] (%p6907_p6) }
 0x39f   : > { %4756 = vst [vmem:[%s9177_s19 + $0x80] sm:$0xff] (%p6907_p6), %v4755_v0  ;;  %v4761_v13 = vld [vmem:[%s8237_s10 + $0x58] sm:$0xff] (%p6907_p6) }
 0x3a0   : > { %v4475_v46 = vpop.f32.mrf.mxu1  ;;  %4758 = vst [vmem:[%s9177_s19 + $0x88] sm:$0xff] (%p6907_p6), %v4757_v41 }
 0x3a1   : > { %v4763_v46 = vld [vmem:[%s8237_s10 + $0x60] sm:$0xff] (%p6907_p6)  ;;  %4762 = vst [vmem:[%s9177_s19 + $0xa8] sm:$0xff] (%p6907_p6), %v4761_v13 }
 0x3a2   : > { %4705 = vmatpush.bf16.msra.mxu3 %v6702_v15  ;;  %v4743_v15 = vld [vmem:[%s8237_s10 + $0x10] sm:$0xff] (%p6907_p6)  ;;  %4764 = vst [vmem:[%s9177_s19 + $0xc0] sm:$0xff] (%p6907_p6), %v4763_v46 }
 0x3a3   : > { %4744 = vst [vmem:[%s9177_s19 + $0x20] sm:$0xff] (%p6907_p6), %v4743_v15 }
 0x3a4   : > { %v4512_v6 = vpop.f32.mrf.mxu0 }
 0x3a5   : > { %4706 = vmatmul.bf16.vlgmr.msra.gmra.mxu3 %v2550_v27  ;;  %v4749_v27 = vld [vmem:[%s8237_s10 + $0x28] sm:$0xff] (%p6907_p6) }
 0x3a6   : > { %4750 = vst [vmem:[%s9177_s19 + $0x48] sm:$0xff] (%p6907_p6), %v4749_v27 }
 0x3a9   : > { %v4499_v22 = vpop.f32.mrf.mxu3 }
 0x3aa   : > { %v4500_v47 = vadd.f32 %v4499_v22, %v4487_v16  ;;  %v4759_v16 = vld [vmem:[%s8237_s10 + $0x50] sm:$0xff] (%p6907_p6) }
 0x3ab   : > { %4760 = vst [vmem:[%s9177_s19 + $0xa0] sm:$0xff] (%p6907_p6), %v4759_v16  ;;  %v4767_v22 = vld [vmem:[%s8237_s10 + $0x70] sm:$0xff] (%p6907_p6) }
 0x3ac   : > { %v4514_v26 = vpop.f32.mrf.mxu0  ;;  %v4513_v32 = vadd.f32 %v4512_v6, %v4500_v47  ;;  %v4765_v6 = vld [vmem:[%s8237_s10 + $0x68] sm:$0xff] (%p6907_p6)  ;;  %v4769_v47 = vld [vmem:[%s8237_s10 + $0x78] sm:$0xff] (%p6907_p6)  ;;  %4768 = vst [vmem:[%s9177_s19 + $0xe0] sm:$0xff] (%p6907_p6), %v4767_v22 }
 0x3ad   : > { %4766 = vst [vmem:[%s9177_s19 + $0xc8] sm:$0xff] (%p6907_p6), %v4765_v6  ;;  %v4771_v26 = vld [vmem:[%s8237_s10 + $0x80] sm:$0xff] (%p6907_p6) }
 0x3ae   : > { %4770 = vst [vmem:[%s9177_s19 + $0xe8] sm:$0xff] (%p6907_p6), %v4769_v47 }
 0x3af   : > { %4772 = vst [vmem:[%s9177_s19 + $0x100] sm:$0xff] (%p6907_p6), %v4771_v26 }
 0x3b1   : > { %v4501_v31 = vpop.f32.mrf.mxu3 }
 0x3b2   : > { %v4775_v31 = vld [vmem:[%s8237_s10 + $0x90] sm:$0xff] (%p6907_p6) }
 0x3b3   : > { %v4538_v20 = vpop.f32.mrf.mxu2  ;;  %4776 = vst [vmem:[%s9177_s19 + $0x120] sm:$0xff] (%p6907_p6), %v4775_v31 }
 0x3b9   : > { %v4525_v3 = vpop.f32.mrf.mxu1 }
 0x3ba   : > { %v4526_v2 = vadd.f32 %v4525_v3, %v4513_v32  ;;  %v4773_v32 = vld [vmem:[%s8237_s10 + $0x88] sm:$0xff] (%p6907_p6)  ;;  %v4779_v3 = vld [vmem:[%s8237_s10 + $0xa0] sm:$0xff] (%p6907_p6) }
 0x3bb   : > { %v4540_v42 = vpop.f32.mrf.mxu2  ;;  %4774 = vst [vmem:[%s9177_s19 + $0x108] sm:$0xff] (%p6907_p6), %v4773_v32 }
 0x3bc   : > { %v4539_v50 = vadd.f32 %v4538_v20, %v4526_v2  ;;  %v4777_v20 = vld [vmem:[%s8237_s10 + $0x98] sm:$0xff] (%p6907_p6)  ;;  %v4781_v2 = vld [vmem:[%s8237_s10 + $0xa8] sm:$0xff] (%p6907_p6)  ;;  %v4783_v42 = vld [vmem:[%s8237_s10 + $0xb0] sm:$0xff] (%p6907_p6)  ;;  %4780 = vst [vmem:[%s9177_s19 + $0x140] sm:$0xff] (%p6907_p6), %v4779_v3 }
 0x3bd   : > { %4778 = vst [vmem:[%s9177_s19 + $0x128] sm:$0xff] (%p6907_p6), %v4777_v20 }
 0x3be   : > { %4782 = vst [vmem:[%s9177_s19 + $0x148] sm:$0xff] (%p6907_p6), %v4781_v2 }
 0x3bf   : > { %4784 = vst [vmem:[%s9177_s19 + $0x160] sm:$0xff] (%p6907_p6), %v4783_v42 }
 0x3c1   : > { %v4527_v39 = vpop.f32.mrf.mxu1 }
 0x3c2   : > { %v4787_v39 = vld [vmem:[%s8237_s10 + $0xc0] sm:$0xff] (%p6907_p6) }
 0x3c3   : > { %4788 = vst [vmem:[%s9177_s19 + $0x180] sm:$0xff] (%p6907_p6), %v4787_v39 }
 0x3c4   : > { %v4564_v23 = vpop.f32.mrf.mxu0 }
 0x3ca   : > { %v4551_v59 = vpop.f32.mrf.mxu3 }
 0x3cb   : > { %v4552_v43 = vadd.f32 %v4551_v59, %v4539_v50  ;;  %v4785_v50 = vld [vmem:[%s8237_s10 + $0xb8] sm:$0xff] (%p6907_p6)  ;;  %v4791_v59 = vld [vmem:[%s8237_s10 + $0xd0] sm:$0xff] (%p6907_p6) }
 0x3cc   : > { %v4566_v40 = vpop.f32.mrf.mxu0  ;;  %4786 = vst [vmem:[%s9177_s19 + $0x168] sm:$0xff] (%p6907_p6), %v4785_v50 }
 0x3cd   : > { %v4565_v17 = vadd.f32 %v4564_v23, %v4552_v43  ;;  %v4789_v23 = vld [vmem:[%s8237_s10 + $0xc8] sm:$0xff] (%p6907_p6)  ;;  %v4793_v43 = vld [vmem:[%s8237_s10 + $0xd8] sm:$0xff] (%p6907_p6)  ;;  %v4795_v40 = vld [vmem:[%s8237_s10 + $0xe0] sm:$0xff] (%p6907_p6)  ;;  %4792 = vst [vmem:[%s9177_s19 + $0x1a0] sm:$0xff] (%p6907_p6), %v4791_v59 }
 0x3ce   : > { %4790 = vst [vmem:[%s9177_s19 + $0x188] sm:$0xff] (%p6907_p6), %v4789_v23 }
 0x3cf   : > { %4794 = vst [vmem:[%s9177_s19 + $0x1a8] sm:$0xff] (%p6907_p6), %v4793_v43 }
 0x3d0   : > { %4796 = vst [vmem:[%s9177_s19 + $0x1c0] sm:$0xff] (%p6907_p6), %v4795_v40 }
 0x3d2   : > { %v4553_v10 = vpop.f32.mrf.mxu3 }
 0x3d3   : > { %v4590_v36 = vpop.f32.mrf.mxu2  ;;  %v4799_v10 = vld [vmem:[%s8237_s10 + $0xf0] sm:$0xff] (%p6907_p6) }
 0x3d4   : > { %4800 = vst [vmem:[%s9177_s19 + $0x1e0] sm:$0xff] (%p6907_p6), %v4799_v10 }
 0x3d9   : > { %v4577_v33 = vpop.f32.mrf.mxu1 }
 0x3da   : > { %v4578_v61 = vadd.f32 %v4577_v33, %v4565_v17  ;;  %v4797_v17 = vld [vmem:[%s8237_s10 + $0xe8] sm:$0xff] (%p6907_p6) }
 0x3db   : > { %v4592_v60 = vpop.f32.mrf.mxu2  ;;  %4798 = vst [vmem:[%s9177_s19 + $0x1c8] sm:$0xff] (%p6907_p6), %v4797_v17 }
 0x3dc   : > { %v4591_v19 = vadd.f32 %v4590_v36, %v4578_v61  ;;  %v4801_v36 = vld [vmem:[%s8237_s10 + $0xf8] sm:$0xff] (%p6907_p6) }
 0x3dd   : > { %4802 = vst [vmem:[%s9177_s19 + $0x1e8] sm:$0xff] (%p6907_p6), %v4801_v36 }
 0x3e1   : > { %v4579_v4 = vpop.f32.mrf.mxu1 }
 0x3e4   : > { %v4616_v14 = vpop.f32.mrf.mxu0 }
 0x3ea   : > { %v4603_v8 = vpop.f32.mrf.mxu3 }
 0x3eb   : > { %v4604_v52 = vadd.f32 %v4603_v8, %v4591_v19 }
 0x3ec   : > { %v4618_v49 = vpop.f32.mrf.mxu0 }
 0x3ed   : > { %v4617_v1 = vadd.f32 %v4616_v14, %v4604_v52 }
 0x3f2   : > { %v4605_v51 = vpop.f32.mrf.mxu3 }
 0x3f3   : > { %v4642_v55 = vpop.f32.mrf.mxu2 }
 0x3f9   : > { %v4629_v24 = vpop.f32.mrf.mxu1 }
 0x3fa   : > { %v4630_v56 = vadd.f32 %v4629_v24, %v4617_v1 }
 0x3fb   : > { %v4644_v44 = vpop.f32.mrf.mxu2 }
 0x3fc   : > { %v4643_v57 = vadd.f32 %v4642_v55, %v4630_v56 }
 0x401   : > { %v4631_v9 = vpop.f32.mrf.mxu1 }
 0x404   : > { %v4668_v34 = vpop.f32.mrf.mxu0 }
 0x40a   : > { %v4655_v37 = vpop.f32.mrf.mxu3 }
 0x40b   : > { %v4656_v21 = vadd.f32 %v4655_v37, %v4643_v57 }
 0x40c   : > { %v4670_v38 = vpop.f32.mrf.mxu0 }
 0x40d   : > { %v4669_v7 = vadd.f32 %v4668_v34, %v4656_v21 }
 0x412   : > { %v4657_v25 = vpop.f32.mrf.mxu3 }
 0x413   : > { %v4694_v18 = vpop.f32.mrf.mxu2 }
 0x419   : > { %v4681_v54 = vpop.f32.mrf.mxu1 }
 0x41a   : > { %v4682_v11 = vadd.f32 %v4681_v54, %v4669_v7 }
 0x41b   : > { %v4696_v53 = vpop.f32.mrf.mxu2 }
 0x41c   : > { %v4695_v28 = vadd.f32 %v4694_v18, %v4682_v11 }
 0x421   : > { %v4683_v29 = vpop.f32.mrf.mxu1 }
 0x428   : > { %v4707_v45 = vpop.f32.mrf.mxu3 }
 0x429   : > { %v4708_v58 = vadd.f32 %v4707_v45, %v4695_v28 }
 0x42b   : > { %4711 = vst [vmem:[%s9165_s18] sm:$0xff] %v4708_v58 }
 0x42c   : > { %4723 = sbr.rel (!%p6907_p6) target bundleno = 1073 (0x431), region = 90 }
 0x430   : > { %v4709_v30 = vpop.f32.mrf.mxu3 }
 0x431 PF: > { %s6363_s20 = sshll.u32 %s6889_s9, 3  ;;  %s4814_s22 = sshll.u32 %s9165_s18, 4  ;;  %s4815_s22 = int_to_ptr.vmem [resolvable:$true] %s4814_s22 }
 0x432   : > { %s4812_s25 = scalar_lea.hbm %s9284_s8, %s6363_s20  ;;  %s6777_s12 = scalar_lea.hbm %s9284_s8, 16 }
 0x433   : > { %s4816_s13 = sshll.u32 %s4812_s25, 4  ;;  %s4817_s13 = int_to_ptr.hbm [resolvable:$true] %s4816_s13 }
 0x434   : > { %s6771_s26 = sshra.s32 %s4817_s13, 4  ;;  %s6772_s26 = int_to_ptr.hbm [resolvable:$true] %s6771_s26 }
 0x435   : > { %s6773_s17 = scalar_lea.hbm %s6772_s26, 8  ;;  %p6778_p2 = scmp.lt.s32.totalorder %s6772_s26, %s9284_s8 }
 0x436   : > { %p6774_p13 = scmp.ne.s32.totalorder %s6772_s26, %s6773_s17  ;;  %p6779_p3 = scmp.lt.s32.totalorder %s6777_s12, %s6773_s17 }
 0x438   : > { %p6775_p0 = pnand %p6774_p13, %p6907_p6  ;;  %p6780_p4 = por %p6779_p3, %p6778_p2 }
 0x43a   : > { %p6776_p1 = pneg %p6775_p0 }
 0x43c   : > { %p6781_p5 = pnand %p6780_p4, %p6776_p1 }
 0x43e   : > { %6784 = shalt.err (!%p6781_p5)
}
 0x43f   : > { %s9289_s20 = scalar_lea.sflag [#allocation5], %s7126_s21 }
 0x440   : > { %6711 = dma.vmem_to_hbm [thread:$0]  (%p6907_p6), %s4815_s22, 128, %s4817_s13, %s9289_s20  }
 0x441 PF: > { %s4835_s23 = sand.u32 1, %s6807_s27   ;;  %p6714_p7 = pnand %p4912_p9, %p6911_p8 }
 0x442   : > { %s4836_s24 = scalar_lea.sflag [#allocation5], %s4835_s23 }
 0x443   : > { %p6715_p10 = pneg %p6714_p7 }
 0x445   : > { %6802 = dma.done.wait (%p6715_p10), %s4836_s24, 128  }
 0x446   : > { %6804 = vsyncadd (%p6715_p10), %s4836_s24, 4294967168  ;;  %p19_p11 = scmp.ge.s32.totalorder %s6893_s11, 4   ;;  %s9290_s27 = smov %s6811_s28 }
 0x447   : > { %s9291_s28 = smov %s6815_s29  ;;  %s9292_s29 = smov %s6905_s14 }
 0x448   : > { %s9293_s30 = smov %s6893_s11  ;;  %21 = sbr.rel (!%p19_p11) target bundleno = 3 (0x3), region = 161 }
 0x44d   :  { %4842 = vsyncpa [#allocation5], 1 }
 0x44e   :  { %4844 = vsyncpa [#allocation5 + $0x1], 1 }

</bundles_post_ra>
